<compile_context>
chip_gen: v7x
topology: tpu7x:2x2x1
jax: 0.10.0
libtpu: 0.0.40
codegen_flags: <defaults>
</compile_context>

<pallas_src>
import math
from functools import partial

import jax
import jax.numpy as jnp
from jax.experimental import pallas as pl
from jax.experimental.pallas import tpu as pltpu


# ----------------------------------------------------------------------------
# In-kernel helpers (arrays are already-loaded activations, weights are Refs)
# ----------------------------------------------------------------------------

def _dot(a, b):
    """bf16-operand / f32-accumulate MXU matmul."""
    return jnp.dot(a.astype(jnp.bfloat16), b.astype(jnp.bfloat16),
                   preferred_element_type=jnp.float32)


def _layer_norm(x, g_ref, b_ref, eps):
    mean = jnp.mean(x, axis=-1, keepdims=True)
    var = jnp.mean((x - mean) ** 2, axis=-1, keepdims=True)
    y = (x - mean) * jax.lax.rsqrt(var + eps)
    return y * g_ref[...].astype(jnp.float32) + b_ref[...].astype(jnp.float32)


def _mha(xq, xkv, wq_ref, wk_ref, wv_ref, wo_ref,
         bq_ref, bk_ref, bv_ref, bo_ref, *, num_heads, scale):
    """Multi-head attention for one batch element, all heads fused in-kernel.

    xq: (Tq, D) f32,  xkv: (Tk, D) f32.
    wq/wk/wv: (H, D, dh) bf16,  wo: (H, dh, D) bf16,
    bq/bk/bv: (H, 1, dh) f32,   bo: (1, D) f32.
    Per-head weight slabs avoid in-kernel lane reshapes; the output projection
    is accumulated as sum_h o_h @ wo[h] (== concat(o_h) @ Wo).
    """
    Tq, D = xq.shape
    xq_b = xq.astype(jnp.bfloat16)
    xkv_b = xkv.astype(jnp.bfloat16)
    out = jnp.zeros((Tq, D), jnp.float32)
    for h in range(num_heads):                       # unrolled at trace time
        q = _dot(xq_b, wq_ref[h]) + bq_ref[h].astype(jnp.float32)    # (Tq, dh)
        k = _dot(xkv_b, wk_ref[h]) + bk_ref[h].astype(jnp.float32)   # (Tk, dh)
        v = _dot(xkv_b, wv_ref[h]) + bv_ref[h].astype(jnp.float32)   # (Tk, dh)
        # scores (Tq, Tk): contract on dh of both operands (rhs transposed).
        s = jax.lax.dot_general(
            q.astype(jnp.bfloat16), k.astype(jnp.bfloat16),
            dimension_numbers=(((1,), (1,)), ((), ())),
            preferred_element_type=jnp.float32) * scale
        s = s - jnp.max(s, axis=-1, keepdims=True)
        p = jnp.exp(s)
        p = p * pl.reciprocal(jnp.sum(p, axis=-1, keepdims=True), approx=True)
        o = _dot(p, v)                               # (Tq, dh)
        out = out + _dot(o, wo_ref[h])               # accumulate O-projection
    return out + bo_ref[...].astype(jnp.float32)


def _ffn(x, w1_ref, b1_ref, w2_ref, b2_ref):
    h = _dot(x, w1_ref[...]) + b1_ref[...].astype(jnp.float32)
    h = jnp.maximum(h, 0.0)
    return _dot(h, w2_ref[...]) + b2_ref[...].astype(jnp.float32)


# ----------------------------------------------------------------------------
# Fused layer kernels (one batch element per grid step)
# ----------------------------------------------------------------------------

def _encoder_layer_kernel(x_ref,
                          wq, wk, wv, wo, bq, bk, bv, bo,
                          ln1_g, ln1_b,
                          fw1, fb1, fw2, fb2,
                          ln2_g, ln2_b,
                          o_ref, *, num_heads, scale, eps):
    x = x_ref[0].astype(jnp.float32)                 # (T, D)
    attn = _mha(x, x, wq, wk, wv, wo, bq, bk, bv, bo,
                num_heads=num_heads, scale=scale)
    x = _layer_norm(x + attn, ln1_g, ln1_b, eps)
    ff = _ffn(x, fw1, fb1, fw2, fb2)
    x = _layer_norm(x + ff, ln2_g, ln2_b, eps)
    o_ref[0] = x.astype(o_ref.dtype)


def _decoder_layer_kernel(enc_ref, x_ref,
                          s_wq, s_wk, s_wv, s_wo, s_bq, s_bk, s_bv, s_bo,
                          ln1_g, ln1_b,
                          c_wq, c_wk, c_wv, c_wo, c_bq, c_bk, c_bv, c_bo,
                          ln2_g, ln2_b,
                          fw1, fb1, fw2, fb2,
                          ln3_g, ln3_b,
                          o_ref, *, num_heads, scale, eps):
    enc = enc_ref[0].astype(jnp.float32)             # (Tsrc, D)
    x = x_ref[0].astype(jnp.float32)                 # (Ttgt, D)
    attn = _mha(x, x, s_wq, s_wk, s_wv, s_wo, s_bq, s_bk, s_bv, s_bo,
                num_heads=num_heads, scale=scale)
    x = _layer_norm(x + attn, ln1_g, ln1_b, eps)
    cross = _mha(x, enc, c_wq, c_wk, c_wv, c_wo, c_bq, c_bk, c_bv, c_bo,
                 num_heads=num_heads, scale=scale)
    x = _layer_norm(x + cross, ln2_g, ln2_b, eps)
    ff = _ffn(x, fw1, fb1, fw2, fb2)
    x = _layer_norm(x + ff, ln3_g, ln3_b, eps)
    o_ref[0] = x.astype(o_ref.dtype)


def _projection_kernel(x_ref, w_ref, b_ref, o_ref):
    x = x_ref[0].astype(jnp.float32)                 # (T, D)
    y = _dot(x, w_ref[...]) + b_ref[...].astype(jnp.float32)   # (T, V) lane-dense
    o_ref[0] = y.astype(o_ref.dtype)


# ----------------------------------------------------------------------------
# pallas_call wrappers
# ----------------------------------------------------------------------------

_PARALLEL = pltpu.CompilerParams(dimension_semantics=("parallel",))


def _full_spec(shape):
    nd = len(shape)
    return pl.BlockSpec(shape, lambda b, _nd=nd: (0,) * _nd)


def encoder_layer(x, p, *, num_heads, eps=1e-5):
    B, T, D = x.shape
    scale = 1.0 / math.sqrt(D // num_heads)
    a = p["self_attn"]
    weights = [a["wq"], a["wk"], a["wv"], a["wo"], a["bq"], a["bk"], a["bv"], a["bo"],
               p["ln1_g"], p["ln1_b"],
               p["ff_w1"], p["ff_b1"], p["ff_w2"], p["ff_b2"],
               p["ln2_g"], p["ln2_b"]]
    return pl.pallas_call(
        partial(_encoder_layer_kernel, num_heads=num_heads, scale=scale, eps=eps),
        out_shape=jax.ShapeDtypeStruct((B, T, D), x.dtype),
        grid=(B,),
        in_specs=[pl.BlockSpec((1, T, D), lambda b: (b, 0, 0))]
                 + [_full_spec(w.shape) for w in weights],
        out_specs=pl.BlockSpec((1, T, D), lambda b: (b, 0, 0)),
        compiler_params=_PARALLEL,
    )(x, *weights)


def decoder_layer(enc_out, x, p, *, num_heads, eps=1e-5):
    B, Tt, D = x.shape
    Ts = enc_out.shape[1]
    scale = 1.0 / math.sqrt(D // num_heads)
    sa, ca = p["self_attn"], p["cross_attn"]
    weights = [sa["wq"], sa["wk"], sa["wv"], sa["wo"],
               sa["bq"], sa["bk"], sa["bv"], sa["bo"],
               p["ln1_g"], p["ln1_b"],
               ca["wq"], ca["wk"], ca["wv"], ca["wo"],
               ca["bq"], ca["bk"], ca["bv"], ca["bo"],
               p["ln2_g"], p["ln2_b"],
               p["ff_w1"], p["ff_b1"], p["ff_w2"], p["ff_b2"],
               p["ln3_g"], p["ln3_b"]]
    return pl.pallas_call(
        partial(_decoder_layer_kernel, num_heads=num_heads, scale=scale, eps=eps),
        out_shape=jax.ShapeDtypeStruct((B, Tt, D), x.dtype),
        grid=(B,),
        in_specs=[pl.BlockSpec((1, Ts, D), lambda b: (b, 0, 0)),
                  pl.BlockSpec((1, Tt, D), lambda b: (b, 0, 0))]
                 + [_full_spec(w.shape) for w in weights],
        out_specs=pl.BlockSpec((1, Tt, D), lambda b: (b, 0, 0)),
        compiler_params=_PARALLEL,
    )(enc_out, x, *weights)


def project(x, w, b):
    B, T, D = x.shape
    V = w.shape[1]
    return pl.pallas_call(
        _projection_kernel,
        out_shape=jax.ShapeDtypeStruct((B, T, V), jnp.float32),
        grid=(B,),
        in_specs=[pl.BlockSpec((1, T, D), lambda i: (i, 0, 0)),
                  _full_spec(w.shape), _full_spec(b.shape)],
        out_specs=pl.BlockSpec((1, T, V), lambda i: (i, 0, 0)),
        compiler_params=_PARALLEL,
    )(x, w, b)


# ----------------------------------------------------------------------------
# Model forward (glue in plain JAX: embedding gather + positional encoding)
# ----------------------------------------------------------------------------

def sinusoidal_pos_encoding(seq_len, d_model, dtype=jnp.float32):
    pos = jnp.arange(seq_len, dtype=jnp.float32)[:, None]
    div = jnp.exp(jnp.arange(0, d_model, 2, dtype=jnp.float32)
                  * (-math.log(10000.0) / d_model))
    pe = jnp.zeros((seq_len, d_model), dtype=jnp.float32)
    pe = pe.at[:, 0::2].set(jnp.sin(pos * div))
    pe = pe.at[:, 1::2].set(jnp.cos(pos * div))
    return pe.astype(dtype)


def seq2seq_forward(params, source_ids, target_ids, *, num_heads):
    src_emb = params["embedding"][source_ids]
    tgt_emb = params["embedding"][target_ids]
    pe = params["pos_enc"]

    # Encoder
    x = src_emb + pe[: src_emb.shape[1]][None]
    for lp in params["encoder_layers"]:
        x = encoder_layer(x, lp, num_heads=num_heads)
    enc_out = x

    # Decoder
    y = tgt_emb + pe[: tgt_emb.shape[1]][None]
    for lp in params["decoder_layers"]:
        y = decoder_layer(enc_out, y, lp, num_heads=num_heads)

    # Final projection to vocab
    return project(y, params["proj_w"], params["proj_b"])


# ----------------------------------------------------------------------------
# Deterministic parameter initialization (matmul weights stored bf16, per-head
# layout; biases / LayerNorm params / embedding in f32)
# ----------------------------------------------------------------------------

_STD = 0.02


def _w(key, shape):
    return (jax.random.normal(key, shape, jnp.float32) * _STD).astype(jnp.bfloat16)


def _init_mha(key, d_model, num_heads):
    dh = d_model // num_heads
    ks = jax.random.split(key, 4)
    return {
        "wq": _w(ks[0], (num_heads, d_model, dh)),
        "wk": _w(ks[1], (num_heads, d_model, dh)),
        "wv": _w(ks[2], (num_heads, d_model, dh)),
        "wo": _w(ks[3], (num_heads, dh, d_model)),
        "bq": jnp.zeros((num_heads, 1, dh), jnp.float32),
        "bk": jnp.zeros((num_heads, 1, dh), jnp.float32),
        "bv": jnp.zeros((num_heads, 1, dh), jnp.float32),
        "bo": jnp.zeros((1, d_model), jnp.float32),
    }


def _init_ffn_ln(key, d_model, d_ff, num_ln):
    k1, k2 = jax.random.split(key, 2)
    out = {
        "ff_w1": _w(k1, (d_model, d_ff)),
        "ff_b1": jnp.zeros((1, d_ff), jnp.float32),
        "ff_w2": _w(k2, (d_ff, d_model)),
        "ff_b2": jnp.zeros((1, d_model), jnp.float32),
    }
    for i in range(1, num_ln + 1):
        out[f"ln{i}_g"] = jnp.ones((1, d_model), jnp.float32)
        out[f"ln{i}_b"] = jnp.zeros((1, d_model), jnp.float32)
    return out


def _init_encoder_layer(key, d_model, d_ff, num_heads):
    k1, k2 = jax.random.split(key, 2)
    p = {"self_attn": _init_mha(k1, d_model, num_heads)}
    p.update(_init_ffn_ln(k2, d_model, d_ff, num_ln=2))
    return p


def _init_decoder_layer(key, d_model, d_ff, num_heads):
    k1, k2, k3 = jax.random.split(key, 3)
    p = {"self_attn": _init_mha(k1, d_model, num_heads),
         "cross_attn": _init_mha(k2, d_model, num_heads)}
    p.update(_init_ffn_ln(k3, d_model, d_ff, num_ln=3))
    return p


def init_params(key, *, num_encoders, num_decoders, d_model, d_ff,
                num_heads, num_tokens, seq_len):
    keys = jax.random.split(key, 2 + num_encoders + num_decoders)
    return {
        "embedding": jax.random.normal(keys[0], (num_tokens, d_model), jnp.float32) * _STD,
        "pos_enc": sinusoidal_pos_encoding(seq_len, d_model),
        "encoder_layers": [
            _init_encoder_layer(keys[2 + i], d_model, d_ff, num_heads)
            for i in range(num_encoders)
        ],
        "decoder_layers": [
            _init_decoder_layer(keys[2 + num_encoders + i], d_model, d_ff, num_heads)
            for i in range(num_decoders)
        ],
        "proj_w": _w(keys[1], (d_model, num_tokens)),
        "proj_b": jnp.zeros((1, num_tokens), jnp.float32),
    }


# ----------------------------------------------------------------------------
# Main
# ----------------------------------------------------------------------------

if __name__ == "__main__":
    batch = 2
    seq_len = 16
    d_model = 64
    num_heads = 4
    d_ff = 128
    num_encoders = 2
    num_decoders = 2
    num_tokens = 512

    root = jax.random.PRNGKey(0)
    kp, ks, kt = jax.random.split(root, 3)

    params = init_params(
        kp,
        num_encoders=num_encoders,
        num_decoders=num_decoders,
        d_model=d_model,
        d_ff=d_ff,
        num_heads=num_heads,
        num_tokens=num_tokens,
        seq_len=seq_len,
    )

    source = jax.random.randint(ks, (batch, seq_len), 0, num_tokens, dtype=jnp.int32)
    target = jax.random.randint(kt, (batch, seq_len), 0, num_tokens, dtype=jnp.int32)

    fwd = jax.jit(partial(seq2seq_forward, num_heads=num_heads))
    logits = fwd(params, source, target)
    jax.block_until_ready(logits)

    assert logits.shape == (batch, seq_len, num_tokens), logits.shape
    assert bool(jnp.all(jnp.isfinite(logits)))
    print("KERNEL_OK")
</pallas_src>

<mosaic_0001>
module attributes {stable_mosaic.version = 11 : i64} {
  func.func @_projection_kernel(%arg0: i32, %arg1: memref<1x16x64xf32, #tpu.memory_space<vmem>>, %arg2: memref<64x512xbf16, #tpu.memory_space<vmem>>, %arg3: memref<1x512xf32, #tpu.memory_space<vmem>>, %arg4: memref<1x16x512xf32, #tpu.memory_space<vmem>>) attributes {dimension_semantics = [#tpu.dimension_semantics<parallel>], iteration_bounds = array<i64: 2>, scalar_prefetch = 0 : i64, scratch_operands = 0 : i64, tpu.core_type = #tpu.core_type<tc>, window_params = [{transform_indices = @transform_0, window_bounds = array<i64: 1, 16, 64>}, {pipeline_mode = #tpu.pipeline_mode<synchronous>, transform_indices = @transform_1, window_bounds = array<i64: 64, 512>}, {pipeline_mode = #tpu.pipeline_mode<synchronous>, transform_indices = @transform_2, window_bounds = array<i64: 1, 512>}, {transform_indices = @transform_3, window_bounds = array<i64: 1, 16, 512>}]} {
    %c0 = arith.constant 0 : index
    %c0_0 = arith.constant 0 : index
    %c0_1 = arith.constant 0 : index
    %0 = vector.load %arg1[%c0, %c0_0, %c0_1] : memref<1x16x64xf32, #tpu.memory_space<vmem>>, vector<1x16x64xf32>
    %1 = vector.shape_cast %0 : vector<1x16x64xf32> to vector<16x64xf32>
    %c0_2 = arith.constant 0 : index
    %c0_3 = arith.constant 0 : index
    %2 = vector.load %arg2[%c0_2, %c0_3] : memref<64x512xbf16, #tpu.memory_space<vmem>>, vector<64x512xbf16>
    %3 = arith.truncf %1 : vector<16x64xf32> to vector<16x64xbf16>
    %cst = arith.constant dense<0.000000e+00> : vector<16x512xf32>
    %4 = tpu.matmul %3, %2, %cst {dimension_numbers = #tpu.dot_dimension_numbers<[1], [0], [0], [1], [0, 0, 1, 1], [], []>} : vector<16x64xbf16>, vector<64x512xbf16>, vector<16x512xf32> -> vector<16x512xf32>
    %c0_4 = arith.constant 0 : index
    %c0_5 = arith.constant 0 : index
    %5 = vector.load %arg3[%c0_4, %c0_5] : memref<1x512xf32, #tpu.memory_space<vmem>>, vector<1x512xf32>
    %6 = vector.broadcast %5 : vector<1x512xf32> to vector<16x512xf32>
    %7 = arith.addf %4, %6 : vector<16x512xf32>
    %c0_6 = arith.constant 0 : index
    %c0_7 = arith.constant 0 : index
    %c0_8 = arith.constant 0 : index
    %8 = vector.load %arg4[%c0_6, %c0_7, %c0_8] : memref<1x16x512xf32, #tpu.memory_space<vmem>>, vector<1x16x512xf32>
    %9 = vector.shape_cast %8 : vector<1x16x512xf32> to vector<16x512xf32>
    %10 = vector.shape_cast %7 : vector<16x512xf32> to vector<1x16x512xf32>
    tpu.vector_store %arg4[%c0_6, %c0_7, %c0_8], %10 {strides = array<i32>} : memref<1x16x512xf32, #tpu.memory_space<vmem>>, vector<1x16x512xf32>,
    return
  }
  func.func @transform_0(%arg0: i32) -> (i32, i32, i32) {
    %c0_i32 = arith.constant 0 : i32
    %c0_i32_0 = arith.constant 0 : i32
    %c0_i32_1 = arith.constant 0 : i32
    return %arg0, %c0_i32, %c0_i32_0 : i32, i32, i32
  }
  func.func @transform_1(%arg0: i32) -> (i32, i32) {
    %c0_i32 = arith.constant 0 : i32
    %c0_i32_0 = arith.constant 0 : i32
    %c0_i32_1 = arith.constant 0 : i32
    return %c0_i32, %c0_i32_0 : i32, i32
  }
  func.func @transform_2(%arg0: i32) -> (i32, i32) {
    %c0_i32 = arith.constant 0 : i32
    %c0_i32_0 = arith.constant 0 : i32
    %c0_i32_1 = arith.constant 0 : i32
    return %c0_i32, %c0_i32_0 : i32, i32
  }
  func.func @transform_3(%arg0: i32) -> (i32, i32, i32) {
    %c0_i32 = arith.constant 0 : i32
    %c0_i32_0 = arith.constant 0 : i32
    %c0_i32_1 = arith.constant 0 : i32
    return %arg0, %c0_i32, %c0_i32_0 : i32, i32, i32
  }
}

module attributes {stable_mosaic.version = 11 : i64} {
  func.func @_encoder_layer_kernel(%arg0: i32, %arg1: memref<1x16x64xf32, #tpu.memory_space<vmem>>, %arg2: memref<4x64x16xbf16, #tpu.memory_space<vmem>>, %arg3: memref<4x64x16xbf16, #tpu.memory_space<vmem>>, %arg4: memref<4x64x16xbf16, #tpu.memory_space<vmem>>, %arg5: memref<4x16x64xbf16, #tpu.memory_space<vmem>>, %arg6: memref<4x1x16xf32, #tpu.memory_space<vmem>>, %arg7: memref<4x1x16xf32, #tpu.memory_space<vmem>>, %arg8: memref<4x1x16xf32, #tpu.memory_space<vmem>>, %arg9: memref<1x64xf32, #tpu.memory_space<vmem>>, %arg10: memref<1x64xf32, #tpu.memory_space<vmem>>, %arg11: memref<1x64xf32, #tpu.memory_space<vmem>>, %arg12: memref<64x128xbf16, #tpu.memory_space<vmem>>, %arg13: memref<1x128xf32, #tpu.memory_space<vmem>>, %arg14: memref<128x64xbf16, #tpu.memory_space<vmem>>, %arg15: memref<1x64xf32, #tpu.memory_space<vmem>>, %arg16: memref<1x64xf32, #tpu.memory_space<vmem>>, %arg17: memref<1x64xf32, #tpu.memory_space<vmem>>, %arg18: memref<1x16x64xf32, #tpu.memory_space<vmem>>) attributes {dimension_semantics = [#tpu.dimension_semantics<parallel>], iteration_bounds = array<i64: 2>, scalar_prefetch = 0 : i64, scratch_operands = 0 : i64, tpu.core_type = #tpu.core_type<tc>, window_params = [{transform_indices = @transform_0, window_bounds = array<i64: 1, 16, 64>}, {pipeline_mode = #tpu.pipeline_mode<synchronous>, transform_indices = @transform_1, window_bounds = array<i64: 4, 64, 16>}, {pipeline_mode = #tpu.pipeline_mode<synchronous>, transform_indices = @transform_2, window_bounds = array<i64: 4, 64, 16>}, {pipeline_mode = #tpu.pipeline_mode<synchronous>, transform_indices = @transform_3, window_bounds = array<i64: 4, 64, 16>}, {pipeline_mode = #tpu.pipeline_mode<synchronous>, transform_indices = @transform_4, window_bounds = array<i64: 4, 16, 64>}, {pipeline_mode = #tpu.pipeline_mode<synchronous>, transform_indices = @transform_5, window_bounds = array<i64: 4, 1, 16>}, {pipeline_mode = #tpu.pipeline_mode<synchronous>, transform_indices = @transform_6, window_bounds = array<i64: 4, 1, 16>}, {pipeline_mode = #tpu.pipeline_mode<synchronous>, transform_indices = @transform_7, window_bounds = array<i64: 4, 1, 16>}, {pipeline_mode = #tpu.pipeline_mode<synchronous>, transform_indices = @transform_8, window_bounds = array<i64: 1, 64>}, {pipeline_mode = #tpu.pipeline_mode<synchronous>, transform_indices = @transform_9, window_bounds = array<i64: 1, 64>}, {pipeline_mode = #tpu.pipeline_mode<synchronous>, transform_indices = @transform_10, window_bounds = array<i64: 1, 64>}, {pipeline_mode = #tpu.pipeline_mode<synchronous>, transform_indices = @transform_11, window_bounds = array<i64: 64, 128>}, {pipeline_mode = #tpu.pipeline_mode<synchronous>, transform_indices = @transform_12, window_bounds = array<i64: 1, 128>}, {pipeline_mode = #tpu.pipeline_mode<synchronous>, transform_indices = @transform_13, window_bounds = array<i64: 128, 64>}, {pipeline_mode = #tpu.pipeline_mode<synchronous>, transform_indices = @transform_14, window_bounds = array<i64: 1, 64>}, {pipeline_mode = #tpu.pipeline_mode<synchronous>, transform_indices = @transform_15, window_bounds = array<i64: 1, 64>}, {pipeline_mode = #tpu.pipeline_mode<synchronous>, transform_indices = @transform_16, window_bounds = array<i64: 1, 64>}, {transform_indices = @transform_17, window_bounds = array<i64: 1, 16, 64>}]} {
    %c0 = arith.constant 0 : index
    %c0_0 = arith.constant 0 : index
    %c0_1 = arith.constant 0 : index
    %0 = vector.load %arg1[%c0, %c0_0, %c0_1] : memref<1x16x64xf32, #tpu.memory_space<vmem>>, vector<1x16x64xf32>
    %1 = vector.shape_cast %0 : vector<1x16x64xf32> to vector<16x64xf32>
    %2 = arith.truncf %1 : vector<16x64xf32> to vector<16x64xbf16>
    %3 = arith.truncf %1 : vector<16x64xf32> to vector<16x64xbf16>
    %cst = arith.constant 0.000000e+00 : f32
    %4 = vector.broadcast %cst : f32 to vector<16x64xf32>
    %c0_2 = arith.constant 0 : index
    %c0_3 = arith.constant 0 : index
    %c0_4 = arith.constant 0 : index
    %5 = vector.load %arg2[%c0_2, %c0_3, %c0_4] : memref<4x64x16xbf16, #tpu.memory_space<vmem>>, vector<1x64x16xbf16>
    %6 = vector.shape_cast %5 : vector<1x64x16xbf16> to vector<64x16xbf16>
    %cst_5 = arith.constant dense<0.000000e+00> : vector<16x16xf32>
    %7 = tpu.matmul %2, %6, %cst_5 {dimension_numbers = #tpu.dot_dimension_numbers<[1], [0], [0], [1], [0, 0, 1, 1], [], []>} : vector<16x64xbf16>, vector<64x16xbf16>, vector<16x16xf32> -> vector<16x16xf32>
    %c0_6 = arith.constant 0 : index
    %c0_7 = arith.constant 0 : index
    %c0_8 = arith.constant 0 : index
    %8 = vector.load %arg6[%c0_6, %c0_7, %c0_8] : memref<4x1x16xf32, #tpu.memory_space<vmem>>, vector<1x1x16xf32>
    %9 = vector.shape_cast %8 : vector<1x1x16xf32> to vector<1x16xf32>
    %10 = vector.broadcast %9 : vector<1x16xf32> to vector<16x16xf32>
    %11 = arith.addf %7, %10 : vector<16x16xf32>
    %c0_9 = arith.constant 0 : index
    %c0_10 = arith.constant 0 : index
    %c0_11 = arith.constant 0 : index
    %12 = vector.load %arg3[%c0_9, %c0_10, %c0_11] : memref<4x64x16xbf16, #tpu.memory_space<vmem>>, vector<1x64x16xbf16>
    %13 = vector.shape_cast %12 : vector<1x64x16xbf16> to vector<64x16xbf16>
    %cst_12 = arith.constant dense<0.000000e+00> : vector<16x16xf32>
    %14 = tpu.matmul %3, %13, %cst_12 {dimension_numbers = #tpu.dot_dimension_numbers<[1], [0], [0], [1], [0, 0, 1, 1], [], []>} : vector<16x64xbf16>, vector<64x16xbf16>, vector<16x16xf32> -> vector<16x16xf32>
    %c0_13 = arith.constant 0 : index
    %c0_14 = arith.constant 0 : index
    %c0_15 = arith.constant 0 : index
    %15 = vector.load %arg7[%c0_13, %c0_14, %c0_15] : memref<4x1x16xf32, #tpu.memory_space<vmem>>, vector<1x1x16xf32>
    %16 = vector.shape_cast %15 : vector<1x1x16xf32> to vector<1x16xf32>
    %17 = vector.broadcast %16 : vector<1x16xf32> to vector<16x16xf32>
    %18 = arith.addf %14, %17 : vector<16x16xf32>
    %c0_16 = arith.constant 0 : index
    %c0_17 = arith.constant 0 : index
    %c0_18 = arith.constant 0 : index
    %19 = vector.load %arg4[%c0_16, %c0_17, %c0_18] : memref<4x64x16xbf16, #tpu.memory_space<vmem>>, vector<1x64x16xbf16>
    %20 = vector.shape_cast %19 : vector<1x64x16xbf16> to vector<64x16xbf16>
    %cst_19 = arith.constant dense<0.000000e+00> : vector<16x16xf32>
    %21 = tpu.matmul %3, %20, %cst_19 {dimension_numbers = #tpu.dot_dimension_numbers<[1], [0], [0], [1], [0, 0, 1, 1], [], []>} : vector<16x64xbf16>, vector<64x16xbf16>, vector<16x16xf32> -> vector<16x16xf32>
    %c0_20 = arith.constant 0 : index
    %c0_21 = arith.constant 0 : index
    %c0_22 = arith.constant 0 : index
    %22 = vector.load %arg8[%c0_20, %c0_21, %c0_22] : memref<4x1x16xf32, #tpu.memory_space<vmem>>, vector<1x1x16xf32>
    %23 = vector.shape_cast %22 : vector<1x1x16xf32> to vector<1x16xf32>
    %24 = vector.broadcast %23 : vector<1x16xf32> to vector<16x16xf32>
    %25 = arith.addf %21, %24 : vector<16x16xf32>
    %26 = arith.truncf %11 : vector<16x16xf32> to vector<16x16xbf16>
    %27 = arith.truncf %18 : vector<16x16xf32> to vector<16x16xbf16>
    %cst_23 = arith.constant dense<0.000000e+00> : vector<16x16xf32>
    %28 = tpu.matmul %26, %27, %cst_23 {dimension_numbers = #tpu.dot_dimension_numbers<[1], [1], [0], [0], [0, 0, 1, 0], [], []>} : vector<16x16xbf16>, vector<16x16xbf16>, vector<16x16xf32> -> vector<16x16xf32>
    %cst_24 = arith.constant 2.500000e-01 : f32
    %29 = vector.broadcast %cst_24 : f32 to vector<16x16xf32>
    %30 = arith.mulf %28, %29 : vector<16x16xf32>
    %cst_25 = arith.constant dense<0xFF800000> : vector<16xf32>
    %31 = vector.multi_reduction <maximumf>, %30, %cst_25 [1] : vector<16x16xf32> to vector<16xf32>
    %32 = vector.shape_cast %31 : vector<16xf32> to vector<16x1xf32>
    %33 = vector.broadcast %32 : vector<16x1xf32> to vector<16x16xf32>
    %34 = arith.subf %30, %33 : vector<16x16xf32>
    %35 = math.exp %34 : vector<16x16xf32>
    %cst_26 = arith.constant dense<0.000000e+00> : vector<16xf32>
    %36 = vector.multi_reduction <add>, %35, %cst_26 [1] : vector<16x16xf32> to vector<16xf32>
    %37 = vector.shape_cast %36 : vector<16xf32> to vector<16x1xf32>
    %38 = tpu.reciprocal %37 {approx = true} : vector<16x1xf32> -> vector<16x1xf32>
    %39 = vector.broadcast %38 : vector<16x1xf32> to vector<16x16xf32>
    %40 = arith.mulf %35, %39 : vector<16x16xf32>
    %41 = arith.truncf %40 : vector<16x16xf32> to vector<16x16xbf16>
    %42 = arith.truncf %25 : vector<16x16xf32> to vector<16x16xbf16>
    %cst_27 = arith.constant dense<0.000000e+00> : vector<16x16xf32>
    %43 = tpu.matmul %41, %42, %cst_27 {dimension_numbers = #tpu.dot_dimension_numbers<[1], [0], [0], [1], [0, 0, 1, 1], [], []>} : vector<16x16xbf16>, vector<16x16xbf16>, vector<16x16xf32> -> vector<16x16xf32>
    %c0_28 = arith.constant 0 : index
    %c0_29 = arith.constant 0 : index
    %c0_30 = arith.constant 0 : index
    %44 = vector.load %arg5[%c0_28, %c0_29, %c0_30] : memref<4x16x64xbf16, #tpu.memory_space<vmem>>, vector<1x16x64xbf16>
    %45 = vector.shape_cast %44 : vector<1x16x64xbf16> to vector<16x64xbf16>
    %46 = arith.truncf %43 : vector<16x16xf32> to vector<16x16xbf16>
    %cst_31 = arith.constant dense<0.000000e+00> : vector<16x64xf32>
    %47 = tpu.matmul %46, %45, %cst_31 {dimension_numbers = #tpu.dot_dimension_numbers<[1], [0], [0], [1], [0, 0, 1, 1], [], []>} : vector<16x16xbf16>, vector<16x64xbf16>, vector<16x64xf32> -> vector<16x64xf32>
    %48 = arith.addf %4, %47 : vector<16x64xf32>
    %c1 = arith.constant 1 : index
    %c0_32 = arith.constant 0 : index
    %c0_33 = arith.constant 0 : index
    %49 = vector.load %arg2[%c1, %c0_32, %c0_33] : memref<4x64x16xbf16, #tpu.memory_space<vmem>>, vector<1x64x16xbf16>
    %50 = vector.shape_cast %49 : vector<1x64x16xbf16> to vector<64x16xbf16>
    %cst_34 = arith.constant dense<0.000000e+00> : vector<16x16xf32>
    %51 = tpu.matmul %2, %50, %cst_34 {dimension_numbers = #tpu.dot_dimension_numbers<[1], [0], [0], [1], [0, 0, 1, 1], [], []>} : vector<16x64xbf16>, vector<64x16xbf16>, vector<16x16xf32> -> vector<16x16xf32>
    %c1_35 = arith.constant 1 : index
    %c0_36 = arith.constant 0 : index
    %c0_37 = arith.constant 0 : index
    %52 = vector.load %arg6[%c1_35, %c0_36, %c0_37] : memref<4x1x16xf32, #tpu.memory_space<vmem>>, vector<1x1x16xf32>
    %53 = vector.shape_cast %52 : vector<1x1x16xf32> to vector<1x16xf32>
    %54 = vector.broadcast %53 : vector<1x16xf32> to vector<16x16xf32>
    %55 = arith.addf %51, %54 : vector<16x16xf32>
    %c1_38 = arith.constant 1 : index
    %c0_39 = arith.constant 0 : index
    %c0_40 = arith.constant 0 : index
    %56 = vector.load %arg3[%c1_38, %c0_39, %c0_40] : memref<4x64x16xbf16, #tpu.memory_space<vmem>>, vector<1x64x16xbf16>
    %57 = vector.shape_cast %56 : vector<1x64x16xbf16> to vector<64x16xbf16>
    %cst_41 = arith.constant dense<0.000000e+00> : vector<16x16xf32>
    %58 = tpu.matmul %3, %57, %cst_41 {dimension_numbers = #tpu.dot_dimension_numbers<[1], [0], [0], [1], [0, 0, 1, 1], [], []>} : vector<16x64xbf16>, vector<64x16xbf16>, vector<16x16xf32> -> vector<16x16xf32>
    %c1_42 = arith.constant 1 : index
    %c0_43 = arith.constant 0 : index
    %c0_44 = arith.constant 0 : index
    %59 = vector.load %arg7[%c1_42, %c0_43, %c0_44] : memref<4x1x16xf32, #tpu.memory_space<vmem>>, vector<1x1x16xf32>
    %60 = vector.shape_cast %59 : vector<1x1x16xf32> to vector<1x16xf32>
    %61 = vector.broadcast %60 : vector<1x16xf32> to vector<16x16xf32>
    %62 = arith.addf %58, %61 : vector<16x16xf32>
    %c1_45 = arith.constant 1 : index
    %c0_46 = arith.constant 0 : index
    %c0_47 = arith.constant 0 : index
    %63 = vector.load %arg4[%c1_45, %c0_46, %c0_47] : memref<4x64x16xbf16, #tpu.memory_space<vmem>>, vector<1x64x16xbf16>
    %64 = vector.shape_cast %63 : vector<1x64x16xbf16> to vector<64x16xbf16>
    %cst_48 = arith.constant dense<0.000000e+00> : vector<16x16xf32>
    %65 = tpu.matmul %3, %64, %cst_48 {dimension_numbers = #tpu.dot_dimension_numbers<[1], [0], [0], [1], [0, 0, 1, 1], [], []>} : vector<16x64xbf16>, vector<64x16xbf16>, vector<16x16xf32> -> vector<16x16xf32>
    %c1_49 = arith.constant 1 : index
    %c0_50 = arith.constant 0 : index
    %c0_51 = arith.constant 0 : index
    %66 = vector.load %arg8[%c1_49, %c0_50, %c0_51] : memref<4x1x16xf32, #tpu.memory_space<vmem>>, vector<1x1x16xf32>
    %67 = vector.shape_cast %66 : vector<1x1x16xf32> to vector<1x16xf32>
    %68 = vector.broadcast %67 : vector<1x16xf32> to vector<16x16xf32>
    %69 = arith.addf %65, %68 : vector<16x16xf32>
    %70 = arith.truncf %55 : vector<16x16xf32> to vector<16x16xbf16>
    %71 = arith.truncf %62 : vector<16x16xf32> to vector<16x16xbf16>
    %cst_52 = arith.constant dense<0.000000e+00> : vector<16x16xf32>
    %72 = tpu.matmul %70, %71, %cst_52 {dimension_numbers = #tpu.dot_dimension_numbers<[1], [1], [0], [0], [0, 0, 1, 0], [], []>} : vector<16x16xbf16>, vector<16x16xbf16>, vector<16x16xf32> -> vector<16x16xf32>
    %cst_53 = arith.constant 2.500000e-01 : f32
    %73 = vector.broadcast %cst_53 : f32 to vector<16x16xf32>
    %74 = arith.mulf %72, %73 : vector<16x16xf32>
    %cst_54 = arith.constant dense<0xFF800000> : vector<16xf32>
    %75 = vector.multi_reduction <maximumf>, %74, %cst_54 [1] : vector<16x16xf32> to vector<16xf32>
    %76 = vector.shape_cast %75 : vector<16xf32> to vector<16x1xf32>
    %77 = vector.broadcast %76 : vector<16x1xf32> to vector<16x16xf32>
    %78 = arith.subf %74, %77 : vector<16x16xf32>
    %79 = math.exp %78 : vector<16x16xf32>
    %cst_55 = arith.constant dense<0.000000e+00> : vector<16xf32>
    %80 = vector.multi_reduction <add>, %79, %cst_55 [1] : vector<16x16xf32> to vector<16xf32>
    %81 = vector.shape_cast %80 : vector<16xf32> to vector<16x1xf32>
    %82 = tpu.reciprocal %81 {approx = true} : vector<16x1xf32> -> vector<16x1xf32>
    %83 = vector.broadcast %82 : vector<16x1xf32> to vector<16x16xf32>
    %84 = arith.mulf %79, %83 : vector<16x16xf32>
    %85 = arith.truncf %84 : vector<16x16xf32> to vector<16x16xbf16>
    %86 = arith.truncf %69 : vector<16x16xf32> to vector<16x16xbf16>
    %cst_56 = arith.constant dense<0.000000e+00> : vector<16x16xf32>
    %87 = tpu.matmul %85, %86, %cst_56 {dimension_numbers = #tpu.dot_dimension_numbers<[1], [0], [0], [1], [0, 0, 1, 1], [], []>} : vector<16x16xbf16>, vector<16x16xbf16>, vector<16x16xf32> -> vector<16x16xf32>
    %c1_57 = arith.constant 1 : index
    %c0_58 = arith.constant 0 : index
    %c0_59 = arith.constant 0 : index
    %88 = vector.load %arg5[%c1_57, %c0_58, %c0_59] : memref<4x16x64xbf16, #tpu.memory_space<vmem>>, vector<1x16x64xbf16>
    %89 = vector.shape_cast %88 : vector<1x16x64xbf16> to vector<16x64xbf16>
    %90 = arith.truncf %87 : vector<16x16xf32> to vector<16x16xbf16>
    %cst_60 = arith.constant dense<0.000000e+00> : vector<16x64xf32>
    %91 = tpu.matmul %90, %89, %cst_60 {dimension_numbers = #tpu.dot_dimension_numbers<[1], [0], [0], [1], [0, 0, 1, 1], [], []>} : vector<16x16xbf16>, vector<16x64xbf16>, vector<16x64xf32> -> vector<16x64xf32>
    %92 = arith.addf %48, %91 : vector<16x64xf32>
    %c2 = arith.constant 2 : index
    %c0_61 = arith.constant 0 : index
    %c0_62 = arith.constant 0 : index
    %93 = vector.load %arg2[%c2, %c0_61, %c0_62] : memref<4x64x16xbf16, #tpu.memory_space<vmem>>, vector<1x64x16xbf16>
    %94 = vector.shape_cast %93 : vector<1x64x16xbf16> to vector<64x16xbf16>
    %cst_63 = arith.constant dense<0.000000e+00> : vector<16x16xf32>
    %95 = tpu.matmul %2, %94, %cst_63 {dimension_numbers = #tpu.dot_dimension_numbers<[1], [0], [0], [1], [0, 0, 1, 1], [], []>} : vector<16x64xbf16>, vector<64x16xbf16>, vector<16x16xf32> -> vector<16x16xf32>
    %c2_64 = arith.constant 2 : index
    %c0_65 = arith.constant 0 : index
    %c0_66 = arith.constant 0 : index
    %96 = vector.load %arg6[%c2_64, %c0_65, %c0_66] : memref<4x1x16xf32, #tpu.memory_space<vmem>>, vector<1x1x16xf32>
    %97 = vector.shape_cast %96 : vector<1x1x16xf32> to vector<1x16xf32>
    %98 = vector.broadcast %97 : vector<1x16xf32> to vector<16x16xf32>
    %99 = arith.addf %95, %98 : vector<16x16xf32>
    %c2_67 = arith.constant 2 : index
    %c0_68 = arith.constant 0 : index
    %c0_69 = arith.constant 0 : index
    %100 = vector.load %arg3[%c2_67, %c0_68, %c0_69] : memref<4x64x16xbf16, #tpu.memory_space<vmem>>, vector<1x64x16xbf16>
    %101 = vector.shape_cast %100 : vector<1x64x16xbf16> to vector<64x16xbf16>
    %cst_70 = arith.constant dense<0.000000e+00> : vector<16x16xf32>
    %102 = tpu.matmul %3, %101, %cst_70 {dimension_numbers = #tpu.dot_dimension_numbers<[1], [0], [0], [1], [0, 0, 1, 1], [], []>} : vector<16x64xbf16>, vector<64x16xbf16>, vector<16x16xf32> -> vector<16x16xf32>
    %c2_71 = arith.constant 2 : index
    %c0_72 = arith.constant 0 : index
    %c0_73 = arith.constant 0 : index
    %103 = vector.load %arg7[%c2_71, %c0_72, %c0_73] : memref<4x1x16xf32, #tpu.memory_space<vmem>>, vector<1x1x16xf32>
    %104 = vector.shape_cast %103 : vector<1x1x16xf32> to vector<1x16xf32>
    %105 = vector.broadcast %104 : vector<1x16xf32> to vector<16x16xf32>
    %106 = arith.addf %102, %105 : vector<16x16xf32>
    %c2_74 = arith.constant 2 : index
    %c0_75 = arith.constant 0 : index
    %c0_76 = arith.constant 0 : index
    %107 = vector.load %arg4[%c2_74, %c0_75, %c0_76] : memref<4x64x16xbf16, #tpu.memory_space<vmem>>, vector<1x64x16xbf16>
    %108 = vector.shape_cast %107 : vector<1x64x16xbf16> to vector<64x16xbf16>
    %cst_77 = arith.constant dense<0.000000e+00> : vector<16x16xf32>
    %109 = tpu.matmul %3, %108, %cst_77 {dimension_numbers = #tpu.dot_dimension_numbers<[1], [0], [0], [1], [0, 0, 1, 1], [], []>} : vector<16x64xbf16>, vector<64x16xbf16>, vector<16x16xf32> -> vector<16x16xf32>
    %c2_78 = arith.constant 2 : index
    %c0_79 = arith.constant 0 : index
    %c0_80 = arith.constant 0 : index
    %110 = vector.load %arg8[%c2_78, %c0_79, %c0_80] : memref<4x1x16xf32, #tpu.memory_space<vmem>>, vector<1x1x16xf32>
    %111 = vector.shape_cast %110 : vector<1x1x16xf32> to vector<1x16xf32>
    %112 = vector.broadcast %111 : vector<1x16xf32> to vector<16x16xf32>
    %113 = arith.addf %109, %112 : vector<16x16xf32>
    %114 = arith.truncf %99 : vector<16x16xf32> to vector<16x16xbf16>
    %115 = arith.truncf %106 : vector<16x16xf32> to vector<16x16xbf16>
    %cst_81 = arith.constant dense<0.000000e+00> : vector<16x16xf32>
    %116 = tpu.matmul %114, %115, %cst_81 {dimension_numbers = #tpu.dot_dimension_numbers<[1], [1], [0], [0], [0, 0, 1, 0], [], []>} : vector<16x16xbf16>, vector<16x16xbf16>, vector<16x16xf32> -> vector<16x16xf32>
    %cst_82 = arith.constant 2.500000e-01 : f32
    %117 = vector.broadcast %cst_82 : f32 to vector<16x16xf32>
    %118 = arith.mulf %116, %117 : vector<16x16xf32>
    %cst_83 = arith.constant dense<0xFF800000> : vector<16xf32>
    %119 = vector.multi_reduction <maximumf>, %118, %cst_83 [1] : vector<16x16xf32> to vector<16xf32>
    %120 = vector.shape_cast %119 : vector<16xf32> to vector<16x1xf32>
    %121 = vector.broadcast %120 : vector<16x1xf32> to vector<16x16xf32>
    %122 = arith.subf %118, %121 : vector<16x16xf32>
    %123 = math.exp %122 : vector<16x16xf32>
    %cst_84 = arith.constant dense<0.000000e+00> : vector<16xf32>
    %124 = vector.multi_reduction <add>, %123, %cst_84 [1] : vector<16x16xf32> to vector<16xf32>
    %125 = vector.shape_cast %124 : vector<16xf32> to vector<16x1xf32>
    %126 = tpu.reciprocal %125 {approx = true} : vector<16x1xf32> -> vector<16x1xf32>
    %127 = vector.broadcast %126 : vector<16x1xf32> to vector<16x16xf32>
    %128 = arith.mulf %123, %127 : vector<16x16xf32>
    %129 = arith.truncf %128 : vector<16x16xf32> to vector<16x16xbf16>
    %130 = arith.truncf %113 : vector<16x16xf32> to vector<16x16xbf16>
    %cst_85 = arith.constant dense<0.000000e+00> : vector<16x16xf32>
    %131 = tpu.matmul %129, %130, %cst_85 {dimension_numbers = #tpu.dot_dimension_numbers<[1], [0], [0], [1], [0, 0, 1, 1], [], []>} : vector<16x16xbf16>, vector<16x16xbf16>, vector<16x16xf32> -> vector<16x16xf32>
    %c2_86 = arith.constant 2 : index
    %c0_87 = arith.constant 0 : index
    %c0_88 = arith.constant 0 : index
    %132 = vector.load %arg5[%c2_86, %c0_87, %c0_88] : memref<4x16x64xbf16, #tpu.memory_space<vmem>>, vector<1x16x64xbf16>
    %133 = vector.shape_cast %132 : vector<1x16x64xbf16> to vector<16x64xbf16>
    %134 = arith.truncf %131 : vector<16x16xf32> to vector<16x16xbf16>
    %cst_89 = arith.constant dense<0.000000e+00> : vector<16x64xf32>
    %135 = tpu.matmul %134, %133, %cst_89 {dimension_numbers = #tpu.dot_dimension_numbers<[1], [0], [0], [1], [0, 0, 1, 1], [], []>} : vector<16x16xbf16>, vector<16x64xbf16>, vector<16x64xf32> -> vector<16x64xf32>
    %136 = arith.addf %92, %135 : vector<16x64xf32>
    %c3 = arith.constant 3 : index
    %c0_90 = arith.constant 0 : index
    %c0_91 = arith.constant 0 : index
    %137 = vector.load %arg2[%c3, %c0_90, %c0_91] : memref<4x64x16xbf16, #tpu.memory_space<vmem>>, vector<1x64x16xbf16>
    %138 = vector.shape_cast %137 : vector<1x64x16xbf16> to vector<64x16xbf16>
    %cst_92 = arith.constant dense<0.000000e+00> : vector<16x16xf32>
    %139 = tpu.matmul %2, %138, %cst_92 {dimension_numbers = #tpu.dot_dimension_numbers<[1], [0], [0], [1], [0, 0, 1, 1], [], []>} : vector<16x64xbf16>, vector<64x16xbf16>, vector<16x16xf32> -> vector<16x16xf32>
    %c3_93 = arith.constant 3 : index
    %c0_94 = arith.constant 0 : index
    %c0_95 = arith.constant 0 : index
    %140 = vector.load %arg6[%c3_93, %c0_94, %c0_95] : memref<4x1x16xf32, #tpu.memory_space<vmem>>, vector<1x1x16xf32>
    %141 = vector.shape_cast %140 : vector<1x1x16xf32> to vector<1x16xf32>
    %142 = vector.broadcast %141 : vector<1x16xf32> to vector<16x16xf32>
    %143 = arith.addf %139, %142 : vector<16x16xf32>
    %c3_96 = arith.constant 3 : index
    %c0_97 = arith.constant 0 : index
    %c0_98 = arith.constant 0 : index
    %144 = vector.load %arg3[%c3_96, %c0_97, %c0_98] : memref<4x64x16xbf16, #tpu.memory_space<vmem>>, vector<1x64x16xbf16>
    %145 = vector.shape_cast %144 : vector<1x64x16xbf16> to vector<64x16xbf16>
    %cst_99 = arith.constant dense<0.000000e+00> : vector<16x16xf32>
    %146 = tpu.matmul %3, %145, %cst_99 {dimension_numbers = #tpu.dot_dimension_numbers<[1], [0], [0], [1], [0, 0, 1, 1], [], []>} : vector<16x64xbf16>, vector<64x16xbf16>, vector<16x16xf32> -> vector<16x16xf32>
    %c3_100 = arith.constant 3 : index
    %c0_101 = arith.constant 0 : index
    %c0_102 = arith.constant 0 : index
    %147 = vector.load %arg7[%c3_100, %c0_101, %c0_102] : memref<4x1x16xf32, #tpu.memory_space<vmem>>, vector<1x1x16xf32>
    %148 = vector.shape_cast %147 : vector<1x1x16xf32> to vector<1x16xf32>
    %149 = vector.broadcast %148 : vector<1x16xf32> to vector<16x16xf32>
    %150 = arith.addf %146, %149 : vector<16x16xf32>
    %c3_103 = arith.constant 3 : index
    %c0_104 = arith.constant 0 : index
    %c0_105 = arith.constant 0 : index
    %151 = vector.load %arg4[%c3_103, %c0_104, %c0_105] : memref<4x64x16xbf16, #tpu.memory_space<vmem>>, vector<1x64x16xbf16>
    %152 = vector.shape_cast %151 : vector<1x64x16xbf16> to vector<64x16xbf16>
    %cst_106 = arith.constant dense<0.000000e+00> : vector<16x16xf32>
    %153 = tpu.matmul %3, %152, %cst_106 {dimension_numbers = #tpu.dot_dimension_numbers<[1], [0], [0], [1], [0, 0, 1, 1], [], []>} : vector<16x64xbf16>, vector<64x16xbf16>, vector<16x16xf32> -> vector<16x16xf32>
    %c3_107 = arith.constant 3 : index
    %c0_108 = arith.constant 0 : index
    %c0_109 = arith.constant 0 : index
    %154 = vector.load %arg8[%c3_107, %c0_108, %c0_109] : memref<4x1x16xf32, #tpu.memory_space<vmem>>, vector<1x1x16xf32>
    %155 = vector.shape_cast %154 : vector<1x1x16xf32> to vector<1x16xf32>
    %156 = vector.broadcast %155 : vector<1x16xf32> to vector<16x16xf32>
    %157 = arith.addf %153, %156 : vector<16x16xf32>
    %158 = arith.truncf %143 : vector<16x16xf32> to vector<16x16xbf16>
    %159 = arith.truncf %150 : vector<16x16xf32> to vector<16x16xbf16>
    %cst_110 = arith.constant dense<0.000000e+00> : vector<16x16xf32>
    %160 = tpu.matmul %158, %159, %cst_110 {dimension_numbers = #tpu.dot_dimension_numbers<[1], [1], [0], [0], [0, 0, 1, 0], [], []>} : vector<16x16xbf16>, vector<16x16xbf16>, vector<16x16xf32> -> vector<16x16xf32>
    %cst_111 = arith.constant 2.500000e-01 : f32
    %161 = vector.broadcast %cst_111 : f32 to vector<16x16xf32>
    %162 = arith.mulf %160, %161 : vector<16x16xf32>
    %cst_112 = arith.constant dense<0xFF800000> : vector<16xf32>
    %163 = vector.multi_reduction <maximumf>, %162, %cst_112 [1] : vector<16x16xf32> to vector<16xf32>
    %164 = vector.shape_cast %163 : vector<16xf32> to vector<16x1xf32>
    %165 = vector.broadcast %164 : vector<16x1xf32> to vector<16x16xf32>
    %166 = arith.subf %162, %165 : vector<16x16xf32>
    %167 = math.exp %166 : vector<16x16xf32>
    %cst_113 = arith.constant dense<0.000000e+00> : vector<16xf32>
    %168 = vector.multi_reduction <add>, %167, %cst_113 [1] : vector<16x16xf32> to vector<16xf32>
    %169 = vector.shape_cast %168 : vector<16xf32> to vector<16x1xf32>
    %170 = tpu.reciprocal %169 {approx = true} : vector<16x1xf32> -> vector<16x1xf32>
    %171 = vector.broadcast %170 : vector<16x1xf32> to vector<16x16xf32>
    %172 = arith.mulf %167, %171 : vector<16x16xf32>
    %173 = arith.truncf %172 : vector<16x16xf32> to vector<16x16xbf16>
    %174 = arith.truncf %157 : vector<16x16xf32> to vector<16x16xbf16>
    %cst_114 = arith.constant dense<0.000000e+00> : vector<16x16xf32>
    %175 = tpu.matmul %173, %174, %cst_114 {dimension_numbers = #tpu.dot_dimension_numbers<[1], [0], [0], [1], [0, 0, 1, 1], [], []>} : vector<16x16xbf16>, vector<16x16xbf16>, vector<16x16xf32> -> vector<16x16xf32>
    %c3_115 = arith.constant 3 : index
    %c0_116 = arith.constant 0 : index
    %c0_117 = arith.constant 0 : index
    %176 = vector.load %arg5[%c3_115, %c0_116, %c0_117] : memref<4x16x64xbf16, #tpu.memory_space<vmem>>, vector<1x16x64xbf16>
    %177 = vector.shape_cast %176 : vector<1x16x64xbf16> to vector<16x64xbf16>
    %178 = arith.truncf %175 : vector<16x16xf32> to vector<16x16xbf16>
    %cst_118 = arith.constant dense<0.000000e+00> : vector<16x64xf32>
    %179 = tpu.matmul %178, %177, %cst_118 {dimension_numbers = #tpu.dot_dimension_numbers<[1], [0], [0], [1], [0, 0, 1, 1], [], []>} : vector<16x16xbf16>, vector<16x64xbf16>, vector<16x64xf32> -> vector<16x64xf32>
    %180 = arith.addf %136, %179 : vector<16x64xf32>
    %c0_119 = arith.constant 0 : index
    %c0_120 = arith.constant 0 : index
    %181 = vector.load %arg9[%c0_119, %c0_120] : memref<1x64xf32, #tpu.memory_space<vmem>>, vector<1x64xf32>
    %182 = vector.broadcast %181 : vector<1x64xf32> to vector<16x64xf32>
    %183 = arith.addf %180, %182 : vector<16x64xf32>
    %184 = arith.addf %1, %183 : vector<16x64xf32>
    %cst_121 = arith.constant dense<0.000000e+00> : vector<16xf32>
    %185 = vector.multi_reduction <add>, %184, %cst_121 [1] : vector<16x64xf32> to vector<16xf32>
    %186 = vector.shape_cast %185 : vector<16xf32> to vector<16x1xf32>
    %cst_122 = arith.constant 6.400000e+01 : f32
    %187 = vector.broadcast %cst_122 : f32 to vector<16x1xf32>
    %188 = arith.divf %186, %187 : vector<16x1xf32>
    %189 = vector.broadcast %188 : vector<16x1xf32> to vector<16x64xf32>
    %190 = arith.subf %184, %189 : vector<16x64xf32>
    %191 = arith.mulf %190, %190 : vector<16x64xf32>
    %cst_123 = arith.constant dense<0.000000e+00> : vector<16xf32>
    %192 = vector.multi_reduction <add>, %191, %cst_123 [1] : vector<16x64xf32> to vector<16xf32>
    %193 = vector.shape_cast %192 : vector<16xf32> to vector<16x1xf32>
    %cst_124 = arith.constant 6.400000e+01 : f32
    %194 = vector.broadcast %cst_124 : f32 to vector<16x1xf32>
    %195 = arith.divf %193, %194 : vector<16x1xf32>
    %196 = vector.broadcast %188 : vector<16x1xf32> to vector<16x64xf32>
    %197 = arith.subf %184, %196 : vector<16x64xf32>
    %cst_125 = arith.constant 9.99999974E-6 : f32
    %198 = vector.broadcast %cst_125 : f32 to vector<16x1xf32>
    %199 = arith.addf %195, %198 : vector<16x1xf32>
    %200 = math.rsqrt %199 : vector<16x1xf32>
    %201 = vector.broadcast %200 : vector<16x1xf32> to vector<16x64xf32>
    %202 = arith.mulf %197, %201 : vector<16x64xf32>
    %c0_126 = arith.constant 0 : index
    %c0_127 = arith.constant 0 : index
    %203 = vector.load %arg10[%c0_126, %c0_127] : memref<1x64xf32, #tpu.memory_space<vmem>>, vector<1x64xf32>
    %204 = vector.broadcast %203 : vector<1x64xf32> to vector<16x64xf32>
    %205 = arith.mulf %202, %204 : vector<16x64xf32>
    %c0_128 = arith.constant 0 : index
    %c0_129 = arith.constant 0 : index
    %206 = vector.load %arg11[%c0_128, %c0_129] : memref<1x64xf32, #tpu.memory_space<vmem>>, vector<1x64xf32>
    %207 = vector.broadcast %206 : vector<1x64xf32> to vector<16x64xf32>
    %208 = arith.addf %205, %207 : vector<16x64xf32>
    %c0_130 = arith.constant 0 : index
    %c0_131 = arith.constant 0 : index
    %209 = vector.load %arg12[%c0_130, %c0_131] : memref<64x128xbf16, #tpu.memory_space<vmem>>, vector<64x128xbf16>
    %210 = arith.truncf %208 : vector<16x64xf32> to vector<16x64xbf16>
    %cst_132 = arith.constant dense<0.000000e+00> : vector<16x128xf32>
    %211 = tpu.matmul %210, %209, %cst_132 {dimension_numbers = #tpu.dot_dimension_numbers<[1], [0], [0], [1], [0, 0, 1, 1], [], []>} : vector<16x64xbf16>, vector<64x128xbf16>, vector<16x128xf32> -> vector<16x128xf32>
    %c0_133 = arith.constant 0 : index
    %c0_134 = arith.constant 0 : index
    %212 = vector.load %arg13[%c0_133, %c0_134] : memref<1x128xf32, #tpu.memory_space<vmem>>, vector<1x128xf32>
    %213 = vector.broadcast %212 : vector<1x128xf32> to vector<16x128xf32>
    %214 = arith.addf %211, %213 : vector<16x128xf32>
    %cst_135 = arith.constant 0.000000e+00 : f32
    %215 = vector.broadcast %cst_135 : f32 to vector<16x128xf32>
    %216 = arith.maximumf %214, %215 : vector<16x128xf32>
    %c0_136 = arith.constant 0 : index
    %c0_137 = arith.constant 0 : index
    %217 = vector.load %arg14[%c0_136, %c0_137] : memref<128x64xbf16, #tpu.memory_space<vmem>>, vector<128x64xbf16>
    %218 = arith.truncf %216 : vector<16x128xf32> to vector<16x128xbf16>
    %cst_138 = arith.constant dense<0.000000e+00> : vector<16x64xf32>
    %219 = tpu.matmul %218, %217, %cst_138 {dimension_numbers = #tpu.dot_dimension_numbers<[1], [0], [0], [1], [0, 0, 1, 1], [], []>} : vector<16x128xbf16>, vector<128x64xbf16>, vector<16x64xf32> -> vector<16x64xf32>
    %c0_139 = arith.constant 0 : index
    %c0_140 = arith.constant 0 : index
    %220 = vector.load %arg15[%c0_139, %c0_140] : memref<1x64xf32, #tpu.memory_space<vmem>>, vector<1x64xf32>
    %221 = vector.broadcast %220 : vector<1x64xf32> to vector<16x64xf32>
    %222 = arith.addf %219, %221 : vector<16x64xf32>
    %223 = arith.addf %208, %222 : vector<16x64xf32>
    %cst_141 = arith.constant dense<0.000000e+00> : vector<16xf32>
    %224 = vector.multi_reduction <add>, %223, %cst_141 [1] : vector<16x64xf32> to vector<16xf32>
    %225 = vector.shape_cast %224 : vector<16xf32> to vector<16x1xf32>
    %cst_142 = arith.constant 6.400000e+01 : f32
    %226 = vector.broadcast %cst_142 : f32 to vector<16x1xf32>
    %227 = arith.divf %225, %226 : vector<16x1xf32>
    %228 = vector.broadcast %227 : vector<16x1xf32> to vector<16x64xf32>
    %229 = arith.subf %223, %228 : vector<16x64xf32>
    %230 = arith.mulf %229, %229 : vector<16x64xf32>
    %cst_143 = arith.constant dense<0.000000e+00> : vector<16xf32>
    %231 = vector.multi_reduction <add>, %230, %cst_143 [1] : vector<16x64xf32> to vector<16xf32>
    %232 = vector.shape_cast %231 : vector<16xf32> to vector<16x1xf32>
    %cst_144 = arith.constant 6.400000e+01 : f32
    %233 = vector.broadcast %cst_144 : f32 to vector<16x1xf32>
    %234 = arith.divf %232, %233 : vector<16x1xf32>
    %235 = vector.broadcast %227 : vector<16x1xf32> to vector<16x64xf32>
    %236 = arith.subf %223, %235 : vector<16x64xf32>
    %cst_145 = arith.constant 9.99999974E-6 : f32
    %237 = vector.broadcast %cst_145 : f32 to vector<16x1xf32>
    %238 = arith.addf %234, %237 : vector<16x1xf32>
    %239 = math.rsqrt %238 : vector<16x1xf32>
    %240 = vector.broadcast %239 : vector<16x1xf32> to vector<16x64xf32>
    %241 = arith.mulf %236, %240 : vector<16x64xf32>
    %c0_146 = arith.constant 0 : index
    %c0_147 = arith.constant 0 : index
    %242 = vector.load %arg16[%c0_146, %c0_147] : memref<1x64xf32, #tpu.memory_space<vmem>>, vector<1x64xf32>
    %243 = vector.broadcast %242 : vector<1x64xf32> to vector<16x64xf32>
    %244 = arith.mulf %241, %243 : vector<16x64xf32>
    %c0_148 = arith.constant 0 : index
    %c0_149 = arith.constant 0 : index
    %245 = vector.load %arg17[%c0_148, %c0_149] : memref<1x64xf32, #tpu.memory_space<vmem>>, vector<1x64xf32>
    %246 = vector.broadcast %245 : vector<1x64xf32> to vector<16x64xf32>
    %247 = arith.addf %244, %246 : vector<16x64xf32>
    %c0_150 = arith.constant 0 : index
    %c0_151 = arith.constant 0 : index
    %c0_152 = arith.constant 0 : index
    %248 = vector.load %arg18[%c0_150, %c0_151, %c0_152] : memref<1x16x64xf32, #tpu.memory_space<vmem>>, vector<1x16x64xf32>
    %249 = vector.shape_cast %248 : vector<1x16x64xf32> to vector<16x64xf32>
    %250 = vector.shape_cast %247 : vector<16x64xf32> to vector<1x16x64xf32>
    tpu.vector_store %arg18[%c0_150, %c0_151, %c0_152], %250 {strides = array<i32>} : memref<1x16x64xf32, #tpu.memory_space<vmem>>, vector<1x16x64xf32>,
    return
  }
  func.func @transform_0(%arg0: i32) -> (i32, i32, i32) {
    %c0_i32 = arith.constant 0 : i32
    %c0_i32_0 = arith.constant 0 : i32
    %c0_i32_1 = arith.constant 0 : i32
    return %arg0, %c0_i32, %c0_i32_0 : i32, i32, i32
  }
  func.func @transform_1(%arg0: i32) -> (i32, i32, i32) {
    %c0_i32 = arith.constant 0 : i32
    %c0_i32_0 = arith.constant 0 : i32
    %c0_i32_1 = arith.constant 0 : i32
    %c0_i32_2 = arith.constant 0 : i32
    return %c0_i32, %c0_i32_0, %c0_i32_1 : i32, i32, i32
  }
  func.func @transform_2(%arg0: i32) -> (i32, i32, i32) {
    %c0_i32 = arith.constant 0 : i32
    %c0_i32_0 = arith.constant 0 : i32
    %c0_i32_1 = arith.constant 0 : i32
    %c0_i32_2 = arith.constant 0 : i32
    return %c0_i32, %c0_i32_0, %c0_i32_1 : i32, i32, i32
  }
  func.func @transform_3(%arg0: i32) -> (i32, i32, i32) {
    %c0_i32 = arith.constant 0 : i32
    %c0_i32_0 = arith.constant 0 : i32
    %c0_i32_1 = arith.constant 0 : i32
    %c0_i32_2 = arith.constant 0 : i32
    return %c0_i32, %c0_i32_0, %c0_i32_1 : i32, i32, i32
  }
  func.func @transform_4(%arg0: i32) -> (i32, i32, i32) {
    %c0_i32 = arith.constant 0 : i32
    %c0_i32_0 = arith.constant 0 : i32
    %c0_i32_1 = arith.constant 0 : i32
    %c0_i32_2 = arith.constant 0 : i32
    return %c0_i32, %c0_i32_0, %c0_i32_1 : i32, i32, i32
  }
  func.func @transform_5(%arg0: i32) -> (i32, i32, i32) {
    %c0_i32 = arith.constant 0 : i32
    %c0_i32_0 = arith.constant 0 : i32
    %c0_i32_1 = arith.constant 0 : i32
    %c0_i32_2 = arith.constant 0 : i32
    return %c0_i32, %c0_i32_0, %c0_i32_1 : i32, i32, i32
  }
  func.func @transform_6(%arg0: i32) -> (i32, i32, i32) {
    %c0_i32 = arith.constant 0 : i32
    %c0_i32_0 = arith.constant 0 : i32
    %c0_i32_1 = arith.constant 0 : i32
    %c0_i32_2 = arith.constant 0 : i32
    return %c0_i32, %c0_i32_0, %c0_i32_1 : i32, i32, i32
  }
  func.func @transform_7(%arg0: i32) -> (i32, i32, i32) {
    %c0_i32 = arith.constant 0 : i32
    %c0_i32_0 = arith.constant 0 : i32
    %c0_i32_1 = arith.constant 0 : i32
    %c0_i32_2 = arith.constant 0 : i32
    return %c0_i32, %c0_i32_0, %c0_i32_1 : i32, i32, i32
  }
  func.func @transform_8(%arg0: i32) -> (i32, i32) {
    %c0_i32 = arith.constant 0 : i32
    %c0_i32_0 = arith.constant 0 : i32
    %c0_i32_1 = arith.constant 0 : i32
    return %c0_i32, %c0_i32_0 : i32, i32
  }
  func.func @transform_9(%arg0: i32) -> (i32, i32) {
    %c0_i32 = arith.constant 0 : i32
    %c0_i32_0 = arith.constant 0 : i32
    %c0_i32_1 = arith.constant 0 : i32
    return %c0_i32, %c0_i32_0 : i32, i32
  }
  func.func @transform_10(%arg0: i32) -> (i32, i32) {
    %c0_i32 = arith.constant 0 : i32
    %c0_i32_0 = arith.constant 0 : i32
    %c0_i32_1 = arith.constant 0 : i32
    return %c0_i32, %c0_i32_0 : i32, i32
  }
  func.func @transform_11(%arg0: i32) -> (i32, i32) {
    %c0_i32 = arith.constant 0 : i32
    %c0_i32_0 = arith.constant 0 : i32
    %c0_i32_1 = arith.constant 0 : i32
    return %c0_i32, %c0_i32_0 : i32, i32
  }
  func.func @transform_12(%arg0: i32) -> (i32, i32) {
    %c0_i32 = arith.constant 0 : i32
    %c0_i32_0 = arith.constant 0 : i32
    %c0_i32_1 = arith.constant 0 : i32
    return %c0_i32, %c0_i32_0 : i32, i32
  }
  func.func @transform_13(%arg0: i32) -> (i32, i32) {
    %c0_i32 = arith.constant 0 : i32
    %c0_i32_0 = arith.constant 0 : i32
    %c0_i32_1 = arith.constant 0 : i32
    return %c0_i32, %c0_i32_0 : i32, i32
  }
  func.func @transform_14(%arg0: i32) -> (i32, i32) {
    %c0_i32 = arith.constant 0 : i32
    %c0_i32_0 = arith.constant 0 : i32
    %c0_i32_1 = arith.constant 0 : i32
    return %c0_i32, %c0_i32_0 : i32, i32
  }
  func.func @transform_15(%arg0: i32) -> (i32, i32) {
    %c0_i32 = arith.constant 0 : i32
    %c0_i32_0 = arith.constant 0 : i32
    %c0_i32_1 = arith.constant 0 : i32
    return %c0_i32, %c0_i32_0 : i32, i32
  }
  func.func @transform_16(%arg0: i32) -> (i32, i32) {
    %c0_i32 = arith.constant 0 : i32
    %c0_i32_0 = arith.constant 0 : i32
    %c0_i32_1 = arith.constant 0 : i32
    return %c0_i32, %c0_i32_0 : i32, i32
  }
  func.func @transform_17(%arg0: i32) -> (i32, i32, i32) {
    %c0_i32 = arith.constant 0 : i32
    %c0_i32_0 = arith.constant 0 : i32
    %c0_i32_1 = arith.constant 0 : i32
    return %arg0, %c0_i32, %c0_i32_0 : i32, i32, i32
  }
}

module attributes {stable_mosaic.version = 11 : i64} {
  func.func @_decoder_layer_kernel(%arg0: i32, %arg1: memref<1x16x64xf32, #tpu.memory_space<vmem>>, %arg2: memref<1x16x64xf32, #tpu.memory_space<vmem>>, %arg3: memref<4x64x16xbf16, #tpu.memory_space<vmem>>, %arg4: memref<4x64x16xbf16, #tpu.memory_space<vmem>>, %arg5: memref<4x64x16xbf16, #tpu.memory_space<vmem>>, %arg6: memref<4x16x64xbf16, #tpu.memory_space<vmem>>, %arg7: memref<4x1x16xf32, #tpu.memory_space<vmem>>, %arg8: memref<4x1x16xf32, #tpu.memory_space<vmem>>, %arg9: memref<4x1x16xf32, #tpu.memory_space<vmem>>, %arg10: memref<1x64xf32, #tpu.memory_space<vmem>>, %arg11: memref<1x64xf32, #tpu.memory_space<vmem>>, %arg12: memref<1x64xf32, #tpu.memory_space<vmem>>, %arg13: memref<4x64x16xbf16, #tpu.memory_space<vmem>>, %arg14: memref<4x64x16xbf16, #tpu.memory_space<vmem>>, %arg15: memref<4x64x16xbf16, #tpu.memory_space<vmem>>, %arg16: memref<4x16x64xbf16, #tpu.memory_space<vmem>>, %arg17: memref<4x1x16xf32, #tpu.memory_space<vmem>>, %arg18: memref<4x1x16xf32, #tpu.memory_space<vmem>>, %arg19: memref<4x1x16xf32, #tpu.memory_space<vmem>>, %arg20: memref<1x64xf32, #tpu.memory_space<vmem>>, %arg21: memref<1x64xf32, #tpu.memory_space<vmem>>, %arg22: memref<1x64xf32, #tpu.memory_space<vmem>>, %arg23: memref<64x128xbf16, #tpu.memory_space<vmem>>, %arg24: memref<1x128xf32, #tpu.memory_space<vmem>>, %arg25: memref<128x64xbf16, #tpu.memory_space<vmem>>, %arg26: memref<1x64xf32, #tpu.memory_space<vmem>>, %arg27: memref<1x64xf32, #tpu.memory_space<vmem>>, %arg28: memref<1x64xf32, #tpu.memory_space<vmem>>, %arg29: memref<1x16x64xf32, #tpu.memory_space<vmem>>) attributes {dimension_semantics = [#tpu.dimension_semantics<parallel>], iteration_bounds = array<i64: 2>, scalar_prefetch = 0 : i64, scratch_operands = 0 : i64, tpu.core_type = #tpu.core_type<tc>, window_params = [{transform_indices = @transform_0, window_bounds = array<i64: 1, 16, 64>}, {transform_indices = @transform_1, window_bounds = array<i64: 1, 16, 64>}, {pipeline_mode = #tpu.pipeline_mode<synchronous>, transform_indices = @transform_2, window_bounds = array<i64: 4, 64, 16>}, {pipeline_mode = #tpu.pipeline_mode<synchronous>, transform_indices = @transform_3, window_bounds = array<i64: 4, 64, 16>}, {pipeline_mode = #tpu.pipeline_mode<synchronous>, transform_indices = @transform_4, window_bounds = array<i64: 4, 64, 16>}, {pipeline_mode = #tpu.pipeline_mode<synchronous>, transform_indices = @transform_5, window_bounds = array<i64: 4, 16, 64>}, {pipeline_mode = #tpu.pipeline_mode<synchronous>, transform_indices = @transform_6, window_bounds = array<i64: 4, 1, 16>}, {pipeline_mode = #tpu.pipeline_mode<synchronous>, transform_indices = @transform_7, window_bounds = array<i64: 4, 1, 16>}, {pipeline_mode = #tpu.pipeline_mode<synchronous>, transform_indices = @transform_8, window_bounds = array<i64: 4, 1, 16>}, {pipeline_mode = #tpu.pipeline_mode<synchronous>, transform_indices = @transform_9, window_bounds = array<i64: 1, 64>}, {pipeline_mode = #tpu.pipeline_mode<synchronous>, transform_indices = @transform_10, window_bounds = array<i64: 1, 64>}, {pipeline_mode = #tpu.pipeline_mode<synchronous>, transform_indices = @transform_11, window_bounds = array<i64: 1, 64>}, {pipeline_mode = #tpu.pipeline_mode<synchronous>, transform_indices = @transform_12, window_bounds = array<i64: 4, 64, 16>}, {pipeline_mode = #tpu.pipeline_mode<synchronous>, transform_indices = @transform_13, window_bounds = array<i64: 4, 64, 16>}, {pipeline_mode = #tpu.pipeline_mode<synchronous>, transform_indices = @transform_14, window_bounds = array<i64: 4, 64, 16>}, {pipeline_mode = #tpu.pipeline_mode<synchronous>, transform_indices = @transform_15, window_bounds = array<i64: 4, 16, 64>}, {pipeline_mode = #tpu.pipeline_mode<synchronous>, transform_indices = @transform_16, window_bounds = array<i64: 4, 1, 16>}, {pipeline_mode = #tpu.pipeline_mode<synchronous>, transform_indices = @transform_17, window_bounds = array<i64: 4, 1, 16>}, {pipeline_mode = #tpu.pipeline_mode<synchronous>, transform_indices = @transform_18, window_bounds = array<i64: 4, 1, 16>}, {pipeline_mode = #tpu.pipeline_mode<synchronous>, transform_indices = @transform_19, window_bounds = array<i64: 1, 64>}, {pipeline_mode = #tpu.pipeline_mode<synchronous>, transform_indices = @transform_20, window_bounds = array<i64: 1, 64>}, {pipeline_mode = #tpu.pipeline_mode<synchronous>, transform_indices = @transform_21, window_bounds = array<i64: 1, 64>}, {pipeline_mode = #tpu.pipeline_mode<synchronous>, transform_indices = @transform_22, window_bounds = array<i64: 64, 128>}, {pipeline_mode = #tpu.pipeline_mode<synchronous>, transform_indices = @transform_23, window_bounds = array<i64: 1, 128>}, {pipeline_mode = #tpu.pipeline_mode<synchronous>, transform_indices = @transform_24, window_bounds = array<i64: 128, 64>}, {pipeline_mode = #tpu.pipeline_mode<synchronous>, transform_indices = @transform_25, window_bounds = array<i64: 1, 64>}, {pipeline_mode = #tpu.pipeline_mode<synchronous>, transform_indices = @transform_26, window_bounds = array<i64: 1, 64>}, {pipeline_mode = #tpu.pipeline_mode<synchronous>, transform_indices = @transform_27, window_bounds = array<i64: 1, 64>}, {transform_indices = @transform_28, window_bounds = array<i64: 1, 16, 64>}]} {
    %c0 = arith.constant 0 : index
    %c0_0 = arith.constant 0 : index
    %c0_1 = arith.constant 0 : index
    %0 = vector.load %arg1[%c0, %c0_0, %c0_1] : memref<1x16x64xf32, #tpu.memory_space<vmem>>, vector<1x16x64xf32>
    %1 = vector.shape_cast %0 : vector<1x16x64xf32> to vector<16x64xf32>
    %c0_2 = arith.constant 0 : index
    %c0_3 = arith.constant 0 : index
    %c0_4 = arith.constant 0 : index
    %2 = vector.load %arg2[%c0_2, %c0_3, %c0_4] : memref<1x16x64xf32, #tpu.memory_space<vmem>>, vector<1x16x64xf32>
    %3 = vector.shape_cast %2 : vector<1x16x64xf32> to vector<16x64xf32>
    %4 = arith.truncf %3 : vector<16x64xf32> to vector<16x64xbf16>
    %5 = arith.truncf %3 : vector<16x64xf32> to vector<16x64xbf16>
    %cst = arith.constant 0.000000e+00 : f32
    %6 = vector.broadcast %cst : f32 to vector<16x64xf32>
    %c0_5 = arith.constant 0 : index
    %c0_6 = arith.constant 0 : index
    %c0_7 = arith.constant 0 : index
    %7 = vector.load %arg3[%c0_5, %c0_6, %c0_7] : memref<4x64x16xbf16, #tpu.memory_space<vmem>>, vector<1x64x16xbf16>
    %8 = vector.shape_cast %7 : vector<1x64x16xbf16> to vector<64x16xbf16>
    %cst_8 = arith.constant dense<0.000000e+00> : vector<16x16xf32>
    %9 = tpu.matmul %4, %8, %cst_8 {dimension_numbers = #tpu.dot_dimension_numbers<[1], [0], [0], [1], [0, 0, 1, 1], [], []>} : vector<16x64xbf16>, vector<64x16xbf16>, vector<16x16xf32> -> vector<16x16xf32>
    %c0_9 = arith.constant 0 : index
    %c0_10 = arith.constant 0 : index
    %c0_11 = arith.constant 0 : index
    %10 = vector.load %arg7[%c0_9, %c0_10, %c0_11] : memref<4x1x16xf32, #tpu.memory_space<vmem>>, vector<1x1x16xf32>
    %11 = vector.shape_cast %10 : vector<1x1x16xf32> to vector<1x16xf32>
    %12 = vector.broadcast %11 : vector<1x16xf32> to vector<16x16xf32>
    %13 = arith.addf %9, %12 : vector<16x16xf32>
    %c0_12 = arith.constant 0 : index
    %c0_13 = arith.constant 0 : index
    %c0_14 = arith.constant 0 : index
    %14 = vector.load %arg4[%c0_12, %c0_13, %c0_14] : memref<4x64x16xbf16, #tpu.memory_space<vmem>>, vector<1x64x16xbf16>
    %15 = vector.shape_cast %14 : vector<1x64x16xbf16> to vector<64x16xbf16>
    %cst_15 = arith.constant dense<0.000000e+00> : vector<16x16xf32>
    %16 = tpu.matmul %5, %15, %cst_15 {dimension_numbers = #tpu.dot_dimension_numbers<[1], [0], [0], [1], [0, 0, 1, 1], [], []>} : vector<16x64xbf16>, vector<64x16xbf16>, vector<16x16xf32> -> vector<16x16xf32>
    %c0_16 = arith.constant 0 : index
    %c0_17 = arith.constant 0 : index
    %c0_18 = arith.constant 0 : index
    %17 = vector.load %arg8[%c0_16, %c0_17, %c0_18] : memref<4x1x16xf32, #tpu.memory_space<vmem>>, vector<1x1x16xf32>
    %18 = vector.shape_cast %17 : vector<1x1x16xf32> to vector<1x16xf32>
    %19 = vector.broadcast %18 : vector<1x16xf32> to vector<16x16xf32>
    %20 = arith.addf %16, %19 : vector<16x16xf32>
    %c0_19 = arith.constant 0 : index
    %c0_20 = arith.constant 0 : index
    %c0_21 = arith.constant 0 : index
    %21 = vector.load %arg5[%c0_19, %c0_20, %c0_21] : memref<4x64x16xbf16, #tpu.memory_space<vmem>>, vector<1x64x16xbf16>
    %22 = vector.shape_cast %21 : vector<1x64x16xbf16> to vector<64x16xbf16>
    %cst_22 = arith.constant dense<0.000000e+00> : vector<16x16xf32>
    %23 = tpu.matmul %5, %22, %cst_22 {dimension_numbers = #tpu.dot_dimension_numbers<[1], [0], [0], [1], [0, 0, 1, 1], [], []>} : vector<16x64xbf16>, vector<64x16xbf16>, vector<16x16xf32> -> vector<16x16xf32>
    %c0_23 = arith.constant 0 : index
    %c0_24 = arith.constant 0 : index
    %c0_25 = arith.constant 0 : index
    %24 = vector.load %arg9[%c0_23, %c0_24, %c0_25] : memref<4x1x16xf32, #tpu.memory_space<vmem>>, vector<1x1x16xf32>
    %25 = vector.shape_cast %24 : vector<1x1x16xf32> to vector<1x16xf32>
    %26 = vector.broadcast %25 : vector<1x16xf32> to vector<16x16xf32>
    %27 = arith.addf %23, %26 : vector<16x16xf32>
    %28 = arith.truncf %13 : vector<16x16xf32> to vector<16x16xbf16>
    %29 = arith.truncf %20 : vector<16x16xf32> to vector<16x16xbf16>
    %cst_26 = arith.constant dense<0.000000e+00> : vector<16x16xf32>
    %30 = tpu.matmul %28, %29, %cst_26 {dimension_numbers = #tpu.dot_dimension_numbers<[1], [1], [0], [0], [0, 0, 1, 0], [], []>} : vector<16x16xbf16>, vector<16x16xbf16>, vector<16x16xf32> -> vector<16x16xf32>
    %cst_27 = arith.constant 2.500000e-01 : f32
    %31 = vector.broadcast %cst_27 : f32 to vector<16x16xf32>
    %32 = arith.mulf %30, %31 : vector<16x16xf32>
    %cst_28 = arith.constant dense<0xFF800000> : vector<16xf32>
    %33 = vector.multi_reduction <maximumf>, %32, %cst_28 [1] : vector<16x16xf32> to vector<16xf32>
    %34 = vector.shape_cast %33 : vector<16xf32> to vector<16x1xf32>
    %35 = vector.broadcast %34 : vector<16x1xf32> to vector<16x16xf32>
    %36 = arith.subf %32, %35 : vector<16x16xf32>
    %37 = math.exp %36 : vector<16x16xf32>
    %cst_29 = arith.constant dense<0.000000e+00> : vector<16xf32>
    %38 = vector.multi_reduction <add>, %37, %cst_29 [1] : vector<16x16xf32> to vector<16xf32>
    %39 = vector.shape_cast %38 : vector<16xf32> to vector<16x1xf32>
    %40 = tpu.reciprocal %39 {approx = true} : vector<16x1xf32> -> vector<16x1xf32>
    %41 = vector.broadcast %40 : vector<16x1xf32> to vector<16x16xf32>
    %42 = arith.mulf %37, %41 : vector<16x16xf32>
    %43 = arith.truncf %42 : vector<16x16xf32> to vector<16x16xbf16>
    %44 = arith.truncf %27 : vector<16x16xf32> to vector<16x16xbf16>
    %cst_30 = arith.constant dense<0.000000e+00> : vector<16x16xf32>
    %45 = tpu.matmul %43, %44, %cst_30 {dimension_numbers = #tpu.dot_dimension_numbers<[1], [0], [0], [1], [0, 0, 1, 1], [], []>} : vector<16x16xbf16>, vector<16x16xbf16>, vector<16x16xf32> -> vector<16x16xf32>
    %c0_31 = arith.constant 0 : index
    %c0_32 = arith.constant 0 : index
    %c0_33 = arith.constant 0 : index
    %46 = vector.load %arg6[%c0_31, %c0_32, %c0_33] : memref<4x16x64xbf16, #tpu.memory_space<vmem>>, vector<1x16x64xbf16>
    %47 = vector.shape_cast %46 : vector<1x16x64xbf16> to vector<16x64xbf16>
    %48 = arith.truncf %45 : vector<16x16xf32> to vector<16x16xbf16>
    %cst_34 = arith.constant dense<0.000000e+00> : vector<16x64xf32>
    %49 = tpu.matmul %48, %47, %cst_34 {dimension_numbers = #tpu.dot_dimension_numbers<[1], [0], [0], [1], [0, 0, 1, 1], [], []>} : vector<16x16xbf16>, vector<16x64xbf16>, vector<16x64xf32> -> vector<16x64xf32>
    %50 = arith.addf %6, %49 : vector<16x64xf32>
    %c1 = arith.constant 1 : index
    %c0_35 = arith.constant 0 : index
    %c0_36 = arith.constant 0 : index
    %51 = vector.load %arg3[%c1, %c0_35, %c0_36] : memref<4x64x16xbf16, #tpu.memory_space<vmem>>, vector<1x64x16xbf16>
    %52 = vector.shape_cast %51 : vector<1x64x16xbf16> to vector<64x16xbf16>
    %cst_37 = arith.constant dense<0.000000e+00> : vector<16x16xf32>
    %53 = tpu.matmul %4, %52, %cst_37 {dimension_numbers = #tpu.dot_dimension_numbers<[1], [0], [0], [1], [0, 0, 1, 1], [], []>} : vector<16x64xbf16>, vector<64x16xbf16>, vector<16x16xf32> -> vector<16x16xf32>
    %c1_38 = arith.constant 1 : index
    %c0_39 = arith.constant 0 : index
    %c0_40 = arith.constant 0 : index
    %54 = vector.load %arg7[%c1_38, %c0_39, %c0_40] : memref<4x1x16xf32, #tpu.memory_space<vmem>>, vector<1x1x16xf32>
    %55 = vector.shape_cast %54 : vector<1x1x16xf32> to vector<1x16xf32>
    %56 = vector.broadcast %55 : vector<1x16xf32> to vector<16x16xf32>
    %57 = arith.addf %53, %56 : vector<16x16xf32>
    %c1_41 = arith.constant 1 : index
    %c0_42 = arith.constant 0 : index
    %c0_43 = arith.constant 0 : index
    %58 = vector.load %arg4[%c1_41, %c0_42, %c0_43] : memref<4x64x16xbf16, #tpu.memory_space<vmem>>, vector<1x64x16xbf16>
    %59 = vector.shape_cast %58 : vector<1x64x16xbf16> to vector<64x16xbf16>
    %cst_44 = arith.constant dense<0.000000e+00> : vector<16x16xf32>
    %60 = tpu.matmul %5, %59, %cst_44 {dimension_numbers = #tpu.dot_dimension_numbers<[1], [0], [0], [1], [0, 0, 1, 1], [], []>} : vector<16x64xbf16>, vector<64x16xbf16>, vector<16x16xf32> -> vector<16x16xf32>
    %c1_45 = arith.constant 1 : index
    %c0_46 = arith.constant 0 : index
    %c0_47 = arith.constant 0 : index
    %61 = vector.load %arg8[%c1_45, %c0_46, %c0_47] : memref<4x1x16xf32, #tpu.memory_space<vmem>>, vector<1x1x16xf32>
    %62 = vector.shape_cast %61 : vector<1x1x16xf32> to vector<1x16xf32>
    %63 = vector.broadcast %62 : vector<1x16xf32> to vector<16x16xf32>
    %64 = arith.addf %60, %63 : vector<16x16xf32>
    %c1_48 = arith.constant 1 : index
    %c0_49 = arith.constant 0 : index
    %c0_50 = arith.constant 0 : index
    %65 = vector.load %arg5[%c1_48, %c0_49, %c0_50] : memref<4x64x16xbf16, #tpu.memory_space<vmem>>, vector<1x64x16xbf16>
    %66 = vector.shape_cast %65 : vector<1x64x16xbf16> to vector<64x16xbf16>
    %cst_51 = arith.constant dense<0.000000e+00> : vector<16x16xf32>
    %67 = tpu.matmul %5, %66, %cst_51 {dimension_numbers = #tpu.dot_dimension_numbers<[1], [0], [0], [1], [0, 0, 1, 1], [], []>} : vector<16x64xbf16>, vector<64x16xbf16>, vector<16x16xf32> -> vector<16x16xf32>
    %c1_52 = arith.constant 1 : index
    %c0_53 = arith.constant 0 : index
    %c0_54 = arith.constant 0 : index
    %68 = vector.load %arg9[%c1_52, %c0_53, %c0_54] : memref<4x1x16xf32, #tpu.memory_space<vmem>>, vector<1x1x16xf32>
    %69 = vector.shape_cast %68 : vector<1x1x16xf32> to vector<1x16xf32>
    %70 = vector.broadcast %69 : vector<1x16xf32> to vector<16x16xf32>
    %71 = arith.addf %67, %70 : vector<16x16xf32>
    %72 = arith.truncf %57 : vector<16x16xf32> to vector<16x16xbf16>
    %73 = arith.truncf %64 : vector<16x16xf32> to vector<16x16xbf16>
    %cst_55 = arith.constant dense<0.000000e+00> : vector<16x16xf32>
    %74 = tpu.matmul %72, %73, %cst_55 {dimension_numbers = #tpu.dot_dimension_numbers<[1], [1], [0], [0], [0, 0, 1, 0], [], []>} : vector<16x16xbf16>, vector<16x16xbf16>, vector<16x16xf32> -> vector<16x16xf32>
    %cst_56 = arith.constant 2.500000e-01 : f32
    %75 = vector.broadcast %cst_56 : f32 to vector<16x16xf32>
    %76 = arith.mulf %74, %75 : vector<16x16xf32>
    %cst_57 = arith.constant dense<0xFF800000> : vector<16xf32>
    %77 = vector.multi_reduction <maximumf>, %76, %cst_57 [1] : vector<16x16xf32> to vector<16xf32>
    %78 = vector.shape_cast %77 : vector<16xf32> to vector<16x1xf32>
    %79 = vector.broadcast %78 : vector<16x1xf32> to vector<16x16xf32>
    %80 = arith.subf %76, %79 : vector<16x16xf32>
    %81 = math.exp %80 : vector<16x16xf32>
    %cst_58 = arith.constant dense<0.000000e+00> : vector<16xf32>
    %82 = vector.multi_reduction <add>, %81, %cst_58 [1] : vector<16x16xf32> to vector<16xf32>
    %83 = vector.shape_cast %82 : vector<16xf32> to vector<16x1xf32>
    %84 = tpu.reciprocal %83 {approx = true} : vector<16x1xf32> -> vector<16x1xf32>
    %85 = vector.broadcast %84 : vector<16x1xf32> to vector<16x16xf32>
    %86 = arith.mulf %81, %85 : vector<16x16xf32>
    %87 = arith.truncf %86 : vector<16x16xf32> to vector<16x16xbf16>
    %88 = arith.truncf %71 : vector<16x16xf32> to vector<16x16xbf16>
    %cst_59 = arith.constant dense<0.000000e+00> : vector<16x16xf32>
    %89 = tpu.matmul %87, %88, %cst_59 {dimension_numbers = #tpu.dot_dimension_numbers<[1], [0], [0], [1], [0, 0, 1, 1], [], []>} : vector<16x16xbf16>, vector<16x16xbf16>, vector<16x16xf32> -> vector<16x16xf32>
    %c1_60 = arith.constant 1 : index
    %c0_61 = arith.constant 0 : index
    %c0_62 = arith.constant 0 : index
    %90 = vector.load %arg6[%c1_60, %c0_61, %c0_62] : memref<4x16x64xbf16, #tpu.memory_space<vmem>>, vector<1x16x64xbf16>
    %91 = vector.shape_cast %90 : vector<1x16x64xbf16> to vector<16x64xbf16>
    %92 = arith.truncf %89 : vector<16x16xf32> to vector<16x16xbf16>
    %cst_63 = arith.constant dense<0.000000e+00> : vector<16x64xf32>
    %93 = tpu.matmul %92, %91, %cst_63 {dimension_numbers = #tpu.dot_dimension_numbers<[1], [0], [0], [1], [0, 0, 1, 1], [], []>} : vector<16x16xbf16>, vector<16x64xbf16>, vector<16x64xf32> -> vector<16x64xf32>
    %94 = arith.addf %50, %93 : vector<16x64xf32>
    %c2 = arith.constant 2 : index
    %c0_64 = arith.constant 0 : index
    %c0_65 = arith.constant 0 : index
    %95 = vector.load %arg3[%c2, %c0_64, %c0_65] : memref<4x64x16xbf16, #tpu.memory_space<vmem>>, vector<1x64x16xbf16>
    %96 = vector.shape_cast %95 : vector<1x64x16xbf16> to vector<64x16xbf16>
    %cst_66 = arith.constant dense<0.000000e+00> : vector<16x16xf32>
    %97 = tpu.matmul %4, %96, %cst_66 {dimension_numbers = #tpu.dot_dimension_numbers<[1], [0], [0], [1], [0, 0, 1, 1], [], []>} : vector<16x64xbf16>, vector<64x16xbf16>, vector<16x16xf32> -> vector<16x16xf32>
    %c2_67 = arith.constant 2 : index
    %c0_68 = arith.constant 0 : index
    %c0_69 = arith.constant 0 : index
    %98 = vector.load %arg7[%c2_67, %c0_68, %c0_69] : memref<4x1x16xf32, #tpu.memory_space<vmem>>, vector<1x1x16xf32>
    %99 = vector.shape_cast %98 : vector<1x1x16xf32> to vector<1x16xf32>
    %100 = vector.broadcast %99 : vector<1x16xf32> to vector<16x16xf32>
    %101 = arith.addf %97, %100 : vector<16x16xf32>
    %c2_70 = arith.constant 2 : index
    %c0_71 = arith.constant 0 : index
    %c0_72 = arith.constant 0 : index
    %102 = vector.load %arg4[%c2_70, %c0_71, %c0_72] : memref<4x64x16xbf16, #tpu.memory_space<vmem>>, vector<1x64x16xbf16>
    %103 = vector.shape_cast %102 : vector<1x64x16xbf16> to vector<64x16xbf16>
    %cst_73 = arith.constant dense<0.000000e+00> : vector<16x16xf32>
    %104 = tpu.matmul %5, %103, %cst_73 {dimension_numbers = #tpu.dot_dimension_numbers<[1], [0], [0], [1], [0, 0, 1, 1], [], []>} : vector<16x64xbf16>, vector<64x16xbf16>, vector<16x16xf32> -> vector<16x16xf32>
    %c2_74 = arith.constant 2 : index
    %c0_75 = arith.constant 0 : index
    %c0_76 = arith.constant 0 : index
    %105 = vector.load %arg8[%c2_74, %c0_75, %c0_76] : memref<4x1x16xf32, #tpu.memory_space<vmem>>, vector<1x1x16xf32>
    %106 = vector.shape_cast %105 : vector<1x1x16xf32> to vector<1x16xf32>
    %107 = vector.broadcast %106 : vector<1x16xf32> to vector<16x16xf32>
    %108 = arith.addf %104, %107 : vector<16x16xf32>
    %c2_77 = arith.constant 2 : index
    %c0_78 = arith.constant 0 : index
    %c0_79 = arith.constant 0 : index
    %109 = vector.load %arg5[%c2_77, %c0_78, %c0_79] : memref<4x64x16xbf16, #tpu.memory_space<vmem>>, vector<1x64x16xbf16>
    %110 = vector.shape_cast %109 : vector<1x64x16xbf16> to vector<64x16xbf16>
    %cst_80 = arith.constant dense<0.000000e+00> : vector<16x16xf32>
    %111 = tpu.matmul %5, %110, %cst_80 {dimension_numbers = #tpu.dot_dimension_numbers<[1], [0], [0], [1], [0, 0, 1, 1], [], []>} : vector<16x64xbf16>, vector<64x16xbf16>, vector<16x16xf32> -> vector<16x16xf32>
    %c2_81 = arith.constant 2 : index
    %c0_82 = arith.constant 0 : index
    %c0_83 = arith.constant 0 : index
    %112 = vector.load %arg9[%c2_81, %c0_82, %c0_83] : memref<4x1x16xf32, #tpu.memory_space<vmem>>, vector<1x1x16xf32>
    %113 = vector.shape_cast %112 : vector<1x1x16xf32> to vector<1x16xf32>
    %114 = vector.broadcast %113 : vector<1x16xf32> to vector<16x16xf32>
    %115 = arith.addf %111, %114 : vector<16x16xf32>
    %116 = arith.truncf %101 : vector<16x16xf32> to vector<16x16xbf16>
    %117 = arith.truncf %108 : vector<16x16xf32> to vector<16x16xbf16>
    %cst_84 = arith.constant dense<0.000000e+00> : vector<16x16xf32>
    %118 = tpu.matmul %116, %117, %cst_84 {dimension_numbers = #tpu.dot_dimension_numbers<[1], [1], [0], [0], [0, 0, 1, 0], [], []>} : vector<16x16xbf16>, vector<16x16xbf16>, vector<16x16xf32> -> vector<16x16xf32>
    %cst_85 = arith.constant 2.500000e-01 : f32
    %119 = vector.broadcast %cst_85 : f32 to vector<16x16xf32>
    %120 = arith.mulf %118, %119 : vector<16x16xf32>
    %cst_86 = arith.constant dense<0xFF800000> : vector<16xf32>
    %121 = vector.multi_reduction <maximumf>, %120, %cst_86 [1] : vector<16x16xf32> to vector<16xf32>
    %122 = vector.shape_cast %121 : vector<16xf32> to vector<16x1xf32>
    %123 = vector.broadcast %122 : vector<16x1xf32> to vector<16x16xf32>
    %124 = arith.subf %120, %123 : vector<16x16xf32>
    %125 = math.exp %124 : vector<16x16xf32>
    %cst_87 = arith.constant dense<0.000000e+00> : vector<16xf32>
    %126 = vector.multi_reduction <add>, %125, %cst_87 [1] : vector<16x16xf32> to vector<16xf32>
    %127 = vector.shape_cast %126 : vector<16xf32> to vector<16x1xf32>
    %128 = tpu.reciprocal %127 {approx = true} : vector<16x1xf32> -> vector<16x1xf32>
    %129 = vector.broadcast %128 : vector<16x1xf32> to vector<16x16xf32>
    %130 = arith.mulf %125, %129 : vector<16x16xf32>
    %131 = arith.truncf %130 : vector<16x16xf32> to vector<16x16xbf16>
    %132 = arith.truncf %115 : vector<16x16xf32> to vector<16x16xbf16>
    %cst_88 = arith.constant dense<0.000000e+00> : vector<16x16xf32>
    %133 = tpu.matmul %131, %132, %cst_88 {dimension_numbers = #tpu.dot_dimension_numbers<[1], [0], [0], [1], [0, 0, 1, 1], [], []>} : vector<16x16xbf16>, vector<16x16xbf16>, vector<16x16xf32> -> vector<16x16xf32>
    %c2_89 = arith.constant 2 : index
    %c0_90 = arith.constant 0 : index
    %c0_91 = arith.constant 0 : index
    %134 = vector.load %arg6[%c2_89, %c0_90, %c0_91] : memref<4x16x64xbf16, #tpu.memory_space<vmem>>, vector<1x16x64xbf16>
    %135 = vector.shape_cast %134 : vector<1x16x64xbf16> to vector<16x64xbf16>
    %136 = arith.truncf %133 : vector<16x16xf32> to vector<16x16xbf16>
    %cst_92 = arith.constant dense<0.000000e+00> : vector<16x64xf32>
    %137 = tpu.matmul %136, %135, %cst_92 {dimension_numbers = #tpu.dot_dimension_numbers<[1], [0], [0], [1], [0, 0, 1, 1], [], []>} : vector<16x16xbf16>, vector<16x64xbf16>, vector<16x64xf32> -> vector<16x64xf32>
    %138 = arith.addf %94, %137 : vector<16x64xf32>
    %c3 = arith.constant 3 : index
    %c0_93 = arith.constant 0 : index
    %c0_94 = arith.constant 0 : index
    %139 = vector.load %arg3[%c3, %c0_93, %c0_94] : memref<4x64x16xbf16, #tpu.memory_space<vmem>>, vector<1x64x16xbf16>
    %140 = vector.shape_cast %139 : vector<1x64x16xbf16> to vector<64x16xbf16>
    %cst_95 = arith.constant dense<0.000000e+00> : vector<16x16xf32>
    %141 = tpu.matmul %4, %140, %cst_95 {dimension_numbers = #tpu.dot_dimension_numbers<[1], [0], [0], [1], [0, 0, 1, 1], [], []>} : vector<16x64xbf16>, vector<64x16xbf16>, vector<16x16xf32> -> vector<16x16xf32>
    %c3_96 = arith.constant 3 : index
    %c0_97 = arith.constant 0 : index
    %c0_98 = arith.constant 0 : index
    %142 = vector.load %arg7[%c3_96, %c0_97, %c0_98] : memref<4x1x16xf32, #tpu.memory_space<vmem>>, vector<1x1x16xf32>
    %143 = vector.shape_cast %142 : vector<1x1x16xf32> to vector<1x16xf32>
    %144 = vector.broadcast %143 : vector<1x16xf32> to vector<16x16xf32>
    %145 = arith.addf %141, %144 : vector<16x16xf32>
    %c3_99 = arith.constant 3 : index
    %c0_100 = arith.constant 0 : index
    %c0_101 = arith.constant 0 : index
    %146 = vector.load %arg4[%c3_99, %c0_100, %c0_101] : memref<4x64x16xbf16, #tpu.memory_space<vmem>>, vector<1x64x16xbf16>
    %147 = vector.shape_cast %146 : vector<1x64x16xbf16> to vector<64x16xbf16>
    %cst_102 = arith.constant dense<0.000000e+00> : vector<16x16xf32>
    %148 = tpu.matmul %5, %147, %cst_102 {dimension_numbers = #tpu.dot_dimension_numbers<[1], [0], [0], [1], [0, 0, 1, 1], [], []>} : vector<16x64xbf16>, vector<64x16xbf16>, vector<16x16xf32> -> vector<16x16xf32>
    %c3_103 = arith.constant 3 : index
    %c0_104 = arith.constant 0 : index
    %c0_105 = arith.constant 0 : index
    %149 = vector.load %arg8[%c3_103, %c0_104, %c0_105] : memref<4x1x16xf32, #tpu.memory_space<vmem>>, vector<1x1x16xf32>
    %150 = vector.shape_cast %149 : vector<1x1x16xf32> to vector<1x16xf32>
    %151 = vector.broadcast %150 : vector<1x16xf32> to vector<16x16xf32>
    %152 = arith.addf %148, %151 : vector<16x16xf32>
    %c3_106 = arith.constant 3 : index
    %c0_107 = arith.constant 0 : index
    %c0_108 = arith.constant 0 : index
    %153 = vector.load %arg5[%c3_106, %c0_107, %c0_108] : memref<4x64x16xbf16, #tpu.memory_space<vmem>>, vector<1x64x16xbf16>
    %154 = vector.shape_cast %153 : vector<1x64x16xbf16> to vector<64x16xbf16>
    %cst_109 = arith.constant dense<0.000000e+00> : vector<16x16xf32>
    %155 = tpu.matmul %5, %154, %cst_109 {dimension_numbers = #tpu.dot_dimension_numbers<[1], [0], [0], [1], [0, 0, 1, 1], [], []>} : vector<16x64xbf16>, vector<64x16xbf16>, vector<16x16xf32> -> vector<16x16xf32>
    %c3_110 = arith.constant 3 : index
    %c0_111 = arith.constant 0 : index
    %c0_112 = arith.constant 0 : index
    %156 = vector.load %arg9[%c3_110, %c0_111, %c0_112] : memref<4x1x16xf32, #tpu.memory_space<vmem>>, vector<1x1x16xf32>
    %157 = vector.shape_cast %156 : vector<1x1x16xf32> to vector<1x16xf32>
    %158 = vector.broadcast %157 : vector<1x16xf32> to vector<16x16xf32>
    %159 = arith.addf %155, %158 : vector<16x16xf32>
    %160 = arith.truncf %145 : vector<16x16xf32> to vector<16x16xbf16>
    %161 = arith.truncf %152 : vector<16x16xf32> to vector<16x16xbf16>
    %cst_113 = arith.constant dense<0.000000e+00> : vector<16x16xf32>
    %162 = tpu.matmul %160, %161, %cst_113 {dimension_numbers = #tpu.dot_dimension_numbers<[1], [1], [0], [0], [0, 0, 1, 0], [], []>} : vector<16x16xbf16>, vector<16x16xbf16>, vector<16x16xf32> -> vector<16x16xf32>
    %cst_114 = arith.constant 2.500000e-01 : f32
    %163 = vector.broadcast %cst_114 : f32 to vector<16x16xf32>
    %164 = arith.mulf %162, %163 : vector<16x16xf32>
    %cst_115 = arith.constant dense<0xFF800000> : vector<16xf32>
    %165 = vector.multi_reduction <maximumf>, %164, %cst_115 [1] : vector<16x16xf32> to vector<16xf32>
    %166 = vector.shape_cast %165 : vector<16xf32> to vector<16x1xf32>
    %167 = vector.broadcast %166 : vector<16x1xf32> to vector<16x16xf32>
    %168 = arith.subf %164, %167 : vector<16x16xf32>
    %169 = math.exp %168 : vector<16x16xf32>
    %cst_116 = arith.constant dense<0.000000e+00> : vector<16xf32>
    %170 = vector.multi_reduction <add>, %169, %cst_116 [1] : vector<16x16xf32> to vector<16xf32>
    %171 = vector.shape_cast %170 : vector<16xf32> to vector<16x1xf32>
    %172 = tpu.reciprocal %171 {approx = true} : vector<16x1xf32> -> vector<16x1xf32>
    %173 = vector.broadcast %172 : vector<16x1xf32> to vector<16x16xf32>
    %174 = arith.mulf %169, %173 : vector<16x16xf32>
    %175 = arith.truncf %174 : vector<16x16xf32> to vector<16x16xbf16>
    %176 = arith.truncf %159 : vector<16x16xf32> to vector<16x16xbf16>
    %cst_117 = arith.constant dense<0.000000e+00> : vector<16x16xf32>
    %177 = tpu.matmul %175, %176, %cst_117 {dimension_numbers = #tpu.dot_dimension_numbers<[1], [0], [0], [1], [0, 0, 1, 1], [], []>} : vector<16x16xbf16>, vector<16x16xbf16>, vector<16x16xf32> -> vector<16x16xf32>
    %c3_118 = arith.constant 3 : index
    %c0_119 = arith.constant 0 : index
    %c0_120 = arith.constant 0 : index
    %178 = vector.load %arg6[%c3_118, %c0_119, %c0_120] : memref<4x16x64xbf16, #tpu.memory_space<vmem>>, vector<1x16x64xbf16>
    %179 = vector.shape_cast %178 : vector<1x16x64xbf16> to vector<16x64xbf16>
    %180 = arith.truncf %177 : vector<16x16xf32> to vector<16x16xbf16>
    %cst_121 = arith.constant dense<0.000000e+00> : vector<16x64xf32>
    %181 = tpu.matmul %180, %179, %cst_121 {dimension_numbers = #tpu.dot_dimension_numbers<[1], [0], [0], [1], [0, 0, 1, 1], [], []>} : vector<16x16xbf16>, vector<16x64xbf16>, vector<16x64xf32> -> vector<16x64xf32>
    %182 = arith.addf %138, %181 : vector<16x64xf32>
    %c0_122 = arith.constant 0 : index
    %c0_123 = arith.constant 0 : index
    %183 = vector.load %arg10[%c0_122, %c0_123] : memref<1x64xf32, #tpu.memory_space<vmem>>, vector<1x64xf32>
    %184 = vector.broadcast %183 : vector<1x64xf32> to vector<16x64xf32>
    %185 = arith.addf %182, %184 : vector<16x64xf32>
    %186 = arith.addf %3, %185 : vector<16x64xf32>
    %cst_124 = arith.constant dense<0.000000e+00> : vector<16xf32>
    %187 = vector.multi_reduction <add>, %186, %cst_124 [1] : vector<16x64xf32> to vector<16xf32>
    %188 = vector.shape_cast %187 : vector<16xf32> to vector<16x1xf32>
    %cst_125 = arith.constant 6.400000e+01 : f32
    %189 = vector.broadcast %cst_125 : f32 to vector<16x1xf32>
    %190 = arith.divf %188, %189 : vector<16x1xf32>
    %191 = vector.broadcast %190 : vector<16x1xf32> to vector<16x64xf32>
    %192 = arith.subf %186, %191 : vector<16x64xf32>
    %193 = arith.mulf %192, %192 : vector<16x64xf32>
    %cst_126 = arith.constant dense<0.000000e+00> : vector<16xf32>
    %194 = vector.multi_reduction <add>, %193, %cst_126 [1] : vector<16x64xf32> to vector<16xf32>
    %195 = vector.shape_cast %194 : vector<16xf32> to vector<16x1xf32>
    %cst_127 = arith.constant 6.400000e+01 : f32
    %196 = vector.broadcast %cst_127 : f32 to vector<16x1xf32>
    %197 = arith.divf %195, %196 : vector<16x1xf32>
    %198 = vector.broadcast %190 : vector<16x1xf32> to vector<16x64xf32>
    %199 = arith.subf %186, %198 : vector<16x64xf32>
    %cst_128 = arith.constant 9.99999974E-6 : f32
    %200 = vector.broadcast %cst_128 : f32 to vector<16x1xf32>
    %201 = arith.addf %197, %200 : vector<16x1xf32>
    %202 = math.rsqrt %201 : vector<16x1xf32>
    %203 = vector.broadcast %202 : vector<16x1xf32> to vector<16x64xf32>
    %204 = arith.mulf %199, %203 : vector<16x64xf32>
    %c0_129 = arith.constant 0 : index
    %c0_130 = arith.constant 0 : index
    %205 = vector.load %arg11[%c0_129, %c0_130] : memref<1x64xf32, #tpu.memory_space<vmem>>, vector<1x64xf32>
    %206 = vector.broadcast %205 : vector<1x64xf32> to vector<16x64xf32>
    %207 = arith.mulf %204, %206 : vector<16x64xf32>
    %c0_131 = arith.constant 0 : index
    %c0_132 = arith.constant 0 : index
    %208 = vector.load %arg12[%c0_131, %c0_132] : memref<1x64xf32, #tpu.memory_space<vmem>>, vector<1x64xf32>
    %209 = vector.broadcast %208 : vector<1x64xf32> to vector<16x64xf32>
    %210 = arith.addf %207, %209 : vector<16x64xf32>
    %211 = arith.truncf %210 : vector<16x64xf32> to vector<16x64xbf16>
    %212 = arith.truncf %1 : vector<16x64xf32> to vector<16x64xbf16>
    %cst_133 = arith.constant 0.000000e+00 : f32
    %213 = vector.broadcast %cst_133 : f32 to vector<16x64xf32>
    %c0_134 = arith.constant 0 : index
    %c0_135 = arith.constant 0 : index
    %c0_136 = arith.constant 0 : index
    %214 = vector.load %arg13[%c0_134, %c0_135, %c0_136] : memref<4x64x16xbf16, #tpu.memory_space<vmem>>, vector<1x64x16xbf16>
    %215 = vector.shape_cast %214 : vector<1x64x16xbf16> to vector<64x16xbf16>
    %cst_137 = arith.constant dense<0.000000e+00> : vector<16x16xf32>
    %216 = tpu.matmul %211, %215, %cst_137 {dimension_numbers = #tpu.dot_dimension_numbers<[1], [0], [0], [1], [0, 0, 1, 1], [], []>} : vector<16x64xbf16>, vector<64x16xbf16>, vector<16x16xf32> -> vector<16x16xf32>
    %c0_138 = arith.constant 0 : index
    %c0_139 = arith.constant 0 : index
    %c0_140 = arith.constant 0 : index
    %217 = vector.load %arg17[%c0_138, %c0_139, %c0_140] : memref<4x1x16xf32, #tpu.memory_space<vmem>>, vector<1x1x16xf32>
    %218 = vector.shape_cast %217 : vector<1x1x16xf32> to vector<1x16xf32>
    %219 = vector.broadcast %218 : vector<1x16xf32> to vector<16x16xf32>
    %220 = arith.addf %216, %219 : vector<16x16xf32>
    %c0_141 = arith.constant 0 : index
    %c0_142 = arith.constant 0 : index
    %c0_143 = arith.constant 0 : index
    %221 = vector.load %arg14[%c0_141, %c0_142, %c0_143] : memref<4x64x16xbf16, #tpu.memory_space<vmem>>, vector<1x64x16xbf16>
    %222 = vector.shape_cast %221 : vector<1x64x16xbf16> to vector<64x16xbf16>
    %cst_144 = arith.constant dense<0.000000e+00> : vector<16x16xf32>
    %223 = tpu.matmul %212, %222, %cst_144 {dimension_numbers = #tpu.dot_dimension_numbers<[1], [0], [0], [1], [0, 0, 1, 1], [], []>} : vector<16x64xbf16>, vector<64x16xbf16>, vector<16x16xf32> -> vector<16x16xf32>
    %c0_145 = arith.constant 0 : index
    %c0_146 = arith.constant 0 : index
    %c0_147 = arith.constant 0 : index
    %224 = vector.load %arg18[%c0_145, %c0_146, %c0_147] : memref<4x1x16xf32, #tpu.memory_space<vmem>>, vector<1x1x16xf32>
    %225 = vector.shape_cast %224 : vector<1x1x16xf32> to vector<1x16xf32>
    %226 = vector.broadcast %225 : vector<1x16xf32> to vector<16x16xf32>
    %227 = arith.addf %223, %226 : vector<16x16xf32>
    %c0_148 = arith.constant 0 : index
    %c0_149 = arith.constant 0 : index
    %c0_150 = arith.constant 0 : index
    %228 = vector.load %arg15[%c0_148, %c0_149, %c0_150] : memref<4x64x16xbf16, #tpu.memory_space<vmem>>, vector<1x64x16xbf16>
    %229 = vector.shape_cast %228 : vector<1x64x16xbf16> to vector<64x16xbf16>
    %cst_151 = arith.constant dense<0.000000e+00> : vector<16x16xf32>
    %230 = tpu.matmul %212, %229, %cst_151 {dimension_numbers = #tpu.dot_dimension_numbers<[1], [0], [0], [1], [0, 0, 1, 1], [], []>} : vector<16x64xbf16>, vector<64x16xbf16>, vector<16x16xf32> -> vector<16x16xf32>
    %c0_152 = arith.constant 0 : index
    %c0_153 = arith.constant 0 : index
    %c0_154 = arith.constant 0 : index
    %231 = vector.load %arg19[%c0_152, %c0_153, %c0_154] : memref<4x1x16xf32, #tpu.memory_space<vmem>>, vector<1x1x16xf32>
    %232 = vector.shape_cast %231 : vector<1x1x16xf32> to vector<1x16xf32>
    %233 = vector.broadcast %232 : vector<1x16xf32> to vector<16x16xf32>
    %234 = arith.addf %230, %233 : vector<16x16xf32>
    %235 = arith.truncf %220 : vector<16x16xf32> to vector<16x16xbf16>
    %236 = arith.truncf %227 : vector<16x16xf32> to vector<16x16xbf16>
    %cst_155 = arith.constant dense<0.000000e+00> : vector<16x16xf32>
    %237 = tpu.matmul %235, %236, %cst_155 {dimension_numbers = #tpu.dot_dimension_numbers<[1], [1], [0], [0], [0, 0, 1, 0], [], []>} : vector<16x16xbf16>, vector<16x16xbf16>, vector<16x16xf32> -> vector<16x16xf32>
    %cst_156 = arith.constant 2.500000e-01 : f32
    %238 = vector.broadcast %cst_156 : f32 to vector<16x16xf32>
    %239 = arith.mulf %237, %238 : vector<16x16xf32>
    %cst_157 = arith.constant dense<0xFF800000> : vector<16xf32>
    %240 = vector.multi_reduction <maximumf>, %239, %cst_157 [1] : vector<16x16xf32> to vector<16xf32>
    %241 = vector.shape_cast %240 : vector<16xf32> to vector<16x1xf32>
    %242 = vector.broadcast %241 : vector<16x1xf32> to vector<16x16xf32>
    %243 = arith.subf %239, %242 : vector<16x16xf32>
    %244 = math.exp %243 : vector<16x16xf32>
    %cst_158 = arith.constant dense<0.000000e+00> : vector<16xf32>
    %245 = vector.multi_reduction <add>, %244, %cst_158 [1] : vector<16x16xf32> to vector<16xf32>
    %246 = vector.shape_cast %245 : vector<16xf32> to vector<16x1xf32>
    %247 = tpu.reciprocal %246 {approx = true} : vector<16x1xf32> -> vector<16x1xf32>
    %248 = vector.broadcast %247 : vector<16x1xf32> to vector<16x16xf32>
    %249 = arith.mulf %244, %248 : vector<16x16xf32>
    %250 = arith.truncf %249 : vector<16x16xf32> to vector<16x16xbf16>
    %251 = arith.truncf %234 : vector<16x16xf32> to vector<16x16xbf16>
    %cst_159 = arith.constant dense<0.000000e+00> : vector<16x16xf32>
    %252 = tpu.matmul %250, %251, %cst_159 {dimension_numbers = #tpu.dot_dimension_numbers<[1], [0], [0], [1], [0, 0, 1, 1], [], []>} : vector<16x16xbf16>, vector<16x16xbf16>, vector<16x16xf32> -> vector<16x16xf32>
    %c0_160 = arith.constant 0 : index
    %c0_161 = arith.constant 0 : index
    %c0_162 = arith.constant 0 : index
    %253 = vector.load %arg16[%c0_160, %c0_161, %c0_162] : memref<4x16x64xbf16, #tpu.memory_space<vmem>>, vector<1x16x64xbf16>
    %254 = vector.shape_cast %253 : vector<1x16x64xbf16> to vector<16x64xbf16>
    %255 = arith.truncf %252 : vector<16x16xf32> to vector<16x16xbf16>
    %cst_163 = arith.constant dense<0.000000e+00> : vector<16x64xf32>
    %256 = tpu.matmul %255, %254, %cst_163 {dimension_numbers = #tpu.dot_dimension_numbers<[1], [0], [0], [1], [0, 0, 1, 1], [], []>} : vector<16x16xbf16>, vector<16x64xbf16>, vector<16x64xf32> -> vector<16x64xf32>
    %257 = arith.addf %213, %256 : vector<16x64xf32>
    %c1_164 = arith.constant 1 : index
    %c0_165 = arith.constant 0 : index
    %c0_166 = arith.constant 0 : index
    %258 = vector.load %arg13[%c1_164, %c0_165, %c0_166] : memref<4x64x16xbf16, #tpu.memory_space<vmem>>, vector<1x64x16xbf16>
    %259 = vector.shape_cast %258 : vector<1x64x16xbf16> to vector<64x16xbf16>
    %cst_167 = arith.constant dense<0.000000e+00> : vector<16x16xf32>
    %260 = tpu.matmul %211, %259, %cst_167 {dimension_numbers = #tpu.dot_dimension_numbers<[1], [0], [0], [1], [0, 0, 1, 1], [], []>} : vector<16x64xbf16>, vector<64x16xbf16>, vector<16x16xf32> -> vector<16x16xf32>
    %c1_168 = arith.constant 1 : index
    %c0_169 = arith.constant 0 : index
    %c0_170 = arith.constant 0 : index
    %261 = vector.load %arg17[%c1_168, %c0_169, %c0_170] : memref<4x1x16xf32, #tpu.memory_space<vmem>>, vector<1x1x16xf32>
    %262 = vector.shape_cast %261 : vector<1x1x16xf32> to vector<1x16xf32>
    %263 = vector.broadcast %262 : vector<1x16xf32> to vector<16x16xf32>
    %264 = arith.addf %260, %263 : vector<16x16xf32>
    %c1_171 = arith.constant 1 : index
    %c0_172 = arith.constant 0 : index
    %c0_173 = arith.constant 0 : index
    %265 = vector.load %arg14[%c1_171, %c0_172, %c0_173] : memref<4x64x16xbf16, #tpu.memory_space<vmem>>, vector<1x64x16xbf16>
    %266 = vector.shape_cast %265 : vector<1x64x16xbf16> to vector<64x16xbf16>
    %cst_174 = arith.constant dense<0.000000e+00> : vector<16x16xf32>
    %267 = tpu.matmul %212, %266, %cst_174 {dimension_numbers = #tpu.dot_dimension_numbers<[1], [0], [0], [1], [0, 0, 1, 1], [], []>} : vector<16x64xbf16>, vector<64x16xbf16>, vector<16x16xf32> -> vector<16x16xf32>
    %c1_175 = arith.constant 1 : index
    %c0_176 = arith.constant 0 : index
    %c0_177 = arith.constant 0 : index
    %268 = vector.load %arg18[%c1_175, %c0_176, %c0_177] : memref<4x1x16xf32, #tpu.memory_space<vmem>>, vector<1x1x16xf32>
    %269 = vector.shape_cast %268 : vector<1x1x16xf32> to vector<1x16xf32>
    %270 = vector.broadcast %269 : vector<1x16xf32> to vector<16x16xf32>
    %271 = arith.addf %267, %270 : vector<16x16xf32>
    %c1_178 = arith.constant 1 : index
    %c0_179 = arith.constant 0 : index
    %c0_180 = arith.constant 0 : index
    %272 = vector.load %arg15[%c1_178, %c0_179, %c0_180] : memref<4x64x16xbf16, #tpu.memory_space<vmem>>, vector<1x64x16xbf16>
    %273 = vector.shape_cast %272 : vector<1x64x16xbf16> to vector<64x16xbf16>
    %cst_181 = arith.constant dense<0.000000e+00> : vector<16x16xf32>
    %274 = tpu.matmul %212, %273, %cst_181 {dimension_numbers = #tpu.dot_dimension_numbers<[1], [0], [0], [1], [0, 0, 1, 1], [], []>} : vector<16x64xbf16>, vector<64x16xbf16>, vector<16x16xf32> -> vector<16x16xf32>
    %c1_182 = arith.constant 1 : index
    %c0_183 = arith.constant 0 : index
    %c0_184 = arith.constant 0 : index
    %275 = vector.load %arg19[%c1_182, %c0_183, %c0_184] : memref<4x1x16xf32, #tpu.memory_space<vmem>>, vector<1x1x16xf32>
    %276 = vector.shape_cast %275 : vector<1x1x16xf32> to vector<1x16xf32>
    %277 = vector.broadcast %276 : vector<1x16xf32> to vector<16x16xf32>
    %278 = arith.addf %274, %277 : vector<16x16xf32>
    %279 = arith.truncf %264 : vector<16x16xf32> to vector<16x16xbf16>
    %280 = arith.truncf %271 : vector<16x16xf32> to vector<16x16xbf16>
    %cst_185 = arith.constant dense<0.000000e+00> : vector<16x16xf32>
    %281 = tpu.matmul %279, %280, %cst_185 {dimension_numbers = #tpu.dot_dimension_numbers<[1], [1], [0], [0], [0, 0, 1, 0], [], []>} : vector<16x16xbf16>, vector<16x16xbf16>, vector<16x16xf32> -> vector<16x16xf32>
    %cst_186 = arith.constant 2.500000e-01 : f32
    %282 = vector.broadcast %cst_186 : f32 to vector<16x16xf32>
    %283 = arith.mulf %281, %282 : vector<16x16xf32>
    %cst_187 = arith.constant dense<0xFF800000> : vector<16xf32>
    %284 = vector.multi_reduction <maximumf>, %283, %cst_187 [1] : vector<16x16xf32> to vector<16xf32>
    %285 = vector.shape_cast %284 : vector<16xf32> to vector<16x1xf32>
    %286 = vector.broadcast %285 : vector<16x1xf32> to vector<16x16xf32>
    %287 = arith.subf %283, %286 : vector<16x16xf32>
    %288 = math.exp %287 : vector<16x16xf32>
    %cst_188 = arith.constant dense<0.000000e+00> : vector<16xf32>
    %289 = vector.multi_reduction <add>, %288, %cst_188 [1] : vector<16x16xf32> to vector<16xf32>
    %290 = vector.shape_cast %289 : vector<16xf32> to vector<16x1xf32>
    %291 = tpu.reciprocal %290 {approx = true} : vector<16x1xf32> -> vector<16x1xf32>
    %292 = vector.broadcast %291 : vector<16x1xf32> to vector<16x16xf32>
    %293 = arith.mulf %288, %292 : vector<16x16xf32>
    %294 = arith.truncf %293 : vector<16x16xf32> to vector<16x16xbf16>
    %295 = arith.truncf %278 : vector<16x16xf32> to vector<16x16xbf16>
    %cst_189 = arith.constant dense<0.000000e+00> : vector<16x16xf32>
    %296 = tpu.matmul %294, %295, %cst_189 {dimension_numbers = #tpu.dot_dimension_numbers<[1], [0], [0], [1], [0, 0, 1, 1], [], []>} : vector<16x16xbf16>, vector<16x16xbf16>, vector<16x16xf32> -> vector<16x16xf32>
    %c1_190 = arith.constant 1 : index
    %c0_191 = arith.constant 0 : index
    %c0_192 = arith.constant 0 : index
    %297 = vector.load %arg16[%c1_190, %c0_191, %c0_192] : memref<4x16x64xbf16, #tpu.memory_space<vmem>>, vector<1x16x64xbf16>
    %298 = vector.shape_cast %297 : vector<1x16x64xbf16> to vector<16x64xbf16>
    %299 = arith.truncf %296 : vector<16x16xf32> to vector<16x16xbf16>
    %cst_193 = arith.constant dense<0.000000e+00> : vector<16x64xf32>
    %300 = tpu.matmul %299, %298, %cst_193 {dimension_numbers = #tpu.dot_dimension_numbers<[1], [0], [0], [1], [0, 0, 1, 1], [], []>} : vector<16x16xbf16>, vector<16x64xbf16>, vector<16x64xf32> -> vector<16x64xf32>
    %301 = arith.addf %257, %300 : vector<16x64xf32>
    %c2_194 = arith.constant 2 : index
    %c0_195 = arith.constant 0 : index
    %c0_196 = arith.constant 0 : index
    %302 = vector.load %arg13[%c2_194, %c0_195, %c0_196] : memref<4x64x16xbf16, #tpu.memory_space<vmem>>, vector<1x64x16xbf16>
    %303 = vector.shape_cast %302 : vector<1x64x16xbf16> to vector<64x16xbf16>
    %cst_197 = arith.constant dense<0.000000e+00> : vector<16x16xf32>
    %304 = tpu.matmul %211, %303, %cst_197 {dimension_numbers = #tpu.dot_dimension_numbers<[1], [0], [0], [1], [0, 0, 1, 1], [], []>} : vector<16x64xbf16>, vector<64x16xbf16>, vector<16x16xf32> -> vector<16x16xf32>
    %c2_198 = arith.constant 2 : index
    %c0_199 = arith.constant 0 : index
    %c0_200 = arith.constant 0 : index
    %305 = vector.load %arg17[%c2_198, %c0_199, %c0_200] : memref<4x1x16xf32, #tpu.memory_space<vmem>>, vector<1x1x16xf32>
    %306 = vector.shape_cast %305 : vector<1x1x16xf32> to vector<1x16xf32>
    %307 = vector.broadcast %306 : vector<1x16xf32> to vector<16x16xf32>
    %308 = arith.addf %304, %307 : vector<16x16xf32>
    %c2_201 = arith.constant 2 : index
    %c0_202 = arith.constant 0 : index
    %c0_203 = arith.constant 0 : index
    %309 = vector.load %arg14[%c2_201, %c0_202, %c0_203] : memref<4x64x16xbf16, #tpu.memory_space<vmem>>, vector<1x64x16xbf16>
    %310 = vector.shape_cast %309 : vector<1x64x16xbf16> to vector<64x16xbf16>
    %cst_204 = arith.constant dense<0.000000e+00> : vector<16x16xf32>
    %311 = tpu.matmul %212, %310, %cst_204 {dimension_numbers = #tpu.dot_dimension_numbers<[1], [0], [0], [1], [0, 0, 1, 1], [], []>} : vector<16x64xbf16>, vector<64x16xbf16>, vector<16x16xf32> -> vector<16x16xf32>
    %c2_205 = arith.constant 2 : index
    %c0_206 = arith.constant 0 : index
    %c0_207 = arith.constant 0 : index
    %312 = vector.load %arg18[%c2_205, %c0_206, %c0_207] : memref<4x1x16xf32, #tpu.memory_space<vmem>>, vector<1x1x16xf32>
    %313 = vector.shape_cast %312 : vector<1x1x16xf32> to vector<1x16xf32>
    %314 = vector.broadcast %313 : vector<1x16xf32> to vector<16x16xf32>
    %315 = arith.addf %311, %314 : vector<16x16xf32>
    %c2_208 = arith.constant 2 : index
    %c0_209 = arith.constant 0 : index
    %c0_210 = arith.constant 0 : index
    %316 = vector.load %arg15[%c2_208, %c0_209, %c0_210] : memref<4x64x16xbf16, #tpu.memory_space<vmem>>, vector<1x64x16xbf16>
    %317 = vector.shape_cast %316 : vector<1x64x16xbf16> to vector<64x16xbf16>
    %cst_211 = arith.constant dense<0.000000e+00> : vector<16x16xf32>
    %318 = tpu.matmul %212, %317, %cst_211 {dimension_numbers = #tpu.dot_dimension_numbers<[1], [0], [0], [1], [0, 0, 1, 1], [], []>} : vector<16x64xbf16>, vector<64x16xbf16>, vector<16x16xf32> -> vector<16x16xf32>
    %c2_212 = arith.constant 2 : index
    %c0_213 = arith.constant 0 : index
    %c0_214 = arith.constant 0 : index
    %319 = vector.load %arg19[%c2_212, %c0_213, %c0_214] : memref<4x1x16xf32, #tpu.memory_space<vmem>>, vector<1x1x16xf32>
    %320 = vector.shape_cast %319 : vector<1x1x16xf32> to vector<1x16xf32>
    %321 = vector.broadcast %320 : vector<1x16xf32> to vector<16x16xf32>
    %322 = arith.addf %318, %321 : vector<16x16xf32>
    %323 = arith.truncf %308 : vector<16x16xf32> to vector<16x16xbf16>
    %324 = arith.truncf %315 : vector<16x16xf32> to vector<16x16xbf16>
    %cst_215 = arith.constant dense<0.000000e+00> : vector<16x16xf32>
    %325 = tpu.matmul %323, %324, %cst_215 {dimension_numbers = #tpu.dot_dimension_numbers<[1], [1], [0], [0], [0, 0, 1, 0], [], []>} : vector<16x16xbf16>, vector<16x16xbf16>, vector<16x16xf32> -> vector<16x16xf32>
    %cst_216 = arith.constant 2.500000e-01 : f32
    %326 = vector.broadcast %cst_216 : f32 to vector<16x16xf32>
    %327 = arith.mulf %325, %326 : vector<16x16xf32>
    %cst_217 = arith.constant dense<0xFF800000> : vector<16xf32>
    %328 = vector.multi_reduction <maximumf>, %327, %cst_217 [1] : vector<16x16xf32> to vector<16xf32>
    %329 = vector.shape_cast %328 : vector<16xf32> to vector<16x1xf32>
    %330 = vector.broadcast %329 : vector<16x1xf32> to vector<16x16xf32>
    %331 = arith.subf %327, %330 : vector<16x16xf32>
    %332 = math.exp %331 : vector<16x16xf32>
    %cst_218 = arith.constant dense<0.000000e+00> : vector<16xf32>
    %333 = vector.multi_reduction <add>, %332, %cst_218 [1] : vector<16x16xf32> to vector<16xf32>
    %334 = vector.shape_cast %333 : vector<16xf32> to vector<16x1xf32>
    %335 = tpu.reciprocal %334 {approx = true} : vector<16x1xf32> -> vector<16x1xf32>
    %336 = vector.broadcast %335 : vector<16x1xf32> to vector<16x16xf32>
    %337 = arith.mulf %332, %336 : vector<16x16xf32>
    %338 = arith.truncf %337 : vector<16x16xf32> to vector<16x16xbf16>
    %339 = arith.truncf %322 : vector<16x16xf32> to vector<16x16xbf16>
    %cst_219 = arith.constant dense<0.000000e+00> : vector<16x16xf32>
    %340 = tpu.matmul %338, %339, %cst_219 {dimension_numbers = #tpu.dot_dimension_numbers<[1], [0], [0], [1], [0, 0, 1, 1], [], []>} : vector<16x16xbf16>, vector<16x16xbf16>, vector<16x16xf32> -> vector<16x16xf32>
    %c2_220 = arith.constant 2 : index
    %c0_221 = arith.constant 0 : index
    %c0_222 = arith.constant 0 : index
    %341 = vector.load %arg16[%c2_220, %c0_221, %c0_222] : memref<4x16x64xbf16, #tpu.memory_space<vmem>>, vector<1x16x64xbf16>
    %342 = vector.shape_cast %341 : vector<1x16x64xbf16> to vector<16x64xbf16>
    %343 = arith.truncf %340 : vector<16x16xf32> to vector<16x16xbf16>
    %cst_223 = arith.constant dense<0.000000e+00> : vector<16x64xf32>
    %344 = tpu.matmul %343, %342, %cst_223 {dimension_numbers = #tpu.dot_dimension_numbers<[1], [0], [0], [1], [0, 0, 1, 1], [], []>} : vector<16x16xbf16>, vector<16x64xbf16>, vector<16x64xf32> -> vector<16x64xf32>
    %345 = arith.addf %301, %344 : vector<16x64xf32>
    %c3_224 = arith.constant 3 : index
    %c0_225 = arith.constant 0 : index
    %c0_226 = arith.constant 0 : index
    %346 = vector.load %arg13[%c3_224, %c0_225, %c0_226] : memref<4x64x16xbf16, #tpu.memory_space<vmem>>, vector<1x64x16xbf16>
    %347 = vector.shape_cast %346 : vector<1x64x16xbf16> to vector<64x16xbf16>
    %cst_227 = arith.constant dense<0.000000e+00> : vector<16x16xf32>
    %348 = tpu.matmul %211, %347, %cst_227 {dimension_numbers = #tpu.dot_dimension_numbers<[1], [0], [0], [1], [0, 0, 1, 1], [], []>} : vector<16x64xbf16>, vector<64x16xbf16>, vector<16x16xf32> -> vector<16x16xf32>
    %c3_228 = arith.constant 3 : index
    %c0_229 = arith.constant 0 : index
    %c0_230 = arith.constant 0 : index
    %349 = vector.load %arg17[%c3_228, %c0_229, %c0_230] : memref<4x1x16xf32, #tpu.memory_space<vmem>>, vector<1x1x16xf32>
    %350 = vector.shape_cast %349 : vector<1x1x16xf32> to vector<1x16xf32>
    %351 = vector.broadcast %350 : vector<1x16xf32> to vector<16x16xf32>
    %352 = arith.addf %348, %351 : vector<16x16xf32>
    %c3_231 = arith.constant 3 : index
    %c0_232 = arith.constant 0 : index
    %c0_233 = arith.constant 0 : index
    %353 = vector.load %arg14[%c3_231, %c0_232, %c0_233] : memref<4x64x16xbf16, #tpu.memory_space<vmem>>, vector<1x64x16xbf16>
    %354 = vector.shape_cast %353 : vector<1x64x16xbf16> to vector<64x16xbf16>
    %cst_234 = arith.constant dense<0.000000e+00> : vector<16x16xf32>
    %355 = tpu.matmul %212, %354, %cst_234 {dimension_numbers = #tpu.dot_dimension_numbers<[1], [0], [0], [1], [0, 0, 1, 1], [], []>} : vector<16x64xbf16>, vector<64x16xbf16>, vector<16x16xf32> -> vector<16x16xf32>
    %c3_235 = arith.constant 3 : index
    %c0_236 = arith.constant 0 : index
    %c0_237 = arith.constant 0 : index
    %356 = vector.load %arg18[%c3_235, %c0_236, %c0_237] : memref<4x1x16xf32, #tpu.memory_space<vmem>>, vector<1x1x16xf32>
    %357 = vector.shape_cast %356 : vector<1x1x16xf32> to vector<1x16xf32>
    %358 = vector.broadcast %357 : vector<1x16xf32> to vector<16x16xf32>
    %359 = arith.addf %355, %358 : vector<16x16xf32>
    %c3_238 = arith.constant 3 : index
    %c0_239 = arith.constant 0 : index
    %c0_240 = arith.constant 0 : index
    %360 = vector.load %arg15[%c3_238, %c0_239, %c0_240] : memref<4x64x16xbf16, #tpu.memory_space<vmem>>, vector<1x64x16xbf16>
    %361 = vector.shape_cast %360 : vector<1x64x16xbf16> to vector<64x16xbf16>
    %cst_241 = arith.constant dense<0.000000e+00> : vector<16x16xf32>
    %362 = tpu.matmul %212, %361, %cst_241 {dimension_numbers = #tpu.dot_dimension_numbers<[1], [0], [0], [1], [0, 0, 1, 1], [], []>} : vector<16x64xbf16>, vector<64x16xbf16>, vector<16x16xf32> -> vector<16x16xf32>
    %c3_242 = arith.constant 3 : index
    %c0_243 = arith.constant 0 : index
    %c0_244 = arith.constant 0 : index
    %363 = vector.load %arg19[%c3_242, %c0_243, %c0_244] : memref<4x1x16xf32, #tpu.memory_space<vmem>>, vector<1x1x16xf32>
    %364 = vector.shape_cast %363 : vector<1x1x16xf32> to vector<1x16xf32>
    %365 = vector.broadcast %364 : vector<1x16xf32> to vector<16x16xf32>
    %366 = arith.addf %362, %365 : vector<16x16xf32>
    %367 = arith.truncf %352 : vector<16x16xf32> to vector<16x16xbf16>
    %368 = arith.truncf %359 : vector<16x16xf32> to vector<16x16xbf16>
    %cst_245 = arith.constant dense<0.000000e+00> : vector<16x16xf32>
    %369 = tpu.matmul %367, %368, %cst_245 {dimension_numbers = #tpu.dot_dimension_numbers<[1], [1], [0], [0], [0, 0, 1, 0], [], []>} : vector<16x16xbf16>, vector<16x16xbf16>, vector<16x16xf32> -> vector<16x16xf32>
    %cst_246 = arith.constant 2.500000e-01 : f32
    %370 = vector.broadcast %cst_246 : f32 to vector<16x16xf32>
    %371 = arith.mulf %369, %370 : vector<16x16xf32>
    %cst_247 = arith.constant dense<0xFF800000> : vector<16xf32>
    %372 = vector.multi_reduction <maximumf>, %371, %cst_247 [1] : vector<16x16xf32> to vector<16xf32>
    %373 = vector.shape_cast %372 : vector<16xf32> to vector<16x1xf32>
    %374 = vector.broadcast %373 : vector<16x1xf32> to vector<16x16xf32>
    %375 = arith.subf %371, %374 : vector<16x16xf32>
    %376 = math.exp %375 : vector<16x16xf32>
    %cst_248 = arith.constant dense<0.000000e+00> : vector<16xf32>
    %377 = vector.multi_reduction <add>, %376, %cst_248 [1] : vector<16x16xf32> to vector<16xf32>
    %378 = vector.shape_cast %377 : vector<16xf32> to vector<16x1xf32>
    %379 = tpu.reciprocal %378 {approx = true} : vector<16x1xf32> -> vector<16x1xf32>
    %380 = vector.broadcast %379 : vector<16x1xf32> to vector<16x16xf32>
    %381 = arith.mulf %376, %380 : vector<16x16xf32>
    %382 = arith.truncf %381 : vector<16x16xf32> to vector<16x16xbf16>
    %383 = arith.truncf %366 : vector<16x16xf32> to vector<16x16xbf16>
    %cst_249 = arith.constant dense<0.000000e+00> : vector<16x16xf32>
    %384 = tpu.matmul %382, %383, %cst_249 {dimension_numbers = #tpu.dot_dimension_numbers<[1], [0], [0], [1], [0, 0, 1, 1], [], []>} : vector<16x16xbf16>, vector<16x16xbf16>, vector<16x16xf32> -> vector<16x16xf32>
    %c3_250 = arith.constant 3 : index
    %c0_251 = arith.constant 0 : index
    %c0_252 = arith.constant 0 : index
    %385 = vector.load %arg16[%c3_250, %c0_251, %c0_252] : memref<4x16x64xbf16, #tpu.memory_space<vmem>>, vector<1x16x64xbf16>
    %386 = vector.shape_cast %385 : vector<1x16x64xbf16> to vector<16x64xbf16>
    %387 = arith.truncf %384 : vector<16x16xf32> to vector<16x16xbf16>
    %cst_253 = arith.constant dense<0.000000e+00> : vector<16x64xf32>
    %388 = tpu.matmul %387, %386, %cst_253 {dimension_numbers = #tpu.dot_dimension_numbers<[1], [0], [0], [1], [0, 0, 1, 1], [], []>} : vector<16x16xbf16>, vector<16x64xbf16>, vector<16x64xf32> -> vector<16x64xf32>
    %389 = arith.addf %345, %388 : vector<16x64xf32>
    %c0_254 = arith.constant 0 : index
    %c0_255 = arith.constant 0 : index
    %390 = vector.load %arg20[%c0_254, %c0_255] : memref<1x64xf32, #tpu.memory_space<vmem>>, vector<1x64xf32>
    %391 = vector.broadcast %390 : vector<1x64xf32> to vector<16x64xf32>
    %392 = arith.addf %389, %391 : vector<16x64xf32>
    %393 = arith.addf %210, %392 : vector<16x64xf32>
    %cst_256 = arith.constant dense<0.000000e+00> : vector<16xf32>
    %394 = vector.multi_reduction <add>, %393, %cst_256 [1] : vector<16x64xf32> to vector<16xf32>
    %395 = vector.shape_cast %394 : vector<16xf32> to vector<16x1xf32>
    %cst_257 = arith.constant 6.400000e+01 : f32
    %396 = vector.broadcast %cst_257 : f32 to vector<16x1xf32>
    %397 = arith.divf %395, %396 : vector<16x1xf32>
    %398 = vector.broadcast %397 : vector<16x1xf32> to vector<16x64xf32>
    %399 = arith.subf %393, %398 : vector<16x64xf32>
    %400 = arith.mulf %399, %399 : vector<16x64xf32>
    %cst_258 = arith.constant dense<0.000000e+00> : vector<16xf32>
    %401 = vector.multi_reduction <add>, %400, %cst_258 [1] : vector<16x64xf32> to vector<16xf32>
    %402 = vector.shape_cast %401 : vector<16xf32> to vector<16x1xf32>
    %cst_259 = arith.constant 6.400000e+01 : f32
    %403 = vector.broadcast %cst_259 : f32 to vector<16x1xf32>
    %404 = arith.divf %402, %403 : vector<16x1xf32>
    %405 = vector.broadcast %397 : vector<16x1xf32> to vector<16x64xf32>
    %406 = arith.subf %393, %405 : vector<16x64xf32>
    %cst_260 = arith.constant 9.99999974E-6 : f32
    %407 = vector.broadcast %cst_260 : f32 to vector<16x1xf32>
    %408 = arith.addf %404, %407 : vector<16x1xf32>
    %409 = math.rsqrt %408 : vector<16x1xf32>
    %410 = vector.broadcast %409 : vector<16x1xf32> to vector<16x64xf32>
    %411 = arith.mulf %406, %410 : vector<16x64xf32>
    %c0_261 = arith.constant 0 : index
    %c0_262 = arith.constant 0 : index
    %412 = vector.load %arg21[%c0_261, %c0_262] : memref<1x64xf32, #tpu.memory_space<vmem>>, vector<1x64xf32>
    %413 = vector.broadcast %412 : vector<1x64xf32> to vector<16x64xf32>
    %414 = arith.mulf %411, %413 : vector<16x64xf32>
    %c0_263 = arith.constant 0 : index
    %c0_264 = arith.constant 0 : index
    %415 = vector.load %arg22[%c0_263, %c0_264] : memref<1x64xf32, #tpu.memory_space<vmem>>, vector<1x64xf32>
    %416 = vector.broadcast %415 : vector<1x64xf32> to vector<16x64xf32>
    %417 = arith.addf %414, %416 : vector<16x64xf32>
    %c0_265 = arith.constant 0 : index
    %c0_266 = arith.constant 0 : index
    %418 = vector.load %arg23[%c0_265, %c0_266] : memref<64x128xbf16, #tpu.memory_space<vmem>>, vector<64x128xbf16>
    %419 = arith.truncf %417 : vector<16x64xf32> to vector<16x64xbf16>
    %cst_267 = arith.constant dense<0.000000e+00> : vector<16x128xf32>
    %420 = tpu.matmul %419, %418, %cst_267 {dimension_numbers = #tpu.dot_dimension_numbers<[1], [0], [0], [1], [0, 0, 1, 1], [], []>} : vector<16x64xbf16>, vector<64x128xbf16>, vector<16x128xf32> -> vector<16x128xf32>
    %c0_268 = arith.constant 0 : index
    %c0_269 = arith.constant 0 : index
    %421 = vector.load %arg24[%c0_268, %c0_269] : memref<1x128xf32, #tpu.memory_space<vmem>>, vector<1x128xf32>
    %422 = vector.broadcast %421 : vector<1x128xf32> to vector<16x128xf32>
    %423 = arith.addf %420, %422 : vector<16x128xf32>
    %cst_270 = arith.constant 0.000000e+00 : f32
    %424 = vector.broadcast %cst_270 : f32 to vector<16x128xf32>
    %425 = arith.maximumf %423, %424 : vector<16x128xf32>
    %c0_271 = arith.constant 0 : index
    %c0_272 = arith.constant 0 : index
    %426 = vector.load %arg25[%c0_271, %c0_272] : memref<128x64xbf16, #tpu.memory_space<vmem>>, vector<128x64xbf16>
    %427 = arith.truncf %425 : vector<16x128xf32> to vector<16x128xbf16>
    %cst_273 = arith.constant dense<0.000000e+00> : vector<16x64xf32>
    %428 = tpu.matmul %427, %426, %cst_273 {dimension_numbers = #tpu.dot_dimension_numbers<[1], [0], [0], [1], [0, 0, 1, 1], [], []>} : vector<16x128xbf16>, vector<128x64xbf16>, vector<16x64xf32> -> vector<16x64xf32>
    %c0_274 = arith.constant 0 : index
    %c0_275 = arith.constant 0 : index
    %429 = vector.load %arg26[%c0_274, %c0_275] : memref<1x64xf32, #tpu.memory_space<vmem>>, vector<1x64xf32>
    %430 = vector.broadcast %429 : vector<1x64xf32> to vector<16x64xf32>
    %431 = arith.addf %428, %430 : vector<16x64xf32>
    %432 = arith.addf %417, %431 : vector<16x64xf32>
    %cst_276 = arith.constant dense<0.000000e+00> : vector<16xf32>
    %433 = vector.multi_reduction <add>, %432, %cst_276 [1] : vector<16x64xf32> to vector<16xf32>
    %434 = vector.shape_cast %433 : vector<16xf32> to vector<16x1xf32>
    %cst_277 = arith.constant 6.400000e+01 : f32
    %435 = vector.broadcast %cst_277 : f32 to vector<16x1xf32>
    %436 = arith.divf %434, %435 : vector<16x1xf32>
    %437 = vector.broadcast %436 : vector<16x1xf32> to vector<16x64xf32>
    %438 = arith.subf %432, %437 : vector<16x64xf32>
    %439 = arith.mulf %438, %438 : vector<16x64xf32>
    %cst_278 = arith.constant dense<0.000000e+00> : vector<16xf32>
    %440 = vector.multi_reduction <add>, %439, %cst_278 [1] : vector<16x64xf32> to vector<16xf32>
    %441 = vector.shape_cast %440 : vector<16xf32> to vector<16x1xf32>
    %cst_279 = arith.constant 6.400000e+01 : f32
    %442 = vector.broadcast %cst_279 : f32 to vector<16x1xf32>
    %443 = arith.divf %441, %442 : vector<16x1xf32>
    %444 = vector.broadcast %436 : vector<16x1xf32> to vector<16x64xf32>
    %445 = arith.subf %432, %444 : vector<16x64xf32>
    %cst_280 = arith.constant 9.99999974E-6 : f32
    %446 = vector.broadcast %cst_280 : f32 to vector<16x1xf32>
    %447 = arith.addf %443, %446 : vector<16x1xf32>
    %448 = math.rsqrt %447 : vector<16x1xf32>
    %449 = vector.broadcast %448 : vector<16x1xf32> to vector<16x64xf32>
    %450 = arith.mulf %445, %449 : vector<16x64xf32>
    %c0_281 = arith.constant 0 : index
    %c0_282 = arith.constant 0 : index
    %451 = vector.load %arg27[%c0_281, %c0_282] : memref<1x64xf32, #tpu.memory_space<vmem>>, vector<1x64xf32>
    %452 = vector.broadcast %451 : vector<1x64xf32> to vector<16x64xf32>
    %453 = arith.mulf %450, %452 : vector<16x64xf32>
    %c0_283 = arith.constant 0 : index
    %c0_284 = arith.constant 0 : index
    %454 = vector.load %arg28[%c0_283, %c0_284] : memref<1x64xf32, #tpu.memory_space<vmem>>, vector<1x64xf32>
    %455 = vector.broadcast %454 : vector<1x64xf32> to vector<16x64xf32>
    %456 = arith.addf %453, %455 : vector<16x64xf32>
    %c0_285 = arith.constant 0 : index
    %c0_286 = arith.constant 0 : index
    %c0_287 = arith.constant 0 : index
    %457 = vector.load %arg29[%c0_285, %c0_286, %c0_287] : memref<1x16x64xf32, #tpu.memory_space<vmem>>, vector<1x16x64xf32>
    %458 = vector.shape_cast %457 : vector<1x16x64xf32> to vector<16x64xf32>
    %459 = vector.shape_cast %456 : vector<16x64xf32> to vector<1x16x64xf32>
    tpu.vector_store %arg29[%c0_285, %c0_286, %c0_287], %459 {strides = array<i32>} : memref<1x16x64xf32, #tpu.memory_space<vmem>>, vector<1x16x64xf32>,
    return
  }
  func.func @transform_0(%arg0: i32) -> (i32, i32, i32) {
    %c0_i32 = arith.constant 0 : i32
    %c0_i32_0 = arith.constant 0 : i32
    %c0_i32_1 = arith.constant 0 : i32
    return %arg0, %c0_i32, %c0_i32_0 : i32, i32, i32
  }
  func.func @transform_1(%arg0: i32) -> (i32, i32, i32) {
    %c0_i32 = arith.constant 0 : i32
    %c0_i32_0 = arith.constant 0 : i32
    %c0_i32_1 = arith.constant 0 : i32
    return %arg0, %c0_i32, %c0_i32_0 : i32, i32, i32
  }
  func.func @transform_2(%arg0: i32) -> (i32, i32, i32) {
    %c0_i32 = arith.constant 0 : i32
    %c0_i32_0 = arith.constant 0 : i32
    %c0_i32_1 = arith.constant 0 : i32
    %c0_i32_2 = arith.constant 0 : i32
    return %c0_i32, %c0_i32_0, %c0_i32_1 : i32, i32, i32
  }
  func.func @transform_3(%arg0: i32) -> (i32, i32, i32) {
    %c0_i32 = arith.constant 0 : i32
    %c0_i32_0 = arith.constant 0 : i32
    %c0_i32_1 = arith.constant 0 : i32
    %c0_i32_2 = arith.constant 0 : i32
    return %c0_i32, %c0_i32_0, %c0_i32_1 : i32, i32, i32
  }
  func.func @transform_4(%arg0: i32) -> (i32, i32, i32) {
    %c0_i32 = arith.constant 0 : i32
    %c0_i32_0 = arith.constant 0 : i32
    %c0_i32_1 = arith.constant 0 : i32
    %c0_i32_2 = arith.constant 0 : i32
    return %c0_i32, %c0_i32_0, %c0_i32_1 : i32, i32, i32
  }
  func.func @transform_5(%arg0: i32) -> (i32, i32, i32) {
    %c0_i32 = arith.constant 0 : i32
    %c0_i32_0 = arith.constant 0 : i32
    %c0_i32_1 = arith.constant 0 : i32
    %c0_i32_2 = arith.constant 0 : i32
    return %c0_i32, %c0_i32_0, %c0_i32_1 : i32, i32, i32
  }
  func.func @transform_6(%arg0: i32) -> (i32, i32, i32) {
    %c0_i32 = arith.constant 0 : i32
    %c0_i32_0 = arith.constant 0 : i32
    %c0_i32_1 = arith.constant 0 : i32
    %c0_i32_2 = arith.constant 0 : i32
    return %c0_i32, %c0_i32_0, %c0_i32_1 : i32, i32, i32
  }
  func.func @transform_7(%arg0: i32) -> (i32, i32, i32) {
    %c0_i32 = arith.constant 0 : i32
    %c0_i32_0 = arith.constant 0 : i32
    %c0_i32_1 = arith.constant 0 : i32
    %c0_i32_2 = arith.constant 0 : i32
    return %c0_i32, %c0_i32_0, %c0_i32_1 : i32, i32, i32
  }
  func.func @transform_8(%arg0: i32) -> (i32, i32, i32) {
    %c0_i32 = arith.constant 0 : i32
    %c0_i32_0 = arith.constant 0 : i32
    %c0_i32_1 = arith.constant 0 : i32
    %c0_i32_2 = arith.constant 0 : i32
    return %c0_i32, %c0_i32_0, %c0_i32_1 : i32, i32, i32
  }
  func.func @transform_9(%arg0: i32) -> (i32, i32) {
    %c0_i32 = arith.constant 0 : i32
    %c0_i32_0 = arith.constant 0 : i32
    %c0_i32_1 = arith.constant 0 : i32
    return %c0_i32, %c0_i32_0 : i32, i32
  }
  func.func @transform_10(%arg0: i32) -> (i32, i32) {
    %c0_i32 = arith.constant 0 : i32
    %c0_i32_0 = arith.constant 0 : i32
    %c0_i32_1 = arith.constant 0 : i32
    return %c0_i32, %c0_i32_0 : i32, i32
  }
  func.func @transform_11(%arg0: i32) -> (i32, i32) {
    %c0_i32 = arith.constant 0 : i32
    %c0_i32_0 = arith.constant 0 : i32
    %c0_i32_1 = arith.constant 0 : i32
    return %c0_i32, %c0_i32_0 : i32, i32
  }
  func.func @transform_12(%arg0: i32) -> (i32, i32, i32) {
    %c0_i32 = arith.constant 0 : i32
    %c0_i32_0 = arith.constant 0 : i32
    %c0_i32_1 = arith.constant 0 : i32
    %c0_i32_2 = arith.constant 0 : i32
    return %c0_i32, %c0_i32_0, %c0_i32_1 : i32, i32, i32
  }
  func.func @transform_13(%arg0: i32) -> (i32, i32, i32) {
    %c0_i32 = arith.constant 0 : i32
    %c0_i32_0 = arith.constant 0 : i32
    %c0_i32_1 = arith.constant 0 : i32
    %c0_i32_2 = arith.constant 0 : i32
    return %c0_i32, %c0_i32_0, %c0_i32_1 : i32, i32, i32
  }
  func.func @transform_14(%arg0: i32) -> (i32, i32, i32) {
    %c0_i32 = arith.constant 0 : i32
    %c0_i32_0 = arith.constant 0 : i32
    %c0_i32_1 = arith.constant 0 : i32
    %c0_i32_2 = arith.constant 0 : i32
    return %c0_i32, %c0_i32_0, %c0_i32_1 : i32, i32, i32
  }
  func.func @transform_15(%arg0: i32) -> (i32, i32, i32) {
    %c0_i32 = arith.constant 0 : i32
    %c0_i32_0 = arith.constant 0 : i32
    %c0_i32_1 = arith.constant 0 : i32
    %c0_i32_2 = arith.constant 0 : i32
    return %c0_i32, %c0_i32_0, %c0_i32_1 : i32, i32, i32
  }
  func.func @transform_16(%arg0: i32) -> (i32, i32, i32) {
    %c0_i32 = arith.constant 0 : i32
    %c0_i32_0 = arith.constant 0 : i32
    %c0_i32_1 = arith.constant 0 : i32
    %c0_i32_2 = arith.constant 0 : i32
    return %c0_i32, %c0_i32_0, %c0_i32_1 : i32, i32, i32
  }
  func.func @transform_17(%arg0: i32) -> (i32, i32, i32) {
    %c0_i32 = arith.constant 0 : i32
    %c0_i32_0 = arith.constant 0 : i32
    %c0_i32_1 = arith.constant 0 : i32
    %c0_i32_2 = arith.constant 0 : i32
    return %c0_i32, %c0_i32_0, %c0_i32_1 : i32, i32, i32
  }
  func.func @transform_18(%arg0: i32) -> (i32, i32, i32) {
    %c0_i32 = arith.constant 0 : i32
    %c0_i32_0 = arith.constant 0 : i32
    %c0_i32_1 = arith.constant 0 : i32
    %c0_i32_2 = arith.constant 0 : i32
    return %c0_i32, %c0_i32_0, %c0_i32_1 : i32, i32, i32
  }
  func.func @transform_19(%arg0: i32) -> (i32, i32) {
    %c0_i32 = arith.constant 0 : i32
    %c0_i32_0 = arith.constant 0 : i32
    %c0_i32_1 = arith.constant 0 : i32
    return %c0_i32, %c0_i32_0 : i32, i32
  }
  func.func @transform_20(%arg0: i32) -> (i32, i32) {
    %c0_i32 = arith.constant 0 : i32
    %c0_i32_0 = arith.constant 0 : i32
    %c0_i32_1 = arith.constant 0 : i32
    return %c0_i32, %c0_i32_0 : i32, i32
  }
  func.func @transform_21(%arg0: i32) -> (i32, i32) {
    %c0_i32 = arith.constant 0 : i32
    %c0_i32_0 = arith.constant 0 : i32
    %c0_i32_1 = arith.constant 0 : i32
    return %c0_i32, %c0_i32_0 : i32, i32
  }
  func.func @transform_22(%arg0: i32) -> (i32, i32) {
    %c0_i32 = arith.constant 0 : i32
    %c0_i32_0 = arith.constant 0 : i32
    %c0_i32_1 = arith.constant 0 : i32
    return %c0_i32, %c0_i32_0 : i32, i32
  }
  func.func @transform_23(%arg0: i32) -> (i32, i32) {
    %c0_i32 = arith.constant 0 : i32
    %c0_i32_0 = arith.constant 0 : i32
    %c0_i32_1 = arith.constant 0 : i32
    return %c0_i32, %c0_i32_0 : i32, i32
  }
  func.func @transform_24(%arg0: i32) -> (i32, i32) {
    %c0_i32 = arith.constant 0 : i32
    %c0_i32_0 = arith.constant 0 : i32
    %c0_i32_1 = arith.constant 0 : i32
    return %c0_i32, %c0_i32_0 : i32, i32
  }
  func.func @transform_25(%arg0: i32) -> (i32, i32) {
    %c0_i32 = arith.constant 0 : i32
    %c0_i32_0 = arith.constant 0 : i32
    %c0_i32_1 = arith.constant 0 : i32
    return %c0_i32, %c0_i32_0 : i32, i32
  }
  func.func @transform_26(%arg0: i32) -> (i32, i32) {
    %c0_i32 = arith.constant 0 : i32
    %c0_i32_0 = arith.constant 0 : i32
    %c0_i32_1 = arith.constant 0 : i32
    return %c0_i32, %c0_i32_0 : i32, i32
  }
  func.func @transform_27(%arg0: i32) -> (i32, i32) {
    %c0_i32 = arith.constant 0 : i32
    %c0_i32_0 = arith.constant 0 : i32
    %c0_i32_1 = arith.constant 0 : i32
    return %c0_i32, %c0_i32_0 : i32, i32
  }
  func.func @transform_28(%arg0: i32) -> (i32, i32, i32) {
    %c0_i32 = arith.constant 0 : i32
    %c0_i32_0 = arith.constant 0 : i32
    %c0_i32_1 = arith.constant 0 : i32
    return %arg0, %c0_i32, %c0_i32_0 : i32, i32, i32
  }
}

</mosaic_0001>

<bundles_post_ra>
// kernel: seq2seq_forward.9
= control target key start
LH: loop header
LB: loop body
LE: loop exit
PB: predicated region body
PF: predicated region fallthrough
CT: control target
= control target key end

     0   :  { %8 = vsyncpa [#allocation3], 0  ;;  %s809_s0 = inlined_call_operand.vmem [shape: f32[2,16,64], index: 0, kind: input, shape index: {}]   ;;  %s810_s1 = inlined_call_operand.vmem [shape: bf16[64,512], index: 1, kind: input, shape index: {}]   ;;  %s811_s2 = inlined_call_operand.vmem [shape: f32[1,512], index: 2, kind: input, shape index: {}]   ;;  %s812_s3 = inlined_call_operand.hbm [shape: f32[2,16,512], index: 3, kind: output, shape index: {}]  }
   0x1   :  { %10 = vsyncpa [#allocation3 + $0x1], 0  ;;  %s651_s12 = smov 0   ;;  %s653_s13 = smov 0  }
   0x2   :  { %s655_s14 = smov 0   ;;  %s657_s15 = smov 0  }
   0x3 LB: > { %s672_s16 = sadd.s32 4294967295, %s625_s15   ;;  %s465_s17 = sadd.s32 4294967294, %s625_s15   ;;  %s625_s15 = sphi %s657_s15, %s818_s15   ;;  %s621_s14 = sphi %s655_s14, %s817_s14   ;;  %s617_s13 = sphi %s653_s13, %s816_s13   ;;  %s613_s12 = sphi %s651_s12, %s815_s12  }
   0x4   : > { %s676_s18 = sadd.s32 1, %s625_s15   ;;  %s91_s19 = sadd.s32 1, %s621_s14 }
   0x5   : > { %s88_s20 = ssub.s32 %s625_s15, %s676_s18  ;;  %p101_p0 = scmp.ne.s32.totalorder %s621_s14, %s617_s13 }
   0x6   : > { %p89_p1 = scmp.eq.s32.totalorder %s88_s20, 0  ;;  %p102_p2 = scmp.eq.s32.totalorder %s672_s16, 1 }
   0x7   : > { %p107_p3 = scmp.ne.s32.totalorder %s617_s13, %s613_s12  ;;  %p108_p4 = scmp.eq.s32.totalorder %s465_s17, 1 }
   0x8   : > { %s687_s21 = scalar_select %p89_p1, %s621_s14, %s91_s19  }
   0x9   : > { %p689_p5 = por %p102_p2, %p101_p0  ;;  %p693_p6 = por %p108_p4, %p107_p3 }
   0xa   : > { %p468_p7 = scmp.ge.s32.totalorder %s625_s15, 1  ;;  %p140_p8 = scmp.lt.s32.totalorder %s625_s15, 3 }
   0xc   : > { %p141_p9 = pnand %p468_p7, %p140_p8 }
   0xd   : > { %v539_v0 = vld [vmem:[%s810_s1 + $0x4] ss:$16 sps:$4 sm:$0xff] (!%p141_p9)   ;;  %p164_p10 = scmp.lt.s32.totalorder (!%p141_p9), %s672_s16, 1  ;;  %v541_v1 = vld [vmem:[%s810_s1 + $0xc] ss:$16 sps:$4 sm:$0xff] (!%p141_p9)   ;;  %v627_v2 = vmov (!%p141_p9), 0   ;;  %v191_v20 = vlaneseq (!%p141_p9) }
   0xe   : > { %144 = sbr.rel (%p141_p9) target bundleno = 263 (0x107), region = 32  ;;  %327 = vmatprep.mubr.bf16.mxu0 (!%p141_p9), %v627_v2  ;;  %370 = vmatprep.mubr.bf16.mxu1 (!%p141_p9), %v627_v2  ;;  %v543_v3 = vld [vmem:[%s810_s1] ss:$16 sps:$4 sm:$0xff] (!%p141_p9)   ;;  %v544_v4 = vld [vmem:[%s810_s1 + $0x8] ss:$16 sps:$4 sm:$0xff] (!%p141_p9)   ;;  %vm291_vm0 = vcmask (!%p141_p9), 523264  }
   0xf   : > { %295 = vmatprep.subr.bf16.mxu0 (!%p141_p9), %v539_v0  ;;  %338 = vmatprep.subr.bf16.mxu1 (!%p141_p9), %v541_v1  ;;  %v545_v5 = vld [vmem:[%s810_s1 + $0x24] ss:$16 sps:$4 sm:$0xff] (!%p141_p9)   ;;  %v547_v6 = vld [vmem:[%s810_s1 + $0x2c] ss:$16 sps:$4 sm:$0xff] (!%p141_p9)   ;;  %v549_v7 = vld [vmem:[%s810_s1 + $0x20] ss:$16 sps:$4 sm:$0xff] (!%p141_p9)  }
  0x10   : > { %296 = vmatpush1.bf16.msra.mxu0 (!%p141_p9), %v543_v3  ;;  %339 = vmatpush1.bf16.msra.mxu1 (!%p141_p9), %v544_v4  ;;  %v550_v8 = vld [vmem:[%s810_s1 + $0x28] ss:$16 sps:$4 sm:$0xff] (!%p141_p9)   ;;  %v551_v9 = vld [vmem:[%s810_s1 + $0x44] ss:$16 sps:$4 sm:$0xff] (!%p141_p9)   ;;  %v553_v10 = vld [vmem:[%s810_s1 + $0x4c] ss:$16 sps:$4 sm:$0xff] (!%p141_p9)  }
  0x11   : > { %297 = vmatprep.subr.bf16.mxu0 (!%p141_p9), %v545_v5  ;;  %340 = vmatprep.subr.bf16.mxu1 (!%p141_p9), %v547_v6  ;;  %v555_v11 = vld [vmem:[%s810_s1 + $0x40] ss:$16 sps:$4 sm:$0xff] (!%p141_p9)   ;;  %v556_v12 = vld [vmem:[%s810_s1 + $0x48] ss:$16 sps:$4 sm:$0xff] (!%p141_p9)   ;;  %v557_v13 = vld [vmem:[%s810_s1 + $0x64] ss:$16 sps:$4 sm:$0xff] (!%p141_p9)  }
  0x12   : > { %v559_v14 = vld [vmem:[%s810_s1 + $0x6c] ss:$16 sps:$4 sm:$0xff] (!%p141_p9)   ;;  %v561_v15 = vld [vmem:[%s810_s1 + $0x60] ss:$16 sps:$4 sm:$0xff] (!%p141_p9)   ;;  %v562_v16 = vld [vmem:[%s810_s1 + $0x68] ss:$16 sps:$4 sm:$0xff] (!%p141_p9)  }
  0x13   : > { %v192_v21 = vshrl.u32 (!%p141_p9), %v191_v20, 7  ;;  %v189_v24 = vld [vmem:[%s811_s2] sm:$0xf] (!%p141_p9)  ;;  %s496_s29 = sshll.u32 (!%p141_p9), %s672_s16, 10  ;;  %s628_s9 = smov (!%p141_p9), [#allocation2]  }
  0x14   : > { %298 = vmatpush1.bf16.msra.mxu0 (!%p141_p9), %v549_v7  ;;  %341 = vmatpush1.bf16.msra.mxu1 (!%p141_p9), %v550_v8  ;;  %s762_s7 = scalar_lea.hbm (!%p141_p9), %s812_s3, %s496_s29  ;;  %s567_s10 = sshll.u32 (!%p141_p9), %s628_s9, 4  ;;  %s568_s10 = int_to_ptr.vmem [resolvable:$false] %s567_s10 }
  0x15   : > { %s165_s5 = scalar_select %p164_p10, %s672_s16, 1  ;;  %299 = vmatprep.subr.bf16.mxu0 %v551_v9  ;;  %342 = vmatprep.subr.bf16.mxu1 %v553_v10  ;;  %v193_v22 = vsub.s32 0, %v192_v21  ;;  %v201_v23 = vsub.s32 2, %v192_v21  ;;  %v197_v25 = vsub.s32 1, %v192_v21  ;;  %v205_v26 = vsub.s32 3, %v192_v21 }
  0x17   : > { %s495_s25 = sshll.u32 %s165_s5, 4  ;;  %v194_v27 = vrot.slane %v189_v24, %v193_v22  ;;  %v202_v28 = vrot.slane %v189_v24, %v201_v23  ;;  %v198_v29 = vrot.slane %v189_v24, %v197_v25  ;;  %v206_v30 = vrot.slane %v189_v24, %v205_v26 }
  0x18   : > { %s168_s11 = scalar_lea.vmem %s809_s0, %s495_s25  ;;  %300 = vmatpush1.bf16.msra.mxu0 %v555_v11  ;;  %343 = vmatpush1.bf16.msra.mxu1 %v556_v12  ;;  %s161_s25 = sand.u32 1, %s617_s13  }
  0x19   : > { %v170_v17 = vld [vmem:[%s168_s11] sm:$0xff]  ;;  %v171_v18 = vld [vmem:[%s168_s11 + $0x8] sm:$0xff]  ;;  %301 = vmatprep.subr.bf16.mxu0 %v557_v13  ;;  %344 = vmatprep.subr.bf16.mxu1 %v559_v14  ;;  %s469_s28 = sshll.u32 %s161_s25, 6  ;;  %s768_s5 = scalar_lea.sflag [#allocation3], %s161_s25 }
  0x1a   : > { %v188_v19 = vpack.c.bf16 %v171_v18, %v170_v17  ;;  %s163_s30 = scalar_lea.vmem [#allocation2], %s469_s28  ;;  %s569_s11 = scalar_lea.vmem %s568_s10, 2048 }
  0x1b   : > { %s403_s4 = sshll.u32 %s163_s30, 4  ;;  %s764_s4 = int_to_ptr.vmem [resolvable:$true] %s403_s4 }
  0x1c   : > { %302 = vmatpush1.bf16.msra.mxu0 %v561_v15  ;;  %345 = vmatpush1.bf16.msra.mxu1 %v562_v16  ;;  %s563_s8 = scalar_lea.vmem %s764_s4, 1024  ;;  %p570_p0 = scmp.lt.s32.totalorder %s764_s4, %s568_s10 }
  0x1d   : > { %p564_p11 = scmp.ne.s32.totalorder %s764_s4, %s563_s8  ;;  %p571_p1 = scmp.lt.s32.totalorder %s569_s11, %s563_s8 }
  0x1f   : > { %488 = vmatmul.mubr.msk.bf16.vlgmr.msra.gmra.mrb[0].mxu0 %vm291_vm0, %v188_v19  ;;  %489 = vmatmul.mubr.msk.bf16.vlgmr.msra.gmra.mrb[0].mxu1 %vm291_vm0, %v188_v19  ;;  %p565_p12 = pnand %p564_p11, %p689_p5  ;;  %p572_p2 = por %p571_p1, %p570_p0 }
  0x21   : > { %p566_p13 = pneg %p565_p12 }
  0x23   : > { %p573_p3 = pnand %p572_p2, %p566_p13 }
  0xf2   : > { %v329_v31 = vpop.f32.mrb[0].mxu0  ;;  %v372_v32 = vpop.f32.mrb[0].mxu1 }
  0xf3   : > { %v330_v33 = vadd.f32 %v329_v31, %v194_v27  ;;  %v373_v34 = vadd.f32 %v372_v32, %v202_v28  ;;  %v331_v35 = vpop.f32.mrb[1].mxu0  ;;  %v374_v36 = vpop.f32.mrb[1].mxu1 }
  0xf4   : > { %v332_v37 = vadd.f32 %v331_v35, %v198_v29  ;;  %v375_v38 = vadd.f32 %v374_v36, %v206_v30  ;;  %v333_v39 = vpop.f32.mrb[2].mxu0  ;;  %v376_v40 = vpop.f32.mrb[2].mxu1 }
  0xf5   : > { %381 = vst [vmem:[%s163_s30] sm:$0xff] %v330_v33  ;;  %383 = vst [vmem:[%s163_s30 + $0x10] sm:$0xff] %v373_v34  ;;  %v334_v41 = vadd.f32 %v333_v39, %v194_v27  ;;  %v377_v42 = vadd.f32 %v376_v40, %v202_v28  ;;  %v335_v43 = vpop.f32.mrb[3].mxu0  ;;  %v378_v44 = vpop.f32.mrb[3].mxu1 }
  0xf6   : > { %382 = vst [vmem:[%s163_s30 + $0x8] sm:$0xff] %v332_v37  ;;  %384 = vst [vmem:[%s163_s30 + $0x18] sm:$0xff] %v375_v38  ;;  %v336_v45 = vadd.f32 %v335_v43, %v198_v29  ;;  %v379_v46 = vadd.f32 %v378_v44, %v206_v30 }
  0xf7   : > { %385 = vst [vmem:[%s163_s30 + $0x20] sm:$0xff] %v334_v41  ;;  %387 = vst [vmem:[%s163_s30 + $0x30] sm:$0xff] %v377_v42 }
  0xf8   : > { %386 = vst [vmem:[%s163_s30 + $0x28] sm:$0xff] %v336_v45  ;;  %388 = vst [vmem:[%s163_s30 + $0x38] sm:$0xff] %v379_v46 }
  0xf9   : > { %576 = shalt.err (!%p573_p3)
}
  0xfa   : > { %s577_s17 = scalar_lea.hbm %s762_s7, 1024  ;;  %s581_s24 = scalar_lea.hbm %s812_s3, 2048 }
  0xfb   : > { %p578_p4 = scmp.ne.s32.totalorder %s762_s7, %s577_s17  ;;  %p582_p9 = scmp.lt.u32.totalorder %s762_s7, %s812_s3 }
  0xfc   : > { %p583_p10 = scmp.lt.u32.totalorder %s581_s24, %s577_s17  ;;  %p585_p12 = scmp.lt.u32.totalorder %s577_s17, %s762_s7 }
  0xfd   : > { %p579_p7 = pnand %p578_p4, %p689_p5 }
  0xfe   : > { %p584_p11 = por %p583_p10, %p582_p9 }
  0xff   : > { %p580_p8 = pneg %p579_p7 }
 0x100   : > { %p586_p13 = por %p585_p12, %p584_p11 }
 0x102   : > { %p587_p0 = pnand %p586_p13, %p580_p8 }
 0x104   : > { %590 = shalt.err (!%p587_p0)
}
 0x105   : > { %s629_s27 = smov 512   ;;  %s630_s28 = smov 32  }
 0x106   : > { %497 = dma.vmem_to_hbm [thread:$0]  (%p689_p5), %s764_s4, 1024, %s762_s7, %s768_s5, %s629_s27, %s629_s27, %s630_s28  }
 0x107 PF: > { %p503_p1 = scmp.ge.s32.totalorder %s625_s15, 2  ;;  %s418_s29 = sand.u32 1, %s613_s12  }
 0x108   : > { %s419_s30 = scalar_lea.sflag [#allocation3], %s418_s29 }
 0x109   : > { %p500_p2 = pnand %p503_p1, %p693_p6 }
 0x10b   : > { %608 = dma.done.wait (!%p500_p2), %s419_s30, 1024  }
 0x10c   : > { %610 = vsyncadd (!%p500_p2), %s419_s30, 4294966272  ;;  %p13_p3 = scmp.ge.s32.totalorder %s676_s18, 4   ;;  %s815_s12 = smov %s617_s13 }
 0x10d   : > { %s816_s13 = smov %s621_s14  ;;  %s817_s14 = smov %s687_s21 }
 0x10e   : > { %s818_s15 = smov %s676_s18  ;;  %15 = sbr.rel (!%p13_p3) target bundleno = 3 (0x3), region = 67 }
 0x115   :  { %424 = vsyncpa [#allocation3], 1 }
 0x116   :  { %426 = vsyncpa [#allocation3 + $0x1], 1 }

// kernel: seq2seq_forward.5
= control target key start
LH: loop header
LB: loop body
LE: loop exit
PB: predicated region body
PF: predicated region fallthrough
CT: control target
= control target key end

     0   :  { %s3359_s24 = smov 0   ;;  %s3852_s0 = inlined_call_operand.vmem [shape: f32[2,16,64], index: 0, kind: input, shape index: {}]   ;;  %s3853_s1 = inlined_call_operand.vmem [shape: bf16[4,64,16], index: 1, kind: input, shape index: {}]   ;;  %s3854_s2 = inlined_call_operand.vmem [shape: bf16[4,64,16], index: 2, kind: input, shape index: {}]   ;;  %s3855_s3 = inlined_call_operand.vmem [shape: bf16[4,64,16], index: 3, kind: input, shape index: {}]   ;;  %s3856_s4 = inlined_call_operand.vmem [shape: bf16[4,16,64], index: 4, kind: input, shape index: {}]   ;;  %s3857_s5 = inlined_call_operand.vmem [shape: f32[4,1,16], index: 5, kind: input, shape index: {}]   ;;  %s3858_s6 = inlined_call_operand.vmem [shape: f32[4,1,16], index: 6, kind: input, shape index: {}]   ;;  %s3859_s7 = inlined_call_operand.vmem [shape: f32[4,1,16], index: 7, kind: input, shape index: {}]   ;;  %s3860_s8 = inlined_call_operand.vmem [shape: f32[1,64], index: 8, kind: input, shape index: {}]   ;;  %s3861_s9 = inlined_call_operand.vmem [shape: f32[1,64], index: 9, kind: input, shape index: {}]   ;;  %s3862_s10 = inlined_call_operand.vmem [shape: f32[1,64], index: 10, kind: input, shape index: {}]   ;;  %s3863_s11 = inlined_call_operand.vmem [shape: bf16[64,128], index: 11, kind: input, shape index: {}]   ;;  %s3864_s12 = inlined_call_operand.vmem [shape: f32[1,128], index: 12, kind: input, shape index: {}]   ;;  %s3865_s13 = inlined_call_operand.vmem [shape: bf16[128,64], index: 13, kind: input, shape index: {}]   ;;  %s3866_s14 = inlined_call_operand.vmem [shape: f32[1,64], index: 14, kind: input, shape index: {}]   ;;  %s3867_s15 = inlined_call_operand.vmem [shape: f32[1,64], index: 15, kind: input, shape index: {}]   ;;  %s3868_s16 = inlined_call_operand.vmem [shape: f32[1,64], index: 16, kind: input, shape index: {}]   ;;  %s3869_s17 = inlined_call_operand.vmem [shape: f32[2,16,64], index: 17, kind: output, shape index: {}]  }
   0x1   :  { %3871 = sst [smem:[#allocation2_spill]] %s3852_s0 }
   0x2   :  { %3872 = sst [smem:[#allocation3_spill]] %s3853_s1 }
   0x3 LB: > { %s2589_s25 = sadd.s32 4294967295, %s3265_s24   ;;  %p2593_p0 = scmp.ge.s32.totalorder %s3265_s24, 1  ;;  %s3265_s24 = sphi %s3359_s24, %s27_s24  }
   0x4   : > { %p487_p1 = scmp.lt.s32.totalorder %s3265_s24, 3 }
   0x6   : > { %p488_p2 = pnand %p2593_p0, %p487_p1 }
   0x7   : > { %v3153_v0 = vld [vmem:[%s3854_s2] sm:$0xff] (!%p488_p2)   ;;  %v3267_v1 = vmov (!%p488_p2), 0.0   ;;  %v3154_v2 = vld [vmem:[%s3854_s2 + $0x8] sm:$0xff] (!%p488_p2)   ;;  %s3873_s18 = sld [smem:[#allocation3_spill]] (!%p488_p2)  ;;  %vm3268_vm0 = vmmov (!%p488_p2), 0   ;;  %p539_p3 = scmp.lt.s32.totalorder (!%p488_p2), %s2589_s25, 1 }
   0x8   : > { %491 = sbr.rel (%p488_p2) target bundleno = 5033 (0x13a9), region = 88  ;;  %2907 = vmatprep.subr.bf16.mxu1 (!%p488_p2), %v3267_v1  ;;  %2895 = vmatprep.subr.bf16.mxu0 (!%p488_p2), %v3267_v1  ;;  %v3156_v5 = vld [vmem:[%s3854_s2 + $0x10] sm:$0xff] (!%p488_p2)   ;;  %s3874_s27 = sld [smem:[#allocation2_spill]] (!%p488_p2)  ;;  %v3158_v6 = vld [vmem:[%s3854_s2 + $0x18] sm:$0xff] (!%p488_p2)   ;;  %vm592_vm1 = vcmask (!%p488_p2), 523264   ;;  %v3161_v12 = vld [vmem:[%s3855_s3] sm:$0xff] (!%p488_p2)  }
   0x9   : > { %2908 = vmatpush3.bf16.msra.mxu1 (!%p488_p2), %v3153_v0  ;;  %2915 = vmatprep.mubr.msk.bf16.mxu1 (!%p488_p2), %vm3268_vm0, %v3267_v1  ;;  %v3162_v13 = vld [vmem:[%s3855_s3 + $0x8] sm:$0xff] (!%p488_p2)   ;;  %v3163_v14 = vld [vmem:[%s3855_s3 + $0x10] sm:$0xff] (!%p488_p2)   ;;  %v3164_v15 = vld [vmem:[%s3855_s3 + $0x18] sm:$0xff] (!%p488_p2)   ;;  %vm799_vm2 = vcmask (!%p488_p2), 130048  }
   0xa   : > { %2909 = vmatprep.subr.bf16.mxu1 (!%p488_p2), %v3267_v1  ;;  %2903 = vmatprep.mubr.msk.bf16.mxu0 (!%p488_p2), %vm3268_vm0, %v3267_v1  ;;  %v2604_v16 = vld [vmem:[%s3858_s6] ss:$0 sm:$0xff] (!%p488_p2) }
   0xb   : > { %v2598_v18 = vld [vmem:[%s3857_s5] ss:$0 sm:$0xff] (!%p488_p2) }
   0xc   : > { %v2610_v33 = vld [vmem:[%s3859_s7] ss:$0 sm:$0xff] (!%p488_p2) }
   0xd   : > { %v3155_v3 = vld [vmem:[%s3873_s18] sm:$0xff] (!%p488_p2)   ;;  %v3157_v4 = vld [vmem:[%s3873_s18 + $0x8] sm:$0xff] (!%p488_p2)   ;;  %2910 = vmatpush3.bf16.msra.mxu1 (!%p488_p2), %v3154_v2  ;;  %v3159_v7 = vld [vmem:[%s3873_s18 + $0x10] sm:$0xff] (!%p488_p2)  }
   0xe   : > { %2896 = vmatpush3.bf16.msra.mxu0 (!%p488_p2), %v3155_v3  ;;  %2911 = vmatprep.subr.bf16.mxu1 (!%p488_p2), %v3267_v1  ;;  %v3160_v10 = vld [vmem:[%s3873_s18 + $0x18] sm:$0xff] (!%p488_p2)   ;;  %v3167_v59 = vld [vmem:[%s3873_s18 + $0x20] sm:$0xff] (!%p488_p2)   ;;  %v3169_v60 = vld [vmem:[%s3873_s18 + $0x28] sm:$0xff] (!%p488_p2)  }
   0xf   : > { %s3876_s25 = smov (!%p539_p3, %s2589_s25), 1  ;;  %2897 = vmatprep.subr.bf16.mxu0 %v3267_v1  ;;  %v3171_v61 = vld [vmem:[%s3873_s18 + $0x30] sm:$0xff]   ;;  %v3172_v62 = vld [vmem:[%s3873_s18 + $0x38] sm:$0xff]  }
  0x10   : > { %s2795_s22 = sshll.u32 %s3876_s25, 4 }
  0x11   : > { %s3399_s28 = scalar_lea.vmem %s3874_s27, %s2795_s22  ;;  %2912 = vmatpush3.bf16.msra.mxu1 %v3156_v5  ;;  %s548_s1 = scalar_lea.vmem %s3869_s17, %s2795_s22 }
  0x12   : > { %2898 = vmatpush3.bf16.msra.mxu0 %v3157_v4  ;;  %v550_v8 = vld [vmem:[%s3399_s28] sm:$0xff]  ;;  %v551_v9 = vld [vmem:[%s3399_s28 + $0x8] sm:$0xff]  ;;  %2913 = vmatprep.subr.bf16.mxu1 %v3267_v1 }
  0x13   : > { %2899 = vmatprep.subr.bf16.mxu0 %v3267_v1  ;;  %v3414_v11 = vpack.c.bf16 %v551_v9, %v550_v8  ;;  %v3166_v8 = vld [vmem:[%s3854_s2 + $0x28] sm:$0xff]   ;;  %v3168_v9 = vld [vmem:[%s3854_s2 + $0x30] sm:$0xff]  }
  0x15   : > { %2914 = vmatpush3.bf16.msra.mxu1 %v3158_v6  ;;  %v3165_v6 = vld [vmem:[%s3854_s2 + $0x20] sm:$0xff]  }
  0x16   : > { %2900 = vmatpush3.bf16.msra.mxu0 %v3159_v7  ;;  %2937 = vmatprep.subr.bf16.mxu1 %v3267_v1 }
  0x17   : > { %2901 = vmatprep.subr.bf16.mxu0 %v3267_v1 }
  0x18   : > { %2916 = vmatmul.mubr.msk.bf16.vlgmr.msra.gmra.mrb[0].mxu1 %vm592_vm1, %v3414_v11 }
  0x19   : > { %2939 = vmatprep.mubr.msk.bf16.mxu1 %vm3268_vm0, %v3267_v1 }
  0x1a   : > { %2902 = vmatpush3.bf16.msra.mxu0 %v3160_v10  ;;  %v3170_v10 = vld [vmem:[%s3854_s2 + $0x38] sm:$0xff]  }
  0x1b   : > { %2919 = vmatprep.subr.bf16.mxu0 %v3267_v1 }
  0x1d   : > { %2904 = vmatmul.mubr.msk.bf16.vlgmr.msra.gmra.mrb[0].mxu0 %vm592_vm1, %v3414_v11 }
  0x1e   : > { %2920 = vmatpush3.bf16.msra.mxu0 %v3161_v12  ;;  %2927 = vmatprep.mubr.msk.bf16.mxu0 %vm3268_vm0, %v3267_v1  ;;  %v2627_v12 = vld [vmem:[%s3857_s5 + $0x1] ss:$0 sm:$0xff] }
  0x1f   : > { %2921 = vmatprep.subr.bf16.mxu0 %v3267_v1 }
  0x22   : > { %2922 = vmatpush3.bf16.msra.mxu0 %v3162_v13 }
  0x23   : > { %2923 = vmatprep.subr.bf16.mxu0 %v3267_v1 }
  0x26   : > { %2924 = vmatpush3.bf16.msra.mxu0 %v3163_v14 }
  0x27   : > { %2925 = vmatprep.subr.bf16.mxu0 %v3267_v1 }
  0x2a   : > { %2926 = vmatpush3.bf16.msra.mxu0 %v3164_v15 }
  0x2b   : > { %2931 = vmatprep.subr.bf16.mxu0 %v3267_v1 }
  0x2d   : > { %2928 = vmatmul.mubr.msk.bf16.vlgmr.msra.gmra.mrb[4].mxu0 %vm592_vm1, %v3414_v11 }
  0x2e   : > { %2933 = vmatprep.mubr.msk.bf16.mxu0 %vm3268_vm0, %v3267_v1 }
  0xeb   : > { %v710_v17 = vpop.f32.mrb[0].mxu1 }
  0xec   : > { %v2917_v19 = vpop.f32.mrb[1].mxu1  ;;  %v711_v22 = vadd.f32 %v2604_v16, %v710_v17 }
  0xed   : > { %v713_v20 = vpop.f32.mrb[2].mxu1 }
  0xee   : > { %v714_v23 = vadd.f32 %v2604_v16, %v713_v20  ;;  %v2918_v24 = vpop.f32.mrb[3].mxu1 }
  0xf0   : > { %v630_v21 = vpop.f32.mrb[0].mxu0  ;;  %v798_v28 = vpack.c.bf16 %v714_v23, %v711_v22 }
  0xf1   : > { %v631_v25 = vadd.f32 %v2598_v18, %v630_v21  ;;  %v2905_v26 = vpop.f32.mrb[1].mxu0 }
  0xf2   : > { %v633_v27 = vpop.f32.mrb[2].mxu0  ;;  %v804_v32 = vsel %vm799_vm2, %v798_v28, 0 }
  0xf3   : > { %v634_v29 = vadd.f32 %v2598_v18, %v633_v27  ;;  %v2906_v30 = vpop.f32.mrb[3].mxu0  ;;  %2932 = vmatpush3.bf16.xpose.msra.mxu0 %v804_v32 }
  0xf4   : > { %2943 = vmatprep.subr.bf16.mxu0 %v3267_v1 }
  0xf5   : > { %v797_v31 = vpack.c.bf16 %v634_v29, %v631_v25  ;;  %v2642_v25 = vld [vmem:[%s3858_s6 + $0x1] ss:$0 sm:$0xff] }
  0xfa   : > { %2934 = vmatmul.mubr.msk.bf16.vlgmr.msra.gmra.mrb[8].mxu0 %vm799_vm2, %v797_v31 }
  0xfb   : > { %2951 = vmatprep.mubr.msk.bf16.mxu0 %vm3268_vm0, %v3267_v1  ;;  %2944 = vmatpush3.bf16.msra.mxu0 %v3167_v59  ;;  %v2657_v59 = vld [vmem:[%s3859_s7 + $0x1] ss:$0 sm:$0xff] }
  0xfc   : > { %2945 = vmatprep.subr.bf16.mxu0 %v3267_v1 }
  0xff   : > { %2946 = vmatpush3.bf16.msra.mxu0 %v3169_v60 }
 0x100   : > { %v790_v34 = vpop.f32.mrb[4].mxu0  ;;  %2947 = vmatprep.subr.bf16.mxu0 %v3267_v1 }
 0x101   : > { %v791_v35 = vadd.f32 %v2610_v33, %v790_v34  ;;  %v2929_v36 = vpop.f32.mrb[5].mxu0  ;;  %v3173_v34 = vld [vmem:[%s3855_s3 + $0x20] sm:$0xff]  }
 0x102   : > { %v793_v37 = vpop.f32.mrb[6].mxu0  ;;  %v3175_v36 = vld [vmem:[%s3855_s3 + $0x30] sm:$0xff]  }
 0x103   : > { %v794_v38 = vadd.f32 %v2610_v33, %v793_v37  ;;  %v2930_v39 = vpop.f32.mrb[7].mxu0  ;;  %2948 = vmatpush3.bf16.msra.mxu0 %v3171_v61  ;;  %v3176_v37 = vld [vmem:[%s3855_s3 + $0x38] sm:$0xff]  }
 0x104   : > { %2949 = vmatprep.subr.bf16.mxu0 %v3267_v1 }
 0x105   : > { %v872_v40 = vpack.c.bf16 %v794_v38, %v791_v35  ;;  %v3174_v35 = vld [vmem:[%s3855_s3 + $0x28] sm:$0xff]  }
 0x107   : > { %2938 = vmatpush3.bf16.msra.mxu1 %v872_v40  ;;  %2950 = vmatpush3.bf16.msra.mxu0 %v3172_v62 }
 0x108   : > { %2955 = vmatprep.subr.bf16.mxu1 %v3267_v1  ;;  %2967 = vmatprep.subr.bf16.mxu0 %v3267_v1 }
 0x10a   : > { %2952 = vmatmul.mubr.msk.bf16.vlgmr.msra.gmra.mrb[12].mxu0 %vm592_vm1, %v3414_v11 }
 0x10b   : > { %2975 = vmatprep.mubr.msk.bf16.mxu0 %vm3268_vm0, %v3267_v1  ;;  %2968 = vmatpush3.bf16.msra.mxu0 %v3173_v34 }
 0x10c   : > { %2969 = vmatprep.subr.bf16.mxu0 %v3267_v1 }
 0x10f   : > { %2970 = vmatpush3.bf16.msra.mxu0 %v3174_v35 }
 0x110   : > { %2971 = vmatprep.subr.bf16.mxu0 %v3267_v1 }
 0x113   : > { %2972 = vmatpush3.bf16.msra.mxu0 %v3175_v36 }
 0x114   : > { %2973 = vmatprep.subr.bf16.mxu0 %v3267_v1 }
 0x117   : > { %2974 = vmatpush3.bf16.msra.mxu0 %v3176_v37 }
 0x118   : > { %2991 = vmatprep.subr.bf16.mxu0 %v3267_v1 }
 0x11a   : > { %2976 = vmatmul.mubr.msk.bf16.vlgmr.msra.gmra.mrb[16].mxu0 %vm592_vm1, %v3414_v11 }
 0x11b   : > { %2993 = vmatprep.mubr.msk.bf16.mxu0 %vm3268_vm0, %v3267_v1 }
 0x1cd   : > { %v840_v41 = vpop.f32.mrb[8].mxu0 }
 0x1ce   : > { %v847_v42 = vmul.f32 0.25, %v840_v41  ;;  %v2935_v43 = vpop.f32.mrb[9].mxu0 }
 0x1cf   : > { %v843_v44 = vpop.f32.mrb[10].mxu0 }
 0x1d0   : > { %v848_v45 = vmul.f32 0.25, %v843_v44  ;;  %v2936_v46 = vpop.f32.mrb[11].mxu0  ;;  %v849_v47 = vsel %vm799_vm2, %v847_v42, -inf }
 0x1d1   : > { %850 = vmax.xlane.f32.xlu0 %v849_v47 }
 0x1d2   : > { %v852_v48 = vsel %vm799_vm2, %v848_v45, -inf }
 0x1d5   : > { %853 = vmax.xlane.f32.xlu0 %v852_v48 }
 0x1dd   : > { %v995_v13 = vpop.f32.mrb[12].mxu0 }
 0x1de   : > { %v996_v14 = vadd.f32 %v2627_v12, %v995_v13  ;;  %v2953_v15 = vpop.f32.mrb[13].mxu0  ;;  %v3181_v13 = vld [vmem:[%s3854_s2 + $0x50] sm:$0xff]  }
 0x1df   : > { %v998_v16 = vpop.f32.mrb[14].mxu0 }
 0x1e0   : > { %v999_v17 = vadd.f32 %v2627_v12, %v998_v16  ;;  %v2954_v18 = vpop.f32.mrb[15].mxu0  ;;  %v3180_v12 = vld [vmem:[%s3854_s2 + $0x48] sm:$0xff]  }
 0x1e1   : > { %v3182_v18 = vld [vmem:[%s3873_s18 + $0x40] sm:$0xff]  }
 0x1e2   : > { %v1166_v19 = vpack.c.bf16 %v999_v17, %v996_v14  ;;  %v3183_v14 = vld [vmem:[%s3854_s2 + $0x58] sm:$0xff]  }
 0x25e   : > { %v851_v49 = vpop.xlane.xlu0 %850 }
 0x25f   : > { %v855_v50 = vsub.f32 %v847_v42, %v851_v49 }
 0x261   : > { %v857_v51 = vmul.f32 1.442695, %v855_v50 }
 0x262   : > { %v854_v52 = vpop.xlane.xlu0 %853 }
 0x263   : > { %3217 = vpow2.f32 %v857_v51  ;;  %v856_v53 = vsub.f32 %v848_v45, %v854_v52 }
 0x265   : > { %v859_v54 = vmul.f32 1.442695, %v856_v53 }
 0x267   : > { %3219 = vpow2.f32 %v859_v54 }
 0x26d   : > { %v3218_v55 = vpop.eup %3217 }
 0x26e   : > { %v861_v56 = vsel %vm799_vm2, %v3218_v55, 0.0 }
 0x26f   : > { %862 = vadd.xlane.f32.xlu1 %v861_v56  ;;  %v1159_v56 = vpop.f32.mrb[16].mxu0 }
 0x270   : > { %v1160_v61 = vadd.f32 %v2657_v59, %v1159_v56 }
 0x271   : > { %v3220_v57 = vpop.eup %3219 }
 0x272   : > { %v864_v58 = vsel %vm799_vm2, %v3220_v57, 0.0 }
 0x273   : > { %865 = vadd.xlane.f32.xlu1 %v864_v58 }
 0x2fc   : > { %v863_v63 = vpop.xlane.xlu1 %862 }
 0x2fd   : > { %3221 = vrcp.f32 %v863_v63 }
 0x300   : > { %v866_v0 = vpop.xlane.xlu1 %865 }
 0x301   : > { %3223 = vrcp.f32 %v866_v0  ;;  %v3179_v0 = vld [vmem:[%s3856_s4 + $0x8] sm:$0xff]  }
 0x302   : > { %2992 = vmatpush3.bf16.msra.mxu0 %v3179_v0 }
 0x303   : > { %3003 = vmatprep.subr.bf16.mxu0 %v3267_v1 }
 0x307   : > { %v3222_v2 = vpop.eup %3221 }
 0x308   : > { %v869_v4 = vmul.f32 %v3222_v2, %v3218_v55 }
 0x30b   : > { %v3224_v3 = vpop.eup %3223 }
 0x30c   : > { %v870_v5 = vmul.f32 %v3224_v3, %v3220_v57  ;;  %v2977_v57 = vpop.f32.mrb[17].mxu0 }
 0x30d   : > { %v1162_v58 = vpop.f32.mrb[18].mxu0 }
 0x30e   : > { %v871_v7 = vpack.c.bf16 %v870_v5, %v869_v4  ;;  %v2978_v60 = vpop.f32.mrb[19].mxu0  ;;  %v1163_v62 = vadd.f32 %v2657_v59, %v1162_v58 }
 0x310   : > { %2940 = vmatmul.mubr.msk.bf16.vlgmr.msra.gmra.mrb[4].mxu1 %vm799_vm2, %v871_v7  ;;  %v1240_v63 = vpack.c.bf16 %v1163_v62, %v1160_v61 }
 0x311   : > { %2956 = vmatpush3.bf16.msra.mxu1 %v3165_v6  ;;  %2963 = vmatprep.mubr.msk.bf16.mxu1 %vm3268_vm0, %v3267_v1 }
 0x312   : > { %2957 = vmatprep.subr.bf16.mxu1 %v3267_v1 }
 0x315   : > { %2958 = vmatpush3.bf16.msra.mxu1 %v3166_v8  ;;  %v3177_v8 = vld [vmem:[%s3856_s4] sm:$0xff]  }
 0x316   : > { %2959 = vmatprep.subr.bf16.mxu1 %v3267_v1 }
 0x319   : > { %2960 = vmatpush3.bf16.msra.mxu1 %v3168_v9 }
 0x31a   : > { %2961 = vmatprep.subr.bf16.mxu1 %v3267_v1 }
 0x31d   : > { %2962 = vmatpush3.bf16.msra.mxu1 %v3170_v10  ;;  %v3178_v10 = vld [vmem:[%s3854_s2 + $0x40] sm:$0xff]  }
 0x31e   : > { %2979 = vmatprep.subr.bf16.mxu1 %v3267_v1 }
 0x320   : > { %2964 = vmatmul.mubr.msk.bf16.vlgmr.msra.gmra.mrb[8].mxu1 %vm592_vm1, %v3414_v11 }
 0x321   : > { %2981 = vmatprep.mubr.msk.bf16.mxu1 %vm3268_vm0, %v3267_v1 }
 0x3e3   : > { %v3512_v20 = vpop.f32.mrb[4].mxu1 }
 0x3e4   : > { %v2941_v21 = vpop.f32.mrb[5].mxu1 }
 0x3e5   : > { %v3514_v22 = vpop.f32.mrb[6].mxu1  ;;  %v3184_v21 = vld [vmem:[%s3873_s18 + $0x48] sm:$0xff]  }
 0x3e6   : > { %v919_v23 = vpack.c.bf16 %v3514_v22, %v3512_v20  ;;  %v2942_v24 = vpop.f32.mrb[7].mxu1 }
 0x3f3   : > { %v1077_v26 = vpop.f32.mrb[8].mxu1 }
 0x3f4   : > { %v2965_v27 = vpop.f32.mrb[9].mxu1  ;;  %v1078_v29 = vadd.f32 %v2642_v25, %v1077_v26 }
 0x3f5   : > { %v1080_v28 = vpop.f32.mrb[10].mxu1  ;;  %v3186_v27 = vld [vmem:[%s3873_s18 + $0x58] sm:$0xff]  }
 0x3f6   : > { %v1081_v30 = vadd.f32 %v2642_v25, %v1080_v28  ;;  %v2966_v31 = vpop.f32.mrb[11].mxu1  ;;  %v3185_v25 = vld [vmem:[%s3873_s18 + $0x50] sm:$0xff]   ;;  %v2695_v28 = vld [vmem:[%s3858_s6 + $0x2] ss:$0 sm:$0xff] }
 0x3f8   : > { %v1167_v32 = vpack.c.bf16 %v1081_v30, %v1078_v29 }
 0x3fa   : > { %v1172_v33 = vsel %vm799_vm2, %v1167_v32, 0 }
 0x3fb   : > { %2980 = vmatpush3.bf16.xpose.msra.mxu1 %v1172_v33 }
 0x3fc   : > { %2985 = vmatprep.subr.bf16.mxu1 %v3267_v1 }
 0x402   : > { %2982 = vmatmul.mubr.msk.bf16.vlgmr.msra.gmra.mrb[12].mxu1 %vm799_vm2, %v1166_v19 }
 0x403   : > { %2987 = vmatprep.mubr.msk.bf16.mxu1 %vm3268_vm0, %v3267_v1  ;;  %2986 = vmatpush3.bf16.msra.mxu1 %v1240_v63 }
 0x404   : > { %2997 = vmatprep.subr.bf16.mxu1 %v3267_v1 }
 0x4d5   : > { %v1208_v38 = vpop.f32.mrb[12].mxu1 }
 0x4d6   : > { %v1215_v39 = vmul.f32 0.25, %v1208_v38  ;;  %v2983_v40 = vpop.f32.mrb[13].mxu1 }
 0x4d7   : > { %v1211_v41 = vpop.f32.mrb[14].mxu1 }
 0x4d8   : > { %v1216_v42 = vmul.f32 0.25, %v1211_v41  ;;  %v2984_v43 = vpop.f32.mrb[15].mxu1  ;;  %v1217_v44 = vsel %vm799_vm2, %v1215_v39, -inf }
 0x4d9   : > { %1218 = vmax.xlane.f32.xlu0 %v1217_v44  ;;  %v2680_v43 = vld [vmem:[%s3857_s5 + $0x2] ss:$0 sm:$0xff] }
 0x4da   : > { %v1220_v45 = vsel %vm799_vm2, %v1216_v42, -inf }
 0x4db   : > { %1221 = vmax.xlane.f32.xlu1 %v1220_v45 }
 0x566   : > { %v1219_v46 = vpop.xlane.xlu0 %1218 }
 0x567   : > { %v1223_v47 = vsub.f32 %v1215_v39, %v1219_v46 }
 0x568   : > { %v1222_v48 = vpop.xlane.xlu1 %1221 }
 0x569   : > { %v1225_v49 = vmul.f32 1.442695, %v1223_v47  ;;  %v1224_v50 = vsub.f32 %v1216_v42, %v1222_v48 }
 0x56b   : > { %3225 = vpow2.f32 %v1225_v49  ;;  %v1227_v51 = vmul.f32 1.442695, %v1224_v50 }
 0x56d   : > { %3227 = vpow2.f32 %v1227_v51  ;;  %v3187_v51 = vld [vmem:[%s3855_s3 + $0x40] sm:$0xff]  }
 0x575   : > { %v3226_v52 = vpop.eup %3225 }
 0x576   : > { %v1229_v53 = vsel %vm799_vm2, %v3226_v52, 0.0 }
 0x577   : > { %v3228_v54 = vpop.eup %3227  ;;  %1230 = vadd.xlane.f32.xlu0 %v1229_v53  ;;  %v3189_v53 = vld [vmem:[%s3855_s3 + $0x50] sm:$0xff]  }
 0x578   : > { %v1232_v55 = vsel %vm799_vm2, %v3228_v54, 0.0 }
 0x579   : > { %1233 = vadd.xlane.f32.xlu1 %v1232_v55 }
 0x604   : > { %v1231_v2 = vpop.xlane.xlu0 %1230 }
 0x605   : > { %3229 = vrcp.f32 %v1231_v2 }
 0x606   : > { %v1234_v3 = vpop.xlane.xlu1 %1233 }
 0x607   : > { %3231 = vrcp.f32 %v1234_v3 }
 0x60f   : > { %v3230_v4 = vpop.eup %3229 }
 0x610   : > { %v1237_v6 = vmul.f32 %v3230_v4, %v3226_v52  ;;  %v3188_v52 = vld [vmem:[%s3855_s3 + $0x48] sm:$0xff]  }
 0x611   : > { %v3232_v5 = vpop.eup %3231 }
 0x612   : > { %v1238_v7 = vmul.f32 %v3232_v5, %v3228_v54  ;;  %v3190_v54 = vld [vmem:[%s3855_s3 + $0x58] sm:$0xff]  }
 0x614   : > { %v1239_v9 = vpack.c.bf16 %v1238_v7, %v1237_v6 }
 0x616   : > { %2988 = vmatmul.mubr.msk.bf16.vlgmr.msra.gmra.mrb[16].mxu1 %vm799_vm2, %v1239_v9 }
 0x617   : > { %2998 = vmatpush3.bf16.msra.mxu1 %v3177_v8  ;;  %2999 = vmatprep.mubr.msk.bf16.mxu1 %vm3268_vm0, %v3267_v1 }
 0x618   : > { %3015 = vmatprep.subr.bf16.mxu1 %v3267_v1 }
 0x61e   : > { %3000 = vmatmul.mubr.msk.bf16.vlgmr.msra.gmra.mrb[20].mxu1 %vm799_vm2, %v919_v23 }
 0x61f   : > { %3016 = vmatpush3.bf16.msra.mxu1 %v3178_v10  ;;  %3023 = vmatprep.mubr.msk.bf16.mxu1 %vm3268_vm0, %v3267_v1 }
 0x620   : > { %3017 = vmatprep.subr.bf16.mxu1 %v3267_v1 }
 0x623   : > { %3018 = vmatpush3.bf16.msra.mxu1 %v3180_v12 }
 0x624   : > { %3019 = vmatprep.subr.bf16.mxu1 %v3267_v1 }
 0x627   : > { %3020 = vmatpush3.bf16.msra.mxu1 %v3181_v13 }
 0x628   : > { %3021 = vmatprep.subr.bf16.mxu1 %v3267_v1 }
 0x62b   : > { %3022 = vmatpush3.bf16.msra.mxu1 %v3183_v14  ;;  %v2710_v14 = vld [vmem:[%s3859_s7 + $0x2] ss:$0 sm:$0xff] }
 0x62c   : > { %3039 = vmatprep.subr.bf16.mxu1 %v3267_v1 }
 0x62e   : > { %3024 = vmatmul.mubr.msk.bf16.vlgmr.msra.gmra.mrb[24].mxu1 %vm592_vm1, %v3414_v11 }
 0x62f   : > { %3041 = vmatprep.mubr.msk.bf16.mxu1 %vm3268_vm0, %v3267_v1 }
 0x6e9   : > { %v1278_v15 = vpop.f32.mrb[16].mxu1 }
 0x6ea   : > { %v2989_v16 = vpop.f32.mrb[17].mxu1 }
 0x6eb   : > { %v1281_v17 = vpop.f32.mrb[18].mxu1 }
 0x6ec   : > { %v1288_v19 = vpack.c.bf16 %v1281_v17, %v1278_v15  ;;  %v2990_v20 = vpop.f32.mrb[19].mxu1 }
 0x6ee   : > { %2994 = vmatmul.mubr.msk.bf16.vlgmr.msra.gmra.mrb[20].mxu0 %vm799_vm2, %v1288_v19  ;;  %v3191_v19 = vld [vmem:[%s3856_s4 + $0x10] sm:$0xff]  }
 0x6ef   : > { %3004 = vmatpush3.bf16.msra.mxu0 %v3182_v18  ;;  %3011 = vmatprep.mubr.msk.bf16.mxu0 %vm3268_vm0, %v3267_v1 }
 0x6f0   : > { %3005 = vmatprep.subr.bf16.mxu0 %v3267_v1 }
 0x6f1   : > { %v1382_v22 = vpop.f32.mrb[20].mxu1 }
 0x6f2   : > { %v3001_v23 = vpop.f32.mrb[21].mxu1 }
 0x6f3   : > { %3006 = vmatpush3.bf16.msra.mxu0 %v3184_v21  ;;  %v1385_v24 = vpop.f32.mrb[22].mxu1 }
 0x6f4   : > { %v3002_v26 = vpop.f32.mrb[23].mxu1  ;;  %3007 = vmatprep.subr.bf16.mxu0 %v3267_v1 }
 0x6f7   : > { %3008 = vmatpush3.bf16.msra.mxu0 %v3185_v25 }
 0x6f8   : > { %3009 = vmatprep.subr.bf16.mxu0 %v3267_v1 }
 0x6fb   : > { %3010 = vmatpush3.bf16.msra.mxu0 %v3186_v27  ;;  %v3194_v27 = vld [vmem:[%s3873_s18 + $0x60] sm:$0xff]  }
 0x6fc   : > { %3027 = vmatprep.subr.bf16.mxu0 %v3267_v1 }
 0x6fe   : > { %3012 = vmatmul.mubr.msk.bf16.vlgmr.msra.gmra.mrb[24].mxu0 %vm592_vm1, %v3414_v11 }
 0x6ff   : > { %3035 = vmatprep.mubr.msk.bf16.mxu0 %vm3268_vm0, %v3267_v1  ;;  %3028 = vmatpush3.bf16.msra.mxu0 %v3187_v51 }
 0x700   : > { %3029 = vmatprep.subr.bf16.mxu0 %v3267_v1 }
 0x701   : > { %v1546_v29 = vpop.f32.mrb[24].mxu1 }
 0x702   : > { %v1547_v30 = vadd.f32 %v2695_v28, %v1546_v29  ;;  %v3025_v31 = vpop.f32.mrb[25].mxu1  ;;  %v3198_v29 = vld [vmem:[%s3873_s18 + $0x70] sm:$0xff]  }
 0x703   : > { %v1549_v32 = vpop.f32.mrb[26].mxu1  ;;  %3030 = vmatpush3.bf16.msra.mxu0 %v3188_v52 }
 0x704   : > { %v1550_v33 = vadd.f32 %v2695_v28, %v1549_v32  ;;  %v3026_v34 = vpop.f32.mrb[27].mxu1  ;;  %3031 = vmatprep.subr.bf16.mxu0 %v3267_v1  ;;  %v3196_v28 = vld [vmem:[%s3873_s18 + $0x68] sm:$0xff]  }
 0x705   : > { %v3192_v34 = vld [vmem:[%s3854_s2 + $0x60] sm:$0xff]  }
 0x706   : > { %v1636_v35 = vpack.c.bf16 %v1550_v33, %v1547_v30  ;;  %v3199_v30 = vld [vmem:[%s3873_s18 + $0x78] sm:$0xff]  }
 0x707   : > { %3032 = vmatpush3.bf16.msra.mxu0 %v3189_v53 }
 0x708   : > { %v1641_v36 = vsel %vm799_vm2, %v1636_v35, 0  ;;  %3033 = vmatprep.subr.bf16.mxu0 %v3267_v1 }
 0x709   : > { %3040 = vmatpush3.bf16.xpose.msra.mxu1 %v1641_v36 }
 0x70a   : > { %3045 = vmatprep.subr.bf16.mxu1 %v3267_v1 }
 0x70b   : > { %3034 = vmatpush3.bf16.msra.mxu0 %v3190_v54 }
 0x70c   : > { %3051 = vmatprep.subr.bf16.mxu0 %v3267_v1 }
 0x70e   : > { %3036 = vmatmul.mubr.msk.bf16.vlgmr.msra.gmra.mrb[28].mxu0 %vm592_vm1, %v3414_v11 }
 0x70f   : > { %3053 = vmatprep.mubr.msk.bf16.mxu0 %vm3268_vm0, %v3267_v1  ;;  %3052 = vmatpush3.bf16.msra.mxu0 %v3191_v19 }
 0x710   : > { %3069 = vmatprep.subr.bf16.mxu0 %v3267_v1 }
 0x7c1   : > { %v1332_v37 = vpop.f32.mrb[20].mxu0 }
 0x7c2   : > { %v3619_v38 = vadd.f32 %v1382_v22, %v1332_v37  ;;  %v2995_v39 = vpop.f32.mrb[21].mxu0  ;;  %v3193_v37 = vld [vmem:[%s3854_s2 + $0x68] sm:$0xff]  }
 0x7c3   : > { %v1335_v40 = vpop.f32.mrb[22].mxu0  ;;  %v3195_v39 = vld [vmem:[%s3854_s2 + $0x70] sm:$0xff]  }
 0x7c4   : > { %v3621_v41 = vadd.f32 %v1385_v24, %v1335_v40  ;;  %v2996_v42 = vpop.f32.mrb[23].mxu0  ;;  %v3197_v40 = vld [vmem:[%s3854_s2 + $0x78] sm:$0xff]  }
 0x7c5   : > { %v2731_v42 = vld [vmem:[%s3857_s5 + $0x3] ss:$0 sm:$0xff] }
 0x7d1   : > { %v1464_v44 = vpop.f32.mrb[24].mxu0 }
 0x7d2   : > { %v3013_v45 = vpop.f32.mrb[25].mxu0  ;;  %v1465_v47 = vadd.f32 %v2680_v43, %v1464_v44 }
 0x7d3   : > { %v1467_v46 = vpop.f32.mrb[26].mxu0 }
 0x7d4   : > { %v1468_v48 = vadd.f32 %v2680_v43, %v1467_v46  ;;  %v3014_v49 = vpop.f32.mrb[27].mxu0 }
 0x7d6   : > { %v1635_v50 = vpack.c.bf16 %v1468_v48, %v1465_v47 }
 0x7d8   : > { %3042 = vmatmul.mubr.msk.bf16.vlgmr.msra.gmra.mrb[28].mxu1 %vm799_vm2, %v1635_v50 }
 0x7d9   : > { %3047 = vmatprep.mubr.msk.bf16.mxu1 %vm3268_vm0, %v3267_v1 }
 0x7e1   : > { %v1628_v10 = vpop.f32.mrb[28].mxu0 }
 0x7e2   : > { %v3037_v12 = vpop.f32.mrb[29].mxu0  ;;  %v1629_v16 = vadd.f32 %v2710_v14, %v1628_v10 }
 0x7e3   : > { %v1631_v13 = vpop.f32.mrb[30].mxu0 }
 0x7e4   : > { %v3038_v15 = vpop.f32.mrb[31].mxu0  ;;  %v1632_v17 = vadd.f32 %v2710_v14, %v1631_v13 }
 0x7e6   : > { %v1709_v18 = vpack.c.bf16 %v1632_v17, %v1629_v16 }
 0x7e8   : > { %3046 = vmatpush3.bf16.msra.mxu1 %v1709_v18 }
 0x7e9   : > { %3057 = vmatprep.subr.bf16.mxu1 %v3267_v1 }
 0x8ab   : > { %v1677_v55 = vpop.f32.mrb[28].mxu1 }
 0x8ac   : > { %v1684_v56 = vmul.f32 0.25, %v1677_v55  ;;  %v3043_v57 = vpop.f32.mrb[29].mxu1 }
 0x8ad   : > { %v1680_v58 = vpop.f32.mrb[30].mxu1 }
 0x8ae   : > { %v1685_v59 = vmul.f32 0.25, %v1680_v58  ;;  %v3044_v60 = vpop.f32.mrb[31].mxu1  ;;  %v1686_v61 = vsel %vm799_vm2, %v1684_v56, -inf }
 0x8af   : > { %1687 = vmax.xlane.f32.xlu0 %v1686_v61 }
 0x8b0   : > { %v1689_v62 = vsel %vm799_vm2, %v1685_v59, -inf }
 0x8b1   : > { %1690 = vmax.xlane.f32.xlu1 %v1689_v62 }
 0x93c   : > { %v1688_v63 = vpop.xlane.xlu0 %1687 }
 0x93d   : > { %v1692_v0 = vsub.f32 %v1684_v56, %v1688_v63  ;;  %v2746_v56 = vld [vmem:[%s3858_s6 + $0x3] ss:$0 sm:$0xff] }
 0x93e   : > { %v1691_v2 = vpop.xlane.xlu1 %1690 }
 0x93f   : > { %v1694_v3 = vmul.f32 1.442695, %v1692_v0  ;;  %v1693_v4 = vsub.f32 %v1685_v59, %v1691_v2  ;;  %v3201_v0 = vld [vmem:[%s3855_s3 + $0x68] sm:$0xff]   ;;  %v3202_v2 = vld [vmem:[%s3855_s3 + $0x70] sm:$0xff]  }
 0x941   : > { %3233 = vpow2.f32 %v1694_v3  ;;  %v1696_v5 = vmul.f32 1.442695, %v1693_v4  ;;  %v3203_v3 = vld [vmem:[%s3855_s3 + $0x78] sm:$0xff]  }
 0x943   : > { %3235 = vpow2.f32 %v1696_v5 }
 0x94b   : > { %v3234_v6 = vpop.eup %3233 }
 0x94c   : > { %v1698_v7 = vsel %vm799_vm2, %v3234_v6, 0.0 }
 0x94d   : > { %v3236_v8 = vpop.eup %3235  ;;  %1699 = vadd.xlane.f32.xlu0 %v1698_v7 }
 0x94e   : > { %v1701_v9 = vsel %vm799_vm2, %v3236_v8, 0.0 }
 0x94f   : > { %1702 = vadd.xlane.f32.xlu1 %v1701_v9 }
 0x9da   : > { %v1700_v20 = vpop.xlane.xlu0 %1699 }
 0x9db   : > { %3237 = vrcp.f32 %v1700_v20 }
 0x9dc   : > { %v1703_v21 = vpop.xlane.xlu1 %1702 }
 0x9dd   : > { %3239 = vrcp.f32 %v1703_v21 }
 0x9e5   : > { %v3238_v22 = vpop.eup %3237 }
 0x9e6   : > { %v1706_v24 = vmul.f32 %v3238_v22, %v3234_v6 }
 0x9e7   : > { %v3240_v23 = vpop.eup %3239 }
 0x9e8   : > { %v1707_v25 = vmul.f32 %v3240_v23, %v3236_v8 }
 0x9ea   : > { %v1708_v26 = vpack.c.bf16 %v1707_v25, %v1706_v24  ;;  %v2761_v25 = vld [vmem:[%s3859_s7 + $0x3] ss:$0 sm:$0xff] }
 0x9ec   : > { %3048 = vmatmul.mubr.msk.bf16.vlgmr.msra.gmra.mrb[32].mxu1 %vm799_vm2, %v1708_v26 }
 0x9ed   : > { %3065 = vmatprep.mubr.msk.bf16.mxu1 %vm3268_vm0, %v3267_v1  ;;  %3058 = vmatpush3.bf16.msra.mxu1 %v3194_v27 }
 0x9ee   : > { %3059 = vmatprep.subr.bf16.mxu1 %v3267_v1 }
 0x9f1   : > { %3060 = vmatpush3.bf16.msra.mxu1 %v3196_v28 }
 0x9f2   : > { %3061 = vmatprep.subr.bf16.mxu1 %v3267_v1 }
 0x9f5   : > { %3062 = vmatpush3.bf16.msra.mxu1 %v3198_v29 }
 0x9f6   : > { %3063 = vmatprep.subr.bf16.mxu1 %v3267_v1 }
 0x9f9   : > { %3064 = vmatpush3.bf16.msra.mxu1 %v3199_v30  ;;  %v3204_v30 = vld [vmem:[%s3856_s4 + $0x18] sm:$0xff]  }
 0x9fa   : > { %3081 = vmatprep.subr.bf16.mxu1 %v3267_v1 }
 0x9fc   : > { %3066 = vmatmul.mubr.msk.bf16.vlgmr.msra.gmra.mrb[36].mxu1 %vm592_vm1, %v3414_v11 }
 0x9fd   : > { %3089 = vmatprep.mubr.msk.bf16.mxu1 %vm3268_vm0, %v3267_v1 }
 0xabf   : > { %v1747_v31 = vpop.f32.mrb[32].mxu1 }
 0xac0   : > { %v3049_v32 = vpop.f32.mrb[33].mxu1 }
 0xac1   : > { %v1750_v33 = vpop.f32.mrb[34].mxu1 }
 0xac2   : > { %v1757_v35 = vpack.c.bf16 %v1750_v33, %v1747_v31  ;;  %v3050_v36 = vpop.f32.mrb[35].mxu1 }
 0xac4   : > { %3054 = vmatmul.mubr.msk.bf16.vlgmr.msra.gmra.mrb[32].mxu0 %vm799_vm2, %v1757_v35 }
 0xac5   : > { %3070 = vmatpush3.bf16.msra.mxu0 %v3192_v34  ;;  %3077 = vmatprep.mubr.msk.bf16.mxu0 %vm3268_vm0, %v3267_v1 }
 0xac6   : > { %3071 = vmatprep.subr.bf16.mxu0 %v3267_v1 }
 0xac9   : > { %3072 = vmatpush3.bf16.msra.mxu0 %v3193_v37 }
 0xaca   : > { %3073 = vmatprep.subr.bf16.mxu0 %v3267_v1 }
 0xacd   : > { %3074 = vmatpush3.bf16.msra.mxu0 %v3195_v39 }
 0xace   : > { %3075 = vmatprep.subr.bf16.mxu0 %v3267_v1 }
 0xacf   : > { %v1885_v43 = vpop.f32.mrb[36].mxu1 }
 0xad0   : > { %v1886_v44 = vadd.f32 %v2731_v42, %v1885_v43  ;;  %v3067_v45 = vpop.f32.mrb[37].mxu1 }
 0xad1   : > { %3076 = vmatpush3.bf16.msra.mxu0 %v3197_v40  ;;  %v1888_v46 = vpop.f32.mrb[38].mxu1 }
 0xad2   : > { %3093 = vmatprep.subr.bf16.mxu0 %v3267_v1  ;;  %v1889_v47 = vadd.f32 %v2731_v42, %v1888_v46  ;;  %v3068_v48 = vpop.f32.mrb[39].mxu1  ;;  %v2773_v46 = vld [vmem:[%s3860_s8] ss:$0 sm:$0xff] }
 0xad4   : > { %3078 = vmatmul.mubr.msk.bf16.vlgmr.msra.gmra.mrb[36].mxu0 %vm592_vm1, %v3414_v11  ;;  %v2056_v49 = vpack.c.bf16 %v1889_v47, %v1886_v44 }
 0xad5   : > { %3095 = vmatprep.mubr.msk.bf16.mxu0 %vm3268_vm0, %v3267_v1 }
 0xb97   : > { %v1801_v50 = vpop.f32.mrb[32].mxu0 }
 0xb98   : > { %v3711_v51 = vadd.f32 %v1801_v50, %v3619_v38  ;;  %v3055_v52 = vpop.f32.mrb[33].mxu0 }
 0xb99   : > { %v1804_v53 = vpop.f32.mrb[34].mxu0 }
 0xb9a   : > { %v3714_v54 = vadd.f32 %v1804_v53, %v3621_v41  ;;  %v3056_v55 = vpop.f32.mrb[35].mxu0  ;;  %v3200_v41 = vld [vmem:[%s3855_s3 + $0x60] sm:$0xff]  }
 0xb9b   : > { %3082 = vmatpush3.bf16.msra.mxu1 %v3200_v41 }
 0xb9c   : > { %3083 = vmatprep.subr.bf16.mxu1 %v3267_v1 }
 0xb9f   : > { %3084 = vmatpush3.bf16.msra.mxu1 %v3201_v0 }
 0xba0   : > { %3085 = vmatprep.subr.bf16.mxu1 %v3267_v1 }
 0xba3   : > { %3086 = vmatpush3.bf16.msra.mxu1 %v3202_v2 }
 0xba4   : > { %3087 = vmatprep.subr.bf16.mxu1 %v3267_v1 }
 0xba7   : > { %v1967_v57 = vpop.f32.mrb[36].mxu0  ;;  %3088 = vmatpush3.bf16.msra.mxu1 %v3203_v3 }
 0xba8   : > { %v3079_v58 = vpop.f32.mrb[37].mxu0  ;;  %v1968_v60 = vadd.f32 %v2746_v56, %v1967_v57  ;;  %3105 = vmatprep.subr.bf16.mxu1 %v3267_v1 }
 0xba9   : > { %v1970_v59 = vpop.f32.mrb[38].mxu0 }
 0xbaa   : > { %v1971_v61 = vadd.f32 %v2746_v56, %v1970_v59  ;;  %v3080_v62 = vpop.f32.mrb[39].mxu0  ;;  %3090 = vmatmul.mubr.msk.bf16.vlgmr.msra.gmra.mrb[40].mxu1 %vm592_vm1, %v3414_v11  ;;  %v3257_v56 = vld [vmem:[%s3399_s28] sm:$0xff]  ;;  %v3258_v59 = vld [vmem:[%s3399_s28 + $0x8] sm:$0xff] }
 0xbab   : > { %3107 = vmatprep.mubr.msk.bf16.mxu1 %vm3268_vm0, %v3267_v1  ;;  %3106 = vmatpush3.bf16.msra.mxu1 %v3204_v30 }
 0xbac   : > { %v2057_v63 = vpack.c.bf16 %v1971_v61, %v1968_v60  ;;  %3123 = vmatprep.subr.bf16.mxu1 %v3267_v1 }
 0xbae   : > { %v2062_v38 = vsel %vm799_vm2, %v2057_v63, 0 }
 0xbaf   : > { %3094 = vmatpush3.bf16.xpose.msra.mxu0 %v2062_v38 }
 0xbb0   : > { %3099 = vmatprep.subr.bf16.mxu0 %v3267_v1 }
 0xbb6   : > { %3096 = vmatmul.mubr.msk.bf16.vlgmr.msra.gmra.mrb[40].mxu0 %vm799_vm2, %v2056_v49 }
 0xbb7   : > { %3101 = vmatprep.mubr.msk.bf16.mxu0 %vm3268_vm0, %v3267_v1 }
 0xc7d   : > { %v2049_v22 = vpop.f32.mrb[40].mxu1 }
 0xc7e   : > { %v3091_v23 = vpop.f32.mrb[41].mxu1  ;;  %v2050_v27 = vadd.f32 %v2761_v25, %v2049_v22  ;;  %v2774_v22 = vld [vmem:[%s3861_s9] ss:$0 sm:$0xff] }
 0xc7f   : > { %v2052_v24 = vpop.f32.mrb[42].mxu1 }
 0xc80   : > { %v3092_v26 = vpop.f32.mrb[43].mxu1  ;;  %v2053_v28 = vadd.f32 %v2761_v25, %v2052_v24 }
 0xc82   : > { %v2130_v29 = vpack.c.bf16 %v2053_v28, %v2050_v27  ;;  %v2775_v27 = vld [vmem:[%s3862_s10] ss:$0 sm:$0xff] }
 0xc84   : > { %3100 = vmatpush3.bf16.msra.mxu0 %v2130_v29 }
 0xc85   : > { %3111 = vmatprep.subr.bf16.mxu0 %v3267_v1 }
 0xc89   : > { %v2098_v4 = vpop.f32.mrb[40].mxu0 }
 0xc8a   : > { %v2105_v5 = vmul.f32 0.25, %v2098_v4  ;;  %v3097_v6 = vpop.f32.mrb[41].mxu0 }
 0xc8b   : > { %v2101_v7 = vpop.f32.mrb[42].mxu0  ;;  %v3206_v6 = vld [vmem:[%s3863_s11 + $0x8] sm:$0xff]  }
 0xc8c   : > { %v2106_v8 = vmul.f32 0.25, %v2101_v7  ;;  %v3098_v9 = vpop.f32.mrb[43].mxu0  ;;  %v2107_v10 = vsel %vm799_vm2, %v2105_v5, -inf  ;;  %v3207_v7 = vld [vmem:[%s3863_s11 + $0x10] sm:$0xff]  }
 0xc8d   : > { %2108 = vmax.xlane.f32.xlu0 %v2107_v10  ;;  %v3209_v9 = vld [vmem:[%s3865_s13] sm:$0xff]   ;;  %v3210_v10 = vld [vmem:[%s3865_s13 + $0x8] sm:$0xff]  }
 0xc8e   : > { %v2110_v12 = vsel %vm799_vm2, %v2106_v8, -inf }
 0xc8f   : > { %2111 = vmax.xlane.f32.xlu1 %v2110_v12  ;;  %v3211_v12 = vld [vmem:[%s3865_s13 + $0x10] sm:$0xff]  }
 0xd1a   : > { %v2109_v13 = vpop.xlane.xlu0 %2108 }
 0xd1b   : > { %v2113_v14 = vsub.f32 %v2105_v5, %v2109_v13  ;;  %v3205_v5 = vld [vmem:[%s3863_s11] sm:$0xff]   ;;  %v3212_v13 = vld [vmem:[%s3865_s13 + $0x18] sm:$0xff]  }
 0xd1c   : > { %v2112_v15 = vpop.xlane.xlu1 %2111 }
 0xd1d   : > { %v2115_v16 = vmul.f32 1.442695, %v2113_v14  ;;  %v2114_v11 = vsub.f32 %v2106_v8, %v2112_v15  ;;  %v3208_v8 = vld [vmem:[%s3863_s11 + $0x18] sm:$0xff]   ;;  %v3213_v14 = vld [vmem:[%s3865_s13 + $0x20] sm:$0xff]   ;;  %v3214_v15 = vld [vmem:[%s3865_s13 + $0x28] sm:$0xff]  }
 0xd1f   : > { %3241 = vpow2.f32 %v2115_v16  ;;  %v2117_v17 = vmul.f32 1.442695, %v2114_v11 }
 0xd21   : > { %3243 = vpow2.f32 %v2117_v17 }
 0xd29   : > { %v3242_v18 = vpop.eup %3241 }
 0xd2a   : > { %v2119_v19 = vsel %vm799_vm2, %v3242_v18, 0.0 }
 0xd2b   : > { %v3244_v20 = vpop.eup %3243  ;;  %2120 = vadd.xlane.f32.xlu0 %v2119_v19 }
 0xd2c   : > { %v2122_v21 = vsel %vm799_vm2, %v3244_v20, 0.0 }
 0xd2d   : > { %2123 = vadd.xlane.f32.xlu1 %v2122_v21 }
 0xdb8   : > { %v2121_v31 = vpop.xlane.xlu0 %2120 }
 0xdb9   : > { %3245 = vrcp.f32 %v2121_v31 }
 0xdba   : > { %v2124_v32 = vpop.xlane.xlu1 %2123 }
 0xdbb   : > { %3247 = vrcp.f32 %v2124_v32  ;;  %v3215_v32 = vld [vmem:[%s3865_s13 + $0x30] sm:$0xff]  }
 0xdc3   : > { %v3246_v33 = vpop.eup %3245 }
 0xdc4   : > { %v2127_v35 = vmul.f32 %v3246_v33, %v3242_v18  ;;  %v3216_v33 = vld [vmem:[%s3865_s13 + $0x38] sm:$0xff]  }
 0xdc5   : > { %v3248_v34 = vpop.eup %3247 }
 0xdc6   : > { %v2128_v36 = vmul.f32 %v3248_v34, %v3244_v20  ;;  %v2776_v34 = vld [vmem:[%s3864_s12] ss:$0 sm:$0xff] }
 0xdc8   : > { %v2129_v37 = vpack.c.bf16 %v2128_v36, %v2127_v35 }
 0xdca   : > { %3102 = vmatmul.mubr.msk.bf16.vlgmr.msra.gmra.mrb[44].mxu0 %vm799_vm2, %v2129_v37 }
 0xdcb   : > { %3119 = vmatprep.mubr.msk.bf16.mxu0 %vm3268_vm0, %v3267_v1  ;;  %3112 = vmatpush3.bf16.msra.mxu0 %v3205_v5 }
 0xdcc   : > { %3113 = vmatprep.subr.bf16.mxu0 %v3267_v1 }
 0xdcf   : > { %3114 = vmatpush3.bf16.msra.mxu0 %v3206_v6 }
 0xdd0   : > { %3115 = vmatprep.subr.bf16.mxu0 %v3267_v1 }
 0xdd3   : > { %3116 = vmatpush3.bf16.msra.mxu0 %v3207_v7 }
 0xdd4   : > { %3117 = vmatprep.subr.bf16.mxu0 %v3267_v1 }
 0xdd7   : > { %3118 = vmatpush3.bf16.msra.mxu0 %v3208_v8  ;;  %v2791_v8 = vld [vmem:[%s3867_s15] ss:$0 sm:$0xff] }
 0xe9d   : > { %v2168_v39 = vpop.f32.mrb[44].mxu0 }
 0xe9e   : > { %v3103_v40 = vpop.f32.mrb[45].mxu0 }
 0xe9f   : > { %v2171_v42 = vpop.f32.mrb[46].mxu0 }
 0xea0   : > { %v2178_v43 = vpack.c.bf16 %v2171_v42, %v2168_v39  ;;  %v3104_v44 = vpop.f32.mrb[47].mxu0 }
 0xea2   : > { %3108 = vmatmul.mubr.msk.bf16.vlgmr.msra.gmra.mrb[44].mxu1 %vm799_vm2, %v2178_v43 }
 0xea3   : > { %3139 = vmatprep.mubr.msk.bf16.mxu1 %vm3268_vm0, %v3267_v1  ;;  %3124 = vmatpush3.bf16.msra.mxu1 %v3209_v9 }
 0xea4   : > { %3125 = vmatprep.subr.bf16.mxu1 %v3267_v1 }
 0xea7   : > { %3126 = vmatpush3.bf16.msra.mxu1 %v3210_v10 }
 0xea8   : > { %3127 = vmatprep.subr.bf16.mxu1 %v3267_v1 }
 0xeab   : > { %3128 = vmatpush3.bf16.msra.mxu1 %v3211_v12  ;;  %v2792_v12 = vld [vmem:[%s3868_s16] ss:$0 sm:$0xff] }
 0xeac   : > { %3129 = vmatprep.subr.bf16.mxu1 %v3267_v1 }
 0xeaf   : > { %3130 = vmatpush3.bf16.msra.mxu1 %v3212_v13 }
 0xeb0   : > { %3131 = vmatprep.subr.bf16.mxu1 %v3267_v1 }
 0xeb3   : > { %3132 = vmatpush3.bf16.msra.mxu1 %v3213_v14 }
 0xeb4   : > { %3133 = vmatprep.subr.bf16.mxu1 %v3267_v1 }
 0xeb7   : > { %3134 = vmatpush3.bf16.msra.mxu1 %v3214_v15 }
 0xeb8   : > { %3135 = vmatprep.subr.bf16.mxu1 %v3267_v1 }
 0xebb   : > { %3136 = vmatpush3.bf16.msra.mxu1 %v3215_v32 }
 0xebc   : > { %3137 = vmatprep.subr.bf16.mxu1 %v3267_v1  ;;  %v2782_v1 = vld [vmem:[%s3866_s14] ss:$0 sm:$0xff] }
 0xebf   : > { %3138 = vmatpush3.bf16.msra.mxu1 %v3216_v33 }
 0xf75   : > { %v2222_v45 = vpop.f32.mrb[44].mxu1 }
 0xf76   : > { %v2229_v47 = vadd.f32 %v2222_v45, %v3711_v51  ;;  %v3109_v48 = vpop.f32.mrb[45].mxu1 }
 0xf77   : > { %v2225_v49 = vpop.f32.mrb[46].mxu1 }
 0xf78   : > { %v2238_v50 = vadd.f32 %v2773_v46, %v2229_v47  ;;  %v2230_v52 = vadd.f32 %v2225_v49, %v3714_v54  ;;  %v3110_v53 = vpop.f32.mrb[47].mxu1 }
 0xf7a   : > { %v2239_v55 = vadd.f32 %v2773_v46, %v2230_v52  ;;  %v2240_v57 = vadd.f32 %v3257_v56, %v2238_v50 }
 0xf7c   : > { %v2242_v58 = vsel %vm592_vm1, %v2240_v57, 0.0  ;;  %v2241_v60 = vadd.f32 %v3258_v59, %v2239_v55 }
 0xf7d   : > { %2243 = vadd.xlane.f32.xlu0 %v2242_v58 }
 0xf7e   : > { %v2245_v61 = vsel %vm592_vm1, %v2241_v60, 0.0 }
 0xf7f   : > { %2246 = vadd.xlane.f32.xlu1 %v2245_v61 }
0x100a   : > { %v2244_v62 = vpop.xlane.xlu0 %2243 }
0x100b   : > { %v2249_v63 = vmul.f32 0.015625, %v2244_v62 }
0x100c   : > { %v2247_v51 = vpop.xlane.xlu1 %2246 }
0x100d   : > { %v2251_v38 = vsub.f32 %v2240_v57, %v2249_v63  ;;  %v2250_v41 = vmul.f32 0.015625, %v2247_v51 }
0x100f   : > { %v2252_v0 = vsub.f32 %v2241_v60, %v2250_v41  ;;  %v2253_v2 = vmul.f32 %v2251_v38, %v2251_v38 }
0x1011   : > { %v2255_v54 = vsel %vm592_vm1, %v2253_v2, 0.0  ;;  %v2254_v3 = vmul.f32 %v2252_v0, %v2252_v0 }
0x1012   : > { %2256 = vadd.xlane.f32.xlu0 %v2255_v54 }
0x1013   : > { %v2258_v4 = vsel %vm592_vm1, %v2254_v3, 0.0 }
0x1014   : > { %2259 = vadd.xlane.f32.xlu1 %v2258_v4 }
0x109f   : > { %v2257_v16 = vpop.xlane.xlu0 %2256 }
0x10a0   : > { %v2261_v11 = vmul.f32 0.015625, %v2257_v16 }
0x10a1   : > { %v2260_v17 = vpop.xlane.xlu1 %2259 }
0x10a2   : > { %v2263_v18 = vadd.f32 1e-05, %v2261_v11  ;;  %v2262_v19 = vmul.f32 0.015625, %v2260_v17 }
0x10a4   : > { %3249 = vrsqrt.f32 %v2263_v18  ;;  %v2264_v20 = vadd.f32 1e-05, %v2262_v19 }
0x10a6   : > { %3251 = vrsqrt.f32 %v2264_v20 }
0x10ae   : > { %v3250_v21 = vpop.eup %3249 }
0x10af   : > { %v2267_v23 = vmul.f32 %v3250_v21, %v2251_v38 }
0x10b0   : > { %v3252_v24 = vpop.eup %3251 }
0x10b1   : > { %v2276_v25 = vmul.f32 %v2774_v22, %v2267_v23  ;;  %v2268_v26 = vmul.f32 %v3252_v24, %v2252_v0 }
0x10b3   : > { %v2277_v28 = vmul.f32 %v2774_v22, %v2268_v26  ;;  %v2285_v29 = vadd.f32 %v2775_v27, %v2276_v25 }
0x10b5   : > { %v2286_v30 = vadd.f32 %v2775_v27, %v2277_v28 }
0x10b7   : > { %v2295_v31 = vpack.c.bf16 %v2286_v30, %v2285_v29 }
0x10b9   : > { %3120 = vmatmul.mubr.msk.bf16.vlgmr.msra.gmra.mrb[48].mxu0 %vm592_vm1, %v2295_v31 }
0x118c   : > { %v2364_v35 = vpop.f32.mrb[48].mxu0 }
0x118d   : > { %v2365_v36 = vadd.f32 %v2776_v34, %v2364_v35  ;;  %v3121_v37 = vpop.f32.mrb[49].mxu0 }
0x118e   : > { %v2367_v39 = vpop.f32.mrb[50].mxu0 }
0x118f   : > { %v2368_v40 = vadd.f32 %v2776_v34, %v2367_v39  ;;  %v3122_v42 = vpop.f32.mrb[51].mxu0  ;;  %v2371_v43 = vmax.f32 %v2365_v36, 0.0 }
0x1191   : > { %v2372_v44 = vmax.f32 %v2368_v40, 0.0 }
0x1193   : > { %v2389_v45 = vpack.c.bf16 %v2372_v44, %v2371_v43 }
0x1195   : > { %3140 = vmatmul.mubr.bf16.vlgmr.msra.gmra.mrb[48].mxu1 %v2389_v45 }
0x1268   : > { %v2479_v46 = vpop.f32.mrb[48].mxu1 }
0x1269   : > { %v2480_v47 = vadd.f32 %v2782_v1, %v2479_v46  ;;  %v3141_v48 = vpop.f32.mrb[49].mxu1 }
0x126a   : > { %v2482_v49 = vpop.f32.mrb[50].mxu1 }
0x126b   : > { %v2483_v50 = vadd.f32 %v2782_v1, %v2482_v49  ;;  %v3142_v52 = vpop.f32.mrb[51].mxu1  ;;  %v2486_v53 = vadd.f32 %v2480_v47, %v2285_v29 }
0x126d   : > { %v2488_v55 = vsel %vm592_vm1, %v2486_v53, 0.0  ;;  %v2487_v56 = vadd.f32 %v2483_v50, %v2286_v30 }
0x126e   : > { %2489 = vadd.xlane.f32.xlu0 %v2488_v55 }
0x126f   : > { %v2491_v57 = vsel %vm592_vm1, %v2487_v56, 0.0 }
0x1270   : > { %2492 = vadd.xlane.f32.xlu1 %v2491_v57 }
0x12fb   : > { %v2490_v58 = vpop.xlane.xlu0 %2489 }
0x12fc   : > { %v2494_v59 = vmul.f32 0.015625, %v2490_v58 }
0x12fd   : > { %v2493_v60 = vpop.xlane.xlu1 %2492 }
0x12fe   : > { %v2496_v61 = vsub.f32 %v2486_v53, %v2494_v59  ;;  %v2495_v62 = vmul.f32 0.015625, %v2493_v60 }
0x1300   : > { %v2497_v63 = vsub.f32 %v2487_v56, %v2495_v62  ;;  %v2498_v51 = vmul.f32 %v2496_v61, %v2496_v61 }
0x1302   : > { %v2500_v38 = vsel %vm592_vm1, %v2498_v51, 0.0  ;;  %v2499_v41 = vmul.f32 %v2497_v63, %v2497_v63 }
0x1303   : > { %2501 = vadd.xlane.f32.xlu0 %v2500_v38 }
0x1304   : > { %v2503_v0 = vsel %vm592_vm1, %v2499_v41, 0.0 }
0x1305   : > { %2504 = vadd.xlane.f32.xlu1 %v2503_v0 }
0x1390   : > { %v2502_v2 = vpop.xlane.xlu0 %2501 }
0x1391   : > { %v2506_v54 = vmul.f32 0.015625, %v2502_v2 }
0x1392   : > { %v2505_v3 = vpop.xlane.xlu1 %2504 }
0x1393   : > { %v2508_v4 = vadd.f32 1e-05, %v2506_v54  ;;  %v2507_v5 = vmul.f32 0.015625, %v2505_v3 }
0x1395   : > { %3253 = vrsqrt.f32 %v2508_v4  ;;  %v2509_v6 = vadd.f32 1e-05, %v2507_v5 }
0x1397   : > { %3255 = vrsqrt.f32 %v2509_v6 }
0x139f   : > { %v3254_v7 = vpop.eup %3253 }
0x13a0   : > { %v2512_v9 = vmul.f32 %v3254_v7, %v2496_v61 }
0x13a1   : > { %v3256_v10 = vpop.eup %3255 }
0x13a2   : > { %v2521_v13 = vmul.f32 %v2791_v8, %v2512_v9  ;;  %v2513_v14 = vmul.f32 %v3256_v10, %v2497_v63 }
0x13a4   : > { %v2530_v15 = vadd.f32 %v2792_v12, %v2521_v13  ;;  %v2522_v16 = vmul.f32 %v2791_v8, %v2513_v14 }
0x13a6   : > { %2532 = vst.msk [vmem:[%s548_s1] sm:$0xff] %vm592_vm1, %v2530_v15  ;;  %v2531_v11 = vadd.f32 %v2792_v12, %v2522_v16 }
0x13a8   : > { %2533 = vst.msk [vmem:[%s548_s1 + $0x8] sm:$0xff] %vm592_vm1, %v2531_v11 }
0x13a9 PF: > { %s27_s24 = sadd.s32 1, %s3265_s24  }
0x13aa   : > { %p24_p4 = scmp.ge.s32.totalorder %s27_s24, 4  }
0x13ac   :  { %26 = sbr.rel (!%p24_p4) target bundleno = 3 (0x3), region = 139 }

// kernel: seq2seq_forward.7
= control target key start
LH: loop header
LB: loop body
LE: loop exit
PB: predicated region body
PF: predicated region fallthrough
CT: control target
= control target key end

     0   :  { %s6955_s0 = inlined_call_operand.vmem [shape: f32[2,16,64], index: 0, kind: input, shape index: {}]   ;;  %s6956_s1 = inlined_call_operand.vmem [shape: f32[2,16,64], index: 1, kind: input, shape index: {}]   ;;  %s6957_s2 = inlined_call_operand.vmem [shape: bf16[4,64,16], index: 2, kind: input, shape index: {}]   ;;  %s6958_s3 = inlined_call_operand.vmem [shape: bf16[4,64,16], index: 3, kind: input, shape index: {}]   ;;  %s6959_s4 = inlined_call_operand.vmem [shape: bf16[4,64,16], index: 4, kind: input, shape index: {}]   ;;  %s6960_s5 = inlined_call_operand.vmem [shape: bf16[4,16,64], index: 5, kind: input, shape index: {}]   ;;  %s6961_s6 = inlined_call_operand.vmem [shape: f32[4,1,16], index: 6, kind: input, shape index: {}]   ;;  %s6962_s7 = inlined_call_operand.vmem [shape: f32[4,1,16], index: 7, kind: input, shape index: {}]   ;;  %s6963_s8 = inlined_call_operand.vmem [shape: f32[4,1,16], index: 8, kind: input, shape index: {}]   ;;  %s6964_s9 = inlined_call_operand.vmem [shape: f32[1,64], index: 9, kind: input, shape index: {}]   ;;  %s6965_s10 = inlined_call_operand.vmem [shape: f32[1,64], index: 10, kind: input, shape index: {}]   ;;  %s6966_s11 = inlined_call_operand.vmem [shape: f32[1,64], index: 11, kind: input, shape index: {}]   ;;  %s6967_s12 = inlined_call_operand.vmem [shape: bf16[4,64,16], index: 12, kind: input, shape index: {}]   ;;  %s6968_s13 = inlined_call_operand.vmem [shape: bf16[4,64,16], index: 13, kind: input, shape index: {}]   ;;  %s6969_s14 = inlined_call_operand.vmem [shape: bf16[4,64,16], index: 14, kind: input, shape index: {}]   ;;  %s6970_s15 = inlined_call_operand.vmem [shape: bf16[4,16,64], index: 15, kind: input, shape index: {}]   ;;  %s6971_s16 = inlined_call_operand.vmem [shape: f32[4,1,16], index: 16, kind: input, shape index: {}]   ;;  %s6972_s17 = inlined_call_operand.vmem [shape: f32[4,1,16], index: 17, kind: input, shape index: {}]   ;;  %s6973_s18 = inlined_call_operand.vmem [shape: f32[4,1,16], index: 18, kind: input, shape index: {}]   ;;  %s6974_s19 = inlined_call_operand.vmem [shape: f32[1,64], index: 19, kind: input, shape index: {}]   ;;  %s6975_s20 = inlined_call_operand.vmem [shape: f32[1,64], index: 20, kind: input, shape index: {}]   ;;  %s6976_s21 = inlined_call_operand.vmem [shape: f32[1,64], index: 21, kind: input, shape index: {}]   ;;  %s6977_s22 = inlined_call_operand.vmem [shape: bf16[64,128], index: 22, kind: input, shape index: {}]   ;;  %s6978_s23 = inlined_call_operand.vmem [shape: f32[1,128], index: 23, kind: input, shape index: {}]   ;;  %s6979_s24 = inlined_call_operand.vmem [shape: bf16[128,64], index: 24, kind: input, shape index: {}]   ;;  %s6980_s25 = inlined_call_operand.vmem [shape: f32[1,64], index: 25, kind: input, shape index: {}]   ;;  %s6981_s26 = inlined_call_operand.vmem [shape: f32[1,64], index: 26, kind: input, shape index: {}]   ;;  %s6982_s27 = inlined_call_operand.vmem [shape: f32[1,64], index: 27, kind: input, shape index: {}]   ;;  %s6983_s28 = inlined_call_operand.vmem [shape: f32[2,16,64], index: 28, kind: output, shape index: {}]  }
   0x1   :  { %6996 = sst [smem:[#allocation3_spill]] %s6955_s0 }
   0x2   :  { %6997 = sst [smem:[#allocation4_spill]] %s6956_s1 }
   0x3   :  { %6998 = sst [smem:[#allocation5_spill]] %s6957_s2 }
   0x4   :  { %6999 = sst [smem:[#allocation6_spill]] %s6958_s3 }
   0x5   :  { %7000 = sst [smem:[#allocation7_spill]] %s6959_s4 }
   0x6   :  { %7001 = sst [smem:[#allocation8_spill]] %s6960_s5 }
   0x7   :  { %7002 = sst [smem:[#allocation9_spill]] %s6961_s6 }
   0x8   :  { %7003 = sst [smem:[#allocation10_spill]] %s6962_s7 }
   0x9   :  { %7004 = sst [smem:[#allocation11_spill]] %s6963_s8  ;;  %s6050_s8 = smov 0  }
   0xa   :  { %7005 = sst [smem:[#allocation12_spill]] %s6964_s9 }
   0xb   :  { %7006 = sst [smem:[#allocation13_spill]] %s6965_s10 }
   0xc   :  { %7007 = sst [smem:[#allocation14_spill]] %s6966_s11 }
   0xd   :  { %7008 = sst [smem:[#allocation15_spill]] %s6967_s12 }
   0xe   :  { %7009 = sst [smem:[#allocation16_spill]] %s6982_s27 }
   0xf   :  { %7010 = sst [smem:[#allocation17_spill]] %s6983_s28 }
  0x10 LB: > { %7011 = sst [smem:[#allocation2_spill]] %s5901_s8  ;;  %s4656_s5 = sadd.s32 4294967295, %s5901_s8   ;;  %s5901_s8 = sphi %s6050_s8, %s38_s8  }
  0x11   : > { %p4660_p0 = scmp.ge.s32.totalorder %s5901_s8, 1  ;;  %p772_p1 = scmp.lt.s32.totalorder %s5901_s8, 3 }
  0x13   : > { %p773_p2 = pnand %p4660_p0, %p772_p1 }
  0x14   : > { %s7012_s3 = sld [smem:[#allocation6_spill]] (!%p773_p2)  ;;  %v5903_v1 = vmov (!%p773_p2), 0.0   ;;  %s7013_s29 = sld [smem:[#allocation5_spill]] (!%p773_p2)  ;;  %vm5904_vm0 = vmmov (!%p773_p2), 0   ;;  %vm911_vm1 = vcmask (!%p773_p2), 523264   ;;  %vm1118_vm2 = vcmask (!%p773_p2), 130048  }
  0x15   : > { %776 = sbr.rel (%p773_p2) target bundleno = 9298 (0x2452), region = 132  ;;  %5239 = vmatprep.subr.bf16.mxu1 (!%p773_p2), %v5903_v1  ;;  %5227 = vmatprep.subr.bf16.mxu0 (!%p773_p2), %v5903_v1  ;;  %p851_p3 = scmp.lt.s32.totalorder (!%p773_p2), %s4656_s5, 1 }
  0x16   : > { %5247 = vmatprep.mubr.msk.bf16.mxu1 (!%p773_p2), %vm5904_vm0, %v5903_v1  ;;  %5235 = vmatprep.mubr.msk.bf16.mxu0 (!%p773_p2), %vm5904_vm0, %v5903_v1  ;;  %s7014_s6 = sld [smem:[#allocation4_spill]] (!%p773_p2)  ;;  %s7015_s30 = sld [smem:[#allocation7_spill]] (!%p773_p2) }
  0x17   : > { %s7016_s9 = sld [smem:[#allocation10_spill]] (!%p773_p2)  ;;  %s7017_s11 = sld [smem:[#allocation9_spill]] (!%p773_p2) }
  0x18   : > { %s7019_s8 = sld [smem:[#allocation8_spill]] (!%p773_p2)  ;;  %s7025_s27 = sld [smem:[#allocation13_spill]] (!%p773_p2) }
  0x19   : > { %s7026_s28 = sld [smem:[#allocation14_spill]] (!%p773_p2) }
  0x1a   : > { %v5701_v0 = vld [vmem:[%s7012_s3] sm:$0xff] (!%p773_p2)   ;;  %v5702_v2 = vld [vmem:[%s7012_s3 + $0x8] sm:$0xff] (!%p773_p2)   ;;  %v5704_v5 = vld [vmem:[%s7012_s3 + $0x10] sm:$0xff] (!%p773_p2)  }
  0x1b   : > { %5240 = vmatpush3.bf16.msra.mxu1 (!%p773_p2), %v5701_v0  ;;  %v5703_v3 = vld [vmem:[%s7013_s29] sm:$0xff] (!%p773_p2)   ;;  %v5705_v4 = vld [vmem:[%s7013_s29 + $0x8] sm:$0xff] (!%p773_p2)   ;;  %v5706_v6 = vld [vmem:[%s7012_s3 + $0x18] sm:$0xff] (!%p773_p2)  }
  0x1c   : > { %5241 = vmatprep.subr.bf16.mxu1 %v5903_v1  ;;  %5228 = vmatpush3.bf16.msra.mxu0 %v5703_v3  ;;  %s7031_s5 = smov (!%p851_p3, %s4656_s5), 1  ;;  %v5707_v7 = vld [vmem:[%s7013_s29 + $0x10] sm:$0xff]   ;;  %v5708_v10 = vld [vmem:[%s7013_s29 + $0x18] sm:$0xff]   ;;  %v5709_v12 = vld [vmem:[%s7015_s30] sm:$0xff]  }
  0x1d   : > { %5229 = vmatprep.subr.bf16.mxu0 %v5903_v1  ;;  %s6081_s4 = sshll.u32 %s7031_s5, 4  ;;  %v5710_v13 = vld [vmem:[%s7015_s30 + $0x8] sm:$0xff]   ;;  %v5711_v14 = vld [vmem:[%s7015_s30 + $0x10] sm:$0xff]   ;;  %v5712_v15 = vld [vmem:[%s7015_s30 + $0x18] sm:$0xff]   ;;  %s7018_s5 = sld [smem:[#allocation11_spill]] }
  0x1e   : > { %s6088_s10 = scalar_lea.vmem %s7014_s6, %s6081_s4  ;;  %v4673_v16 = vld [vmem:[%s7016_s9] ss:$0 sm:$0xff]  ;;  %v5717_v60 = vld [vmem:[%s7013_s29 + $0x28] sm:$0xff]   ;;  %v5719_v61 = vld [vmem:[%s7013_s29 + $0x30] sm:$0xff]   ;;  %s7020_s6 = smov %s7019_s8 }
  0x1f   : > { %5242 = vmatpush3.bf16.msra.mxu1 %v5702_v2  ;;  %v869_v8 = vld [vmem:[%s6088_s10] sm:$0xff]  ;;  %v870_v9 = vld [vmem:[%s6088_s10 + $0x8] sm:$0xff]  ;;  %v5720_v62 = vld [vmem:[%s7013_s29 + $0x38] sm:$0xff]  }
  0x20   : > { %5243 = vmatprep.subr.bf16.mxu1 %v5903_v1  ;;  %5230 = vmatpush3.bf16.msra.mxu0 %v5705_v4  ;;  %v6103_v11 = vpack.c.bf16 %v870_v9, %v869_v8  ;;  %v4667_v18 = vld [vmem:[%s7017_s11] ss:$0 sm:$0xff]  ;;  %v5714_v8 = vld [vmem:[%s7012_s3 + $0x28] sm:$0xff]   ;;  %v5716_v9 = vld [vmem:[%s7012_s3 + $0x30] sm:$0xff]  }
  0x21   : > { %5231 = vmatprep.subr.bf16.mxu0 %v5903_v1  ;;  %v5715_v59 = vld [vmem:[%s7013_s29 + $0x20] sm:$0xff]  }
  0x23   : > { %5244 = vmatpush3.bf16.msra.mxu1 %v5704_v5  ;;  %v4679_v33 = vld [vmem:[%s7018_s5] ss:$0 sm:$0xff] }
  0x24   : > { %5245 = vmatprep.subr.bf16.mxu1 %v5903_v1  ;;  %5232 = vmatpush3.bf16.msra.mxu0 %v5707_v7 }
  0x25   : > { %5233 = vmatprep.subr.bf16.mxu0 %v5903_v1 }
  0x27   : > { %5246 = vmatpush3.bf16.msra.mxu1 %v5706_v6  ;;  %v5713_v6 = vld [vmem:[%s7012_s3 + $0x20] sm:$0xff]  }
  0x28   : > { %5269 = vmatprep.subr.bf16.mxu1 %v5903_v1  ;;  %5234 = vmatpush3.bf16.msra.mxu0 %v5708_v10  ;;  %v5718_v10 = vld [vmem:[%s7012_s3 + $0x38] sm:$0xff]  }
  0x29   : > { %5251 = vmatprep.subr.bf16.mxu0 %v5903_v1 }
  0x2a   : > { %5248 = vmatmul.mubr.msk.bf16.vlgmr.msra.gmra.mrb[0].mxu1 %vm911_vm1, %v6103_v11 }
  0x2b   : > { %5271 = vmatprep.mubr.msk.bf16.mxu1 %vm5904_vm0, %v5903_v1  ;;  %5236 = vmatmul.mubr.msk.bf16.vlgmr.msra.gmra.mrb[0].mxu0 %vm911_vm1, %v6103_v11 }
  0x2c   : > { %5252 = vmatpush3.bf16.msra.mxu0 %v5709_v12  ;;  %5259 = vmatprep.mubr.msk.bf16.mxu0 %vm5904_vm0, %v5903_v1  ;;  %v4696_v12 = vld [vmem:[%s7017_s11 + $0x1] ss:$0 sm:$0xff] }
  0x2d   : > { %5253 = vmatprep.subr.bf16.mxu0 %v5903_v1 }
  0x30   : > { %5254 = vmatpush3.bf16.msra.mxu0 %v5710_v13 }
  0x31   : > { %5255 = vmatprep.subr.bf16.mxu0 %v5903_v1 }
  0x34   : > { %5256 = vmatpush3.bf16.msra.mxu0 %v5711_v14 }
  0x35   : > { %5257 = vmatprep.subr.bf16.mxu0 %v5903_v1 }
  0x38   : > { %5258 = vmatpush3.bf16.msra.mxu0 %v5712_v15 }
  0x39   : > { %5263 = vmatprep.subr.bf16.mxu0 %v5903_v1 }
  0x3b   : > { %5260 = vmatmul.mubr.msk.bf16.vlgmr.msra.gmra.mrb[4].mxu0 %vm911_vm1, %v6103_v11 }
  0x3c   : > { %5265 = vmatprep.mubr.msk.bf16.mxu0 %vm5904_vm0, %v5903_v1 }
  0xfd   : > { %v1029_v17 = vpop.f32.mrb[0].mxu1 }
  0xfe   : > { %v5249_v19 = vpop.f32.mrb[1].mxu1  ;;  %v949_v21 = vpop.f32.mrb[0].mxu0  ;;  %v1030_v22 = vadd.f32 %v4673_v16, %v1029_v17 }
  0xff   : > { %v1032_v20 = vpop.f32.mrb[2].mxu1  ;;  %v950_v25 = vadd.f32 %v4667_v18, %v949_v21  ;;  %v5237_v26 = vpop.f32.mrb[1].mxu0 }
 0x100   : > { %v1033_v23 = vadd.f32 %v4673_v16, %v1032_v20  ;;  %v5250_v24 = vpop.f32.mrb[3].mxu1  ;;  %v952_v27 = vpop.f32.mrb[2].mxu0 }
 0x101   : > { %v953_v29 = vadd.f32 %v4667_v18, %v952_v27  ;;  %v5238_v30 = vpop.f32.mrb[3].mxu0 }
 0x102   : > { %v1117_v28 = vpack.c.bf16 %v1033_v23, %v1030_v22 }
 0x103   : > { %v1116_v31 = vpack.c.bf16 %v953_v29, %v950_v25  ;;  %v4711_v25 = vld [vmem:[%s7016_s9 + $0x1] ss:$0 sm:$0xff] }
 0x104   : > { %v1123_v32 = vsel %vm1118_vm2, %v1117_v28, 0 }
 0x105   : > { %5264 = vmatpush3.bf16.xpose.msra.mxu0 %v1123_v32 }
 0x106   : > { %5275 = vmatprep.subr.bf16.mxu0 %v5903_v1 }
 0x10c   : > { %5266 = vmatmul.mubr.msk.bf16.vlgmr.msra.gmra.mrb[8].mxu0 %vm1118_vm2, %v1116_v31 }
 0x10d   : > { %5283 = vmatprep.mubr.msk.bf16.mxu0 %vm5904_vm0, %v5903_v1  ;;  %5276 = vmatpush3.bf16.msra.mxu0 %v5715_v59  ;;  %v4726_v59 = vld [vmem:[%s7018_s5 + $0x1] ss:$0 sm:$0xff] }
 0x10e   : > { %v1109_v34 = vpop.f32.mrb[4].mxu0  ;;  %5277 = vmatprep.subr.bf16.mxu0 %v5903_v1 }
 0x10f   : > { %v1110_v35 = vadd.f32 %v4679_v33, %v1109_v34  ;;  %v5261_v36 = vpop.f32.mrb[5].mxu0  ;;  %v5721_v34 = vld [vmem:[%s7015_s30 + $0x20] sm:$0xff]  }
 0x110   : > { %v1112_v37 = vpop.f32.mrb[6].mxu0  ;;  %v5723_v36 = vld [vmem:[%s7015_s30 + $0x30] sm:$0xff]  }
 0x111   : > { %v1113_v38 = vadd.f32 %v4679_v33, %v1112_v37  ;;  %v5262_v39 = vpop.f32.mrb[7].mxu0  ;;  %5278 = vmatpush3.bf16.msra.mxu0 %v5717_v60  ;;  %v5724_v37 = vld [vmem:[%s7015_s30 + $0x38] sm:$0xff]  }
 0x112   : > { %5279 = vmatprep.subr.bf16.mxu0 %v5903_v1 }
 0x113   : > { %v1191_v40 = vpack.c.bf16 %v1113_v38, %v1110_v35  ;;  %v5722_v35 = vld [vmem:[%s7015_s30 + $0x28] sm:$0xff]  }
 0x115   : > { %5270 = vmatpush3.bf16.msra.mxu1 %v1191_v40  ;;  %5280 = vmatpush3.bf16.msra.mxu0 %v5719_v61 }
 0x116   : > { %5287 = vmatprep.subr.bf16.mxu1 %v5903_v1  ;;  %5281 = vmatprep.subr.bf16.mxu0 %v5903_v1 }
 0x119   : > { %5282 = vmatpush3.bf16.msra.mxu0 %v5720_v62 }
 0x11a   : > { %5299 = vmatprep.subr.bf16.mxu0 %v5903_v1 }
 0x11c   : > { %5284 = vmatmul.mubr.msk.bf16.vlgmr.msra.gmra.mrb[12].mxu0 %vm911_vm1, %v6103_v11 }
 0x11d   : > { %5307 = vmatprep.mubr.msk.bf16.mxu0 %vm5904_vm0, %v5903_v1  ;;  %5300 = vmatpush3.bf16.msra.mxu0 %v5721_v34 }
 0x11e   : > { %5301 = vmatprep.subr.bf16.mxu0 %v5903_v1 }
 0x121   : > { %5302 = vmatpush3.bf16.msra.mxu0 %v5722_v35 }
 0x122   : > { %5303 = vmatprep.subr.bf16.mxu0 %v5903_v1 }
 0x125   : > { %5304 = vmatpush3.bf16.msra.mxu0 %v5723_v36 }
 0x126   : > { %5305 = vmatprep.subr.bf16.mxu0 %v5903_v1 }
 0x129   : > { %5306 = vmatpush3.bf16.msra.mxu0 %v5724_v37 }
 0x12a   : > { %5323 = vmatprep.subr.bf16.mxu0 %v5903_v1 }
 0x12c   : > { %5308 = vmatmul.mubr.msk.bf16.vlgmr.msra.gmra.mrb[16].mxu0 %vm911_vm1, %v6103_v11 }
 0x12d   : > { %5325 = vmatprep.mubr.msk.bf16.mxu0 %vm5904_vm0, %v5903_v1 }
 0x1df   : > { %v1159_v41 = vpop.f32.mrb[8].mxu0 }
 0x1e0   : > { %v1166_v42 = vmul.f32 0.25, %v1159_v41  ;;  %v5267_v43 = vpop.f32.mrb[9].mxu0 }
 0x1e1   : > { %v1162_v44 = vpop.f32.mrb[10].mxu0 }
 0x1e2   : > { %v1167_v45 = vmul.f32 0.25, %v1162_v44  ;;  %v5268_v46 = vpop.f32.mrb[11].mxu0  ;;  %v1168_v47 = vsel %vm1118_vm2, %v1166_v42, -inf }
 0x1e3   : > { %1169 = vmax.xlane.f32.xlu0 %v1168_v47 }
 0x1e4   : > { %v1171_v48 = vsel %vm1118_vm2, %v1167_v45, -inf }
 0x1e7   : > { %1172 = vmax.xlane.f32.xlu0 %v1171_v48 }
 0x1ef   : > { %v1314_v13 = vpop.f32.mrb[12].mxu0 }
 0x1f0   : > { %v1315_v14 = vadd.f32 %v4696_v12, %v1314_v13  ;;  %v5285_v15 = vpop.f32.mrb[13].mxu0  ;;  %v5729_v13 = vld [vmem:[%s7012_s3 + $0x50] sm:$0xff]  }
 0x1f1   : > { %v1317_v16 = vpop.f32.mrb[14].mxu0 }
 0x1f2   : > { %v1318_v17 = vadd.f32 %v4696_v12, %v1317_v16  ;;  %v5286_v18 = vpop.f32.mrb[15].mxu0  ;;  %v5728_v12 = vld [vmem:[%s7012_s3 + $0x48] sm:$0xff]  }
 0x1f3   : > { %v5730_v18 = vld [vmem:[%s7013_s29 + $0x40] sm:$0xff]  }
 0x1f4   : > { %v1485_v19 = vpack.c.bf16 %v1318_v17, %v1315_v14  ;;  %v5731_v14 = vld [vmem:[%s7012_s3 + $0x58] sm:$0xff]  }
 0x270   : > { %v1170_v49 = vpop.xlane.xlu0 %1169 }
 0x271   : > { %v1174_v50 = vsub.f32 %v1166_v42, %v1170_v49 }
 0x273   : > { %v1176_v51 = vmul.f32 1.442695, %v1174_v50 }
 0x274   : > { %v1173_v52 = vpop.xlane.xlu0 %1172 }
 0x275   : > { %5817 = vpow2.f32 %v1176_v51  ;;  %v1175_v53 = vsub.f32 %v1167_v45, %v1173_v52 }
 0x277   : > { %v1178_v54 = vmul.f32 1.442695, %v1175_v53 }
 0x279   : > { %5819 = vpow2.f32 %v1178_v54 }
 0x27f   : > { %v5818_v55 = vpop.eup %5817 }
 0x280   : > { %v1180_v56 = vsel %vm1118_vm2, %v5818_v55, 0.0 }
 0x281   : > { %1181 = vadd.xlane.f32.xlu1 %v1180_v56  ;;  %v1478_v56 = vpop.f32.mrb[16].mxu0 }
 0x282   : > { %v1479_v61 = vadd.f32 %v4726_v59, %v1478_v56 }
 0x283   : > { %v5820_v57 = vpop.eup %5819 }
 0x284   : > { %v1183_v58 = vsel %vm1118_vm2, %v5820_v57, 0.0 }
 0x285   : > { %1184 = vadd.xlane.f32.xlu1 %v1183_v58 }
 0x30e   : > { %v1182_v63 = vpop.xlane.xlu1 %1181 }
 0x30f   : > { %5821 = vrcp.f32 %v1182_v63 }
 0x312   : > { %v1185_v0 = vpop.xlane.xlu1 %1184 }
 0x313   : > { %5823 = vrcp.f32 %v1185_v0  ;;  %v5727_v0 = vld [vmem:[%s7019_s8 + $0x8] sm:$0xff]   ;;  %s7021_s8 = sld [smem:[#allocation12_spill]] }
 0x314   : > { %5324 = vmatpush3.bf16.msra.mxu0 %v5727_v0 }
 0x315   : > { %5335 = vmatprep.subr.bf16.mxu0 %v5903_v1 }
 0x319   : > { %v5822_v2 = vpop.eup %5821 }
 0x31a   : > { %v1188_v4 = vmul.f32 %v5822_v2, %v5818_v55 }
 0x31d   : > { %v5824_v3 = vpop.eup %5823 }
 0x31e   : > { %v1189_v5 = vmul.f32 %v5824_v3, %v5820_v57  ;;  %v5309_v57 = vpop.f32.mrb[17].mxu0 }
 0x31f   : > { %v1481_v58 = vpop.f32.mrb[18].mxu0 }
 0x320   : > { %v1190_v7 = vpack.c.bf16 %v1189_v5, %v1188_v4  ;;  %v5310_v60 = vpop.f32.mrb[19].mxu0  ;;  %v1482_v62 = vadd.f32 %v4726_v59, %v1481_v58 }
 0x322   : > { %5272 = vmatmul.mubr.msk.bf16.vlgmr.msra.gmra.mrb[4].mxu1 %vm1118_vm2, %v1190_v7  ;;  %v1559_v63 = vpack.c.bf16 %v1482_v62, %v1479_v61 }
 0x323   : > { %5288 = vmatpush3.bf16.msra.mxu1 %v5713_v6  ;;  %5295 = vmatprep.mubr.msk.bf16.mxu1 %vm5904_vm0, %v5903_v1 }
 0x324   : > { %5289 = vmatprep.subr.bf16.mxu1 %v5903_v1 }
 0x327   : > { %5290 = vmatpush3.bf16.msra.mxu1 %v5714_v8  ;;  %v5725_v8 = vld [vmem:[%s7020_s6] sm:$0xff]  }
 0x328   : > { %5291 = vmatprep.subr.bf16.mxu1 %v5903_v1 }
 0x32b   : > { %5292 = vmatpush3.bf16.msra.mxu1 %v5716_v9 }
 0x32c   : > { %5293 = vmatprep.subr.bf16.mxu1 %v5903_v1 }
 0x32f   : > { %5294 = vmatpush3.bf16.msra.mxu1 %v5718_v10  ;;  %v5726_v10 = vld [vmem:[%s7012_s3 + $0x40] sm:$0xff]  }
 0x330   : > { %5311 = vmatprep.subr.bf16.mxu1 %v5903_v1 }
 0x332   : > { %5296 = vmatmul.mubr.msk.bf16.vlgmr.msra.gmra.mrb[8].mxu1 %vm911_vm1, %v6103_v11 }
 0x333   : > { %5313 = vmatprep.mubr.msk.bf16.mxu1 %vm5904_vm0, %v5903_v1 }
 0x3f5   : > { %v6201_v20 = vpop.f32.mrb[4].mxu1 }
 0x3f6   : > { %v5273_v21 = vpop.f32.mrb[5].mxu1 }
 0x3f7   : > { %v6203_v22 = vpop.f32.mrb[6].mxu1  ;;  %v5732_v21 = vld [vmem:[%s7013_s29 + $0x48] sm:$0xff]  }
 0x3f8   : > { %v1238_v23 = vpack.c.bf16 %v6203_v22, %v6201_v20  ;;  %v5274_v24 = vpop.f32.mrb[7].mxu1 }
 0x405   : > { %v1396_v26 = vpop.f32.mrb[8].mxu1 }
 0x406   : > { %v5297_v27 = vpop.f32.mrb[9].mxu1  ;;  %v1397_v29 = vadd.f32 %v4711_v25, %v1396_v26 }
 0x407   : > { %v1399_v28 = vpop.f32.mrb[10].mxu1  ;;  %v5734_v27 = vld [vmem:[%s7013_s29 + $0x58] sm:$0xff]  }
 0x408   : > { %v1400_v30 = vadd.f32 %v4711_v25, %v1399_v28  ;;  %v5298_v31 = vpop.f32.mrb[11].mxu1  ;;  %v5733_v25 = vld [vmem:[%s7013_s29 + $0x50] sm:$0xff]   ;;  %v4764_v28 = vld [vmem:[%s7016_s9 + $0x2] ss:$0 sm:$0xff] }
 0x40a   : > { %v1486_v32 = vpack.c.bf16 %v1400_v30, %v1397_v29 }
 0x40c   : > { %v1491_v33 = vsel %vm1118_vm2, %v1486_v32, 0 }
 0x40d   : > { %5312 = vmatpush3.bf16.xpose.msra.mxu1 %v1491_v33 }
 0x40e   : > { %5317 = vmatprep.subr.bf16.mxu1 %v5903_v1 }
 0x414   : > { %5314 = vmatmul.mubr.msk.bf16.vlgmr.msra.gmra.mrb[12].mxu1 %vm1118_vm2, %v1485_v19 }
 0x415   : > { %5319 = vmatprep.mubr.msk.bf16.mxu1 %vm5904_vm0, %v5903_v1  ;;  %5318 = vmatpush3.bf16.msra.mxu1 %v1559_v63 }
 0x416   : > { %5329 = vmatprep.subr.bf16.mxu1 %v5903_v1 }
 0x4e7   : > { %v1527_v38 = vpop.f32.mrb[12].mxu1 }
 0x4e8   : > { %v1534_v39 = vmul.f32 0.25, %v1527_v38  ;;  %v5315_v40 = vpop.f32.mrb[13].mxu1 }
 0x4e9   : > { %v1530_v41 = vpop.f32.mrb[14].mxu1 }
 0x4ea   : > { %v1535_v42 = vmul.f32 0.25, %v1530_v41  ;;  %v5316_v43 = vpop.f32.mrb[15].mxu1  ;;  %v1536_v44 = vsel %vm1118_vm2, %v1534_v39, -inf }
 0x4eb   : > { %1537 = vmax.xlane.f32.xlu0 %v1536_v44  ;;  %v4749_v43 = vld [vmem:[%s7017_s11 + $0x2] ss:$0 sm:$0xff] }
 0x4ec   : > { %v1539_v45 = vsel %vm1118_vm2, %v1535_v42, -inf }
 0x4ed   : > { %1540 = vmax.xlane.f32.xlu1 %v1539_v45 }
 0x578   : > { %v1538_v46 = vpop.xlane.xlu0 %1537 }
 0x579   : > { %v1542_v47 = vsub.f32 %v1534_v39, %v1538_v46 }
 0x57a   : > { %v1541_v48 = vpop.xlane.xlu1 %1540 }
 0x57b   : > { %v1544_v49 = vmul.f32 1.442695, %v1542_v47  ;;  %v1543_v50 = vsub.f32 %v1535_v42, %v1541_v48 }
 0x57d   : > { %5825 = vpow2.f32 %v1544_v49  ;;  %v1546_v51 = vmul.f32 1.442695, %v1543_v50 }
 0x57f   : > { %5827 = vpow2.f32 %v1546_v51  ;;  %v5735_v51 = vld [vmem:[%s7015_s30 + $0x40] sm:$0xff]  }
 0x587   : > { %v5826_v52 = vpop.eup %5825 }
 0x588   : > { %v1548_v53 = vsel %vm1118_vm2, %v5826_v52, 0.0 }
 0x589   : > { %v5828_v54 = vpop.eup %5827  ;;  %1549 = vadd.xlane.f32.xlu0 %v1548_v53  ;;  %v5737_v53 = vld [vmem:[%s7015_s30 + $0x50] sm:$0xff]  }
 0x58a   : > { %v1551_v55 = vsel %vm1118_vm2, %v5828_v54, 0.0 }
 0x58b   : > { %1552 = vadd.xlane.f32.xlu1 %v1551_v55 }
 0x616   : > { %v1550_v2 = vpop.xlane.xlu0 %1549 }
 0x617   : > { %5829 = vrcp.f32 %v1550_v2 }
 0x618   : > { %v1553_v3 = vpop.xlane.xlu1 %1552 }
 0x619   : > { %5831 = vrcp.f32 %v1553_v3 }
 0x621   : > { %v5830_v4 = vpop.eup %5829 }
 0x622   : > { %v1556_v6 = vmul.f32 %v5830_v4, %v5826_v52  ;;  %v5736_v52 = vld [vmem:[%s7015_s30 + $0x48] sm:$0xff]  }
 0x623   : > { %v5832_v5 = vpop.eup %5831 }
 0x624   : > { %v1557_v7 = vmul.f32 %v5832_v5, %v5828_v54  ;;  %v5738_v54 = vld [vmem:[%s7015_s30 + $0x58] sm:$0xff]  }
 0x626   : > { %v1558_v9 = vpack.c.bf16 %v1557_v7, %v1556_v6 }
 0x628   : > { %5320 = vmatmul.mubr.msk.bf16.vlgmr.msra.gmra.mrb[16].mxu1 %vm1118_vm2, %v1558_v9 }
 0x629   : > { %5330 = vmatpush3.bf16.msra.mxu1 %v5725_v8  ;;  %5331 = vmatprep.mubr.msk.bf16.mxu1 %vm5904_vm0, %v5903_v1 }
 0x62a   : > { %5347 = vmatprep.subr.bf16.mxu1 %v5903_v1 }
 0x630   : > { %5332 = vmatmul.mubr.msk.bf16.vlgmr.msra.gmra.mrb[20].mxu1 %vm1118_vm2, %v1238_v23 }
 0x631   : > { %5348 = vmatpush3.bf16.msra.mxu1 %v5726_v10  ;;  %5355 = vmatprep.mubr.msk.bf16.mxu1 %vm5904_vm0, %v5903_v1 }
 0x632   : > { %5349 = vmatprep.subr.bf16.mxu1 %v5903_v1 }
 0x635   : > { %5350 = vmatpush3.bf16.msra.mxu1 %v5728_v12 }
 0x636   : > { %5351 = vmatprep.subr.bf16.mxu1 %v5903_v1 }
 0x639   : > { %5352 = vmatpush3.bf16.msra.mxu1 %v5729_v13 }
 0x63a   : > { %5353 = vmatprep.subr.bf16.mxu1 %v5903_v1 }
 0x63d   : > { %5354 = vmatpush3.bf16.msra.mxu1 %v5731_v14  ;;  %v4779_v14 = vld [vmem:[%s7018_s5 + $0x2] ss:$0 sm:$0xff] }
 0x63e   : > { %5371 = vmatprep.subr.bf16.mxu1 %v5903_v1 }
 0x640   : > { %5356 = vmatmul.mubr.msk.bf16.vlgmr.msra.gmra.mrb[24].mxu1 %vm911_vm1, %v6103_v11 }
 0x641   : > { %5373 = vmatprep.mubr.msk.bf16.mxu1 %vm5904_vm0, %v5903_v1 }
 0x6fb   : > { %v1597_v15 = vpop.f32.mrb[16].mxu1 }
 0x6fc   : > { %v5321_v16 = vpop.f32.mrb[17].mxu1 }
 0x6fd   : > { %v1600_v17 = vpop.f32.mrb[18].mxu1 }
 0x6fe   : > { %v1607_v19 = vpack.c.bf16 %v1600_v17, %v1597_v15  ;;  %v5322_v20 = vpop.f32.mrb[19].mxu1 }
 0x700   : > { %5326 = vmatmul.mubr.msk.bf16.vlgmr.msra.gmra.mrb[20].mxu0 %vm1118_vm2, %v1607_v19  ;;  %v5739_v19 = vld [vmem:[%s7020_s6 + $0x10] sm:$0xff]  }
 0x701   : > { %5336 = vmatpush3.bf16.msra.mxu0 %v5730_v18  ;;  %5343 = vmatprep.mubr.msk.bf16.mxu0 %vm5904_vm0, %v5903_v1 }
 0x702   : > { %5337 = vmatprep.subr.bf16.mxu0 %v5903_v1 }
 0x703   : > { %v1701_v22 = vpop.f32.mrb[20].mxu1 }
 0x704   : > { %v5333_v23 = vpop.f32.mrb[21].mxu1 }
 0x705   : > { %5338 = vmatpush3.bf16.msra.mxu0 %v5732_v21  ;;  %v1704_v24 = vpop.f32.mrb[22].mxu1 }
 0x706   : > { %v5334_v26 = vpop.f32.mrb[23].mxu1  ;;  %5339 = vmatprep.subr.bf16.mxu0 %v5903_v1 }
 0x709   : > { %5340 = vmatpush3.bf16.msra.mxu0 %v5733_v25 }
 0x70a   : > { %5341 = vmatprep.subr.bf16.mxu0 %v5903_v1 }
 0x70d   : > { %5342 = vmatpush3.bf16.msra.mxu0 %v5734_v27  ;;  %v5742_v27 = vld [vmem:[%s7013_s29 + $0x60] sm:$0xff]  }
 0x70e   : > { %5359 = vmatprep.subr.bf16.mxu0 %v5903_v1 }
 0x710   : > { %5344 = vmatmul.mubr.msk.bf16.vlgmr.msra.gmra.mrb[24].mxu0 %vm911_vm1, %v6103_v11 }
 0x711   : > { %5367 = vmatprep.mubr.msk.bf16.mxu0 %vm5904_vm0, %v5903_v1  ;;  %5360 = vmatpush3.bf16.msra.mxu0 %v5735_v51 }
 0x712   : > { %5361 = vmatprep.subr.bf16.mxu0 %v5903_v1 }
 0x713   : > { %v1865_v29 = vpop.f32.mrb[24].mxu1 }
 0x714   : > { %v1866_v30 = vadd.f32 %v4764_v28, %v1865_v29  ;;  %v5357_v31 = vpop.f32.mrb[25].mxu1  ;;  %v5746_v29 = vld [vmem:[%s7013_s29 + $0x70] sm:$0xff]  }
 0x715   : > { %v1868_v32 = vpop.f32.mrb[26].mxu1  ;;  %5362 = vmatpush3.bf16.msra.mxu0 %v5736_v52 }
 0x716   : > { %v1869_v33 = vadd.f32 %v4764_v28, %v1868_v32  ;;  %v5358_v34 = vpop.f32.mrb[27].mxu1  ;;  %5363 = vmatprep.subr.bf16.mxu0 %v5903_v1  ;;  %v5744_v28 = vld [vmem:[%s7013_s29 + $0x68] sm:$0xff]  }
 0x717   : > { %v5740_v34 = vld [vmem:[%s7012_s3 + $0x60] sm:$0xff]  }
 0x718   : > { %v1955_v35 = vpack.c.bf16 %v1869_v33, %v1866_v30  ;;  %v5747_v30 = vld [vmem:[%s7013_s29 + $0x78] sm:$0xff]  }
 0x719   : > { %5364 = vmatpush3.bf16.msra.mxu0 %v5737_v53 }
 0x71a   : > { %v1960_v36 = vsel %vm1118_vm2, %v1955_v35, 0  ;;  %5365 = vmatprep.subr.bf16.mxu0 %v5903_v1 }
 0x71b   : > { %5372 = vmatpush3.bf16.xpose.msra.mxu1 %v1960_v36 }
 0x71c   : > { %5377 = vmatprep.subr.bf16.mxu1 %v5903_v1 }
 0x71d   : > { %5366 = vmatpush3.bf16.msra.mxu0 %v5738_v54 }
 0x71e   : > { %5383 = vmatprep.subr.bf16.mxu0 %v5903_v1 }
 0x720   : > { %5368 = vmatmul.mubr.msk.bf16.vlgmr.msra.gmra.mrb[28].mxu0 %vm911_vm1, %v6103_v11 }
 0x721   : > { %5385 = vmatprep.mubr.msk.bf16.mxu0 %vm5904_vm0, %v5903_v1  ;;  %5384 = vmatpush3.bf16.msra.mxu0 %v5739_v19 }
 0x722   : > { %5401 = vmatprep.subr.bf16.mxu0 %v5903_v1 }
 0x7d3   : > { %v1651_v37 = vpop.f32.mrb[20].mxu0 }
 0x7d4   : > { %v6308_v38 = vadd.f32 %v1701_v22, %v1651_v37  ;;  %v5327_v39 = vpop.f32.mrb[21].mxu0  ;;  %v5741_v37 = vld [vmem:[%s7012_s3 + $0x68] sm:$0xff]  }
 0x7d5   : > { %v1654_v40 = vpop.f32.mrb[22].mxu0  ;;  %v5743_v39 = vld [vmem:[%s7012_s3 + $0x70] sm:$0xff]  }
 0x7d6   : > { %v6310_v41 = vadd.f32 %v1704_v24, %v1654_v40  ;;  %v5328_v42 = vpop.f32.mrb[23].mxu0  ;;  %v5745_v40 = vld [vmem:[%s7012_s3 + $0x78] sm:$0xff]  }
 0x7d7   : > { %v4800_v42 = vld [vmem:[%s7017_s11 + $0x3] ss:$0 sm:$0xff] }
 0x7e3   : > { %v1783_v44 = vpop.f32.mrb[24].mxu0 }
 0x7e4   : > { %v5345_v45 = vpop.f32.mrb[25].mxu0  ;;  %v1784_v47 = vadd.f32 %v4749_v43, %v1783_v44 }
 0x7e5   : > { %v1786_v46 = vpop.f32.mrb[26].mxu0 }
 0x7e6   : > { %v1787_v48 = vadd.f32 %v4749_v43, %v1786_v46  ;;  %v5346_v49 = vpop.f32.mrb[27].mxu0 }
 0x7e8   : > { %v1954_v50 = vpack.c.bf16 %v1787_v48, %v1784_v47 }
 0x7ea   : > { %5374 = vmatmul.mubr.msk.bf16.vlgmr.msra.gmra.mrb[28].mxu1 %vm1118_vm2, %v1954_v50 }
 0x7eb   : > { %5379 = vmatprep.mubr.msk.bf16.mxu1 %vm5904_vm0, %v5903_v1 }
 0x7f3   : > { %v1947_v10 = vpop.f32.mrb[28].mxu0 }
 0x7f4   : > { %v5369_v12 = vpop.f32.mrb[29].mxu0  ;;  %v1948_v16 = vadd.f32 %v4779_v14, %v1947_v10 }
 0x7f5   : > { %v1950_v13 = vpop.f32.mrb[30].mxu0 }
 0x7f6   : > { %v5370_v15 = vpop.f32.mrb[31].mxu0  ;;  %v1951_v17 = vadd.f32 %v4779_v14, %v1950_v13 }
 0x7f8   : > { %v2028_v18 = vpack.c.bf16 %v1951_v17, %v1948_v16 }
 0x7fa   : > { %5378 = vmatpush3.bf16.msra.mxu1 %v2028_v18 }
 0x7fb   : > { %5389 = vmatprep.subr.bf16.mxu1 %v5903_v1 }
 0x8bd   : > { %v1996_v55 = vpop.f32.mrb[28].mxu1 }
 0x8be   : > { %v2003_v56 = vmul.f32 0.25, %v1996_v55  ;;  %v5375_v57 = vpop.f32.mrb[29].mxu1 }
 0x8bf   : > { %v1999_v58 = vpop.f32.mrb[30].mxu1 }
 0x8c0   : > { %v2004_v59 = vmul.f32 0.25, %v1999_v58  ;;  %v5376_v60 = vpop.f32.mrb[31].mxu1  ;;  %v2005_v61 = vsel %vm1118_vm2, %v2003_v56, -inf }
 0x8c1   : > { %2006 = vmax.xlane.f32.xlu0 %v2005_v61 }
 0x8c2   : > { %v2008_v62 = vsel %vm1118_vm2, %v2004_v59, -inf }
 0x8c3   : > { %2009 = vmax.xlane.f32.xlu1 %v2008_v62 }
 0x94e   : > { %v2007_v63 = vpop.xlane.xlu0 %2006 }
 0x94f   : > { %v2011_v0 = vsub.f32 %v2003_v56, %v2007_v63  ;;  %v4815_v56 = vld [vmem:[%s7016_s9 + $0x3] ss:$0 sm:$0xff] }
 0x950   : > { %v2010_v2 = vpop.xlane.xlu1 %2009 }
 0x951   : > { %v2013_v3 = vmul.f32 1.442695, %v2011_v0  ;;  %v2012_v4 = vsub.f32 %v2004_v59, %v2010_v2  ;;  %v5749_v0 = vld [vmem:[%s7015_s30 + $0x68] sm:$0xff]   ;;  %v5750_v2 = vld [vmem:[%s7015_s30 + $0x70] sm:$0xff]  }
 0x953   : > { %5833 = vpow2.f32 %v2013_v3  ;;  %v2015_v5 = vmul.f32 1.442695, %v2012_v4  ;;  %v5751_v3 = vld [vmem:[%s7015_s30 + $0x78] sm:$0xff]  }
 0x955   : > { %5835 = vpow2.f32 %v2015_v5 }
 0x95d   : > { %v5834_v6 = vpop.eup %5833 }
 0x95e   : > { %v2017_v7 = vsel %vm1118_vm2, %v5834_v6, 0.0 }
 0x95f   : > { %v5836_v8 = vpop.eup %5835  ;;  %2018 = vadd.xlane.f32.xlu0 %v2017_v7 }
 0x960   : > { %v2020_v9 = vsel %vm1118_vm2, %v5836_v8, 0.0 }
 0x961   : > { %2021 = vadd.xlane.f32.xlu1 %v2020_v9 }
 0x9ec   : > { %v2019_v20 = vpop.xlane.xlu0 %2018 }
 0x9ed   : > { %5837 = vrcp.f32 %v2019_v20 }
 0x9ee   : > { %v2022_v21 = vpop.xlane.xlu1 %2021 }
 0x9ef   : > { %5839 = vrcp.f32 %v2022_v21 }
 0x9f7   : > { %v5838_v22 = vpop.eup %5837 }
 0x9f8   : > { %v2025_v24 = vmul.f32 %v5838_v22, %v5834_v6 }
 0x9f9   : > { %v5840_v23 = vpop.eup %5839 }
 0x9fa   : > { %v2026_v25 = vmul.f32 %v5840_v23, %v5836_v8 }
 0x9fc   : > { %v2027_v26 = vpack.c.bf16 %v2026_v25, %v2025_v24  ;;  %v4830_v25 = vld [vmem:[%s7018_s5 + $0x3] ss:$0 sm:$0xff]  ;;  %s7024_s5 = sld [smem:[#allocation3_spill]] }
 0x9fe   : > { %5380 = vmatmul.mubr.msk.bf16.vlgmr.msra.gmra.mrb[32].mxu1 %vm1118_vm2, %v2027_v26 }
 0x9ff   : > { %5397 = vmatprep.mubr.msk.bf16.mxu1 %vm5904_vm0, %v5903_v1  ;;  %5390 = vmatpush3.bf16.msra.mxu1 %v5742_v27 }
 0xa00   : > { %5391 = vmatprep.subr.bf16.mxu1 %v5903_v1 }
 0xa03   : > { %5392 = vmatpush3.bf16.msra.mxu1 %v5744_v28 }
 0xa04   : > { %5393 = vmatprep.subr.bf16.mxu1 %v5903_v1 }
 0xa07   : > { %5394 = vmatpush3.bf16.msra.mxu1 %v5746_v29 }
 0xa08   : > { %5395 = vmatprep.subr.bf16.mxu1 %v5903_v1 }
 0xa0b   : > { %5396 = vmatpush3.bf16.msra.mxu1 %v5747_v30  ;;  %v5752_v30 = vld [vmem:[%s7020_s6 + $0x18] sm:$0xff]   ;;  %s855_s6 = scalar_lea.vmem %s7024_s5, %s6081_s4 }
 0xa0c   : > { %5413 = vmatprep.subr.bf16.mxu1 %v5903_v1 }
 0xa0e   : > { %5398 = vmatmul.mubr.msk.bf16.vlgmr.msra.gmra.mrb[36].mxu1 %vm911_vm1, %v6103_v11 }
 0xa0f   : > { %5421 = vmatprep.mubr.msk.bf16.mxu1 %vm5904_vm0, %v5903_v1 }
 0xad1   : > { %v2066_v31 = vpop.f32.mrb[32].mxu1 }
 0xad2   : > { %v5381_v32 = vpop.f32.mrb[33].mxu1 }
 0xad3   : > { %v2069_v33 = vpop.f32.mrb[34].mxu1 }
 0xad4   : > { %v2076_v35 = vpack.c.bf16 %v2069_v33, %v2066_v31  ;;  %v5382_v36 = vpop.f32.mrb[35].mxu1 }
 0xad6   : > { %5386 = vmatmul.mubr.msk.bf16.vlgmr.msra.gmra.mrb[32].mxu0 %vm1118_vm2, %v2076_v35 }
 0xad7   : > { %5402 = vmatpush3.bf16.msra.mxu0 %v5740_v34  ;;  %5409 = vmatprep.mubr.msk.bf16.mxu0 %vm5904_vm0, %v5903_v1 }
 0xad8   : > { %5403 = vmatprep.subr.bf16.mxu0 %v5903_v1 }
 0xadb   : > { %5404 = vmatpush3.bf16.msra.mxu0 %v5741_v37 }
 0xadc   : > { %5405 = vmatprep.subr.bf16.mxu0 %v5903_v1 }
 0xadf   : > { %5406 = vmatpush3.bf16.msra.mxu0 %v5743_v39 }
 0xae0   : > { %5407 = vmatprep.subr.bf16.mxu0 %v5903_v1 }
 0xae1   : > { %v2204_v43 = vpop.f32.mrb[36].mxu1 }
 0xae2   : > { %v2205_v44 = vadd.f32 %v4800_v42, %v2204_v43  ;;  %v5399_v45 = vpop.f32.mrb[37].mxu1 }
 0xae3   : > { %5408 = vmatpush3.bf16.msra.mxu0 %v5745_v40  ;;  %v2207_v46 = vpop.f32.mrb[38].mxu1 }
 0xae4   : > { %5425 = vmatprep.subr.bf16.mxu0 %v5903_v1  ;;  %v2208_v47 = vadd.f32 %v4800_v42, %v2207_v46  ;;  %v5400_v48 = vpop.f32.mrb[39].mxu1  ;;  %v4842_v46 = vld [vmem:[%s7021_s8] ss:$0 sm:$0xff]  ;;  %s7022_s8 = sld [smem:[#allocation15_spill]] }
 0xae6   : > { %5410 = vmatmul.mubr.msk.bf16.vlgmr.msra.gmra.mrb[36].mxu0 %vm911_vm1, %v6103_v11  ;;  %v2375_v49 = vpack.c.bf16 %v2208_v47, %v2205_v44 }
 0xae7   : > { %5427 = vmatprep.mubr.msk.bf16.mxu0 %vm5904_vm0, %v5903_v1 }
 0xaea   : > { %s7023_s0 = smov %s7022_s8 }
 0xba9   : > { %v2120_v50 = vpop.f32.mrb[32].mxu0 }
 0xbaa   : > { %v6400_v51 = vadd.f32 %v2120_v50, %v6308_v38  ;;  %v5387_v52 = vpop.f32.mrb[33].mxu0 }
 0xbab   : > { %v2123_v53 = vpop.f32.mrb[34].mxu0 }
 0xbac   : > { %v6403_v54 = vadd.f32 %v2123_v53, %v6310_v41  ;;  %v5388_v55 = vpop.f32.mrb[35].mxu0  ;;  %v5748_v41 = vld [vmem:[%s7015_s30 + $0x60] sm:$0xff]  }
 0xbad   : > { %5414 = vmatpush3.bf16.msra.mxu1 %v5748_v41 }
 0xbae   : > { %5415 = vmatprep.subr.bf16.mxu1 %v5903_v1 }
 0xbb1   : > { %5416 = vmatpush3.bf16.msra.mxu1 %v5749_v0 }
 0xbb2   : > { %5417 = vmatprep.subr.bf16.mxu1 %v5903_v1 }
 0xbb5   : > { %5418 = vmatpush3.bf16.msra.mxu1 %v5750_v2 }
 0xbb6   : > { %5419 = vmatprep.subr.bf16.mxu1 %v5903_v1 }
 0xbb9   : > { %v2286_v57 = vpop.f32.mrb[36].mxu0  ;;  %5420 = vmatpush3.bf16.msra.mxu1 %v5751_v3 }
 0xbba   : > { %v5411_v58 = vpop.f32.mrb[37].mxu0  ;;  %v2287_v60 = vadd.f32 %v4815_v56, %v2286_v57  ;;  %5437 = vmatprep.subr.bf16.mxu1 %v5903_v1 }
 0xbbb   : > { %v2289_v59 = vpop.f32.mrb[38].mxu0 }
 0xbbc   : > { %v2290_v61 = vadd.f32 %v4815_v56, %v2289_v59  ;;  %v5412_v62 = vpop.f32.mrb[39].mxu0  ;;  %5422 = vmatmul.mubr.msk.bf16.vlgmr.msra.gmra.mrb[40].mxu1 %vm911_vm1, %v6103_v11  ;;  %v5893_v56 = vld [vmem:[%s6088_s10] sm:$0xff]  ;;  %v5894_v59 = vld [vmem:[%s6088_s10 + $0x8] sm:$0xff] }
 0xbbd   : > { %5439 = vmatprep.mubr.msk.bf16.mxu1 %vm5904_vm0, %v5903_v1  ;;  %5438 = vmatpush3.bf16.msra.mxu1 %v5752_v30 }
 0xbbe   : > { %v2376_v63 = vpack.c.bf16 %v2290_v61, %v2287_v60  ;;  %5455 = vmatprep.subr.bf16.mxu1 %v5903_v1 }
 0xbc0   : > { %v2381_v38 = vsel %vm1118_vm2, %v2376_v63, 0 }
 0xbc1   : > { %5426 = vmatpush3.bf16.xpose.msra.mxu0 %v2381_v38 }
 0xbc2   : > { %5431 = vmatprep.subr.bf16.mxu0 %v5903_v1 }
 0xbc8   : > { %5428 = vmatmul.mubr.msk.bf16.vlgmr.msra.gmra.mrb[40].mxu0 %vm1118_vm2, %v2375_v49 }
 0xbc9   : > { %5433 = vmatprep.mubr.msk.bf16.mxu0 %vm5904_vm0, %v5903_v1 }
 0xc8f   : > { %v2368_v22 = vpop.f32.mrb[40].mxu1 }
 0xc90   : > { %v5423_v23 = vpop.f32.mrb[41].mxu1  ;;  %v2369_v27 = vadd.f32 %v4830_v25, %v2368_v22 }
 0xc91   : > { %v2371_v24 = vpop.f32.mrb[42].mxu1  ;;  %v4843_v23 = vld [vmem:[%s7025_s27] ss:$0 sm:$0xff]  ;;  %s7027_s27 = sld [smem:[#allocation16_spill]] }
 0xc92   : > { %v5424_v26 = vpop.f32.mrb[43].mxu1  ;;  %v2372_v28 = vadd.f32 %v4830_v25, %v2371_v24 }
 0xc94   : > { %v2449_v29 = vpack.c.bf16 %v2372_v28, %v2369_v27  ;;  %v4844_v28 = vld [vmem:[%s7026_s28] ss:$0 sm:$0xff]  ;;  %s7028_s28 = sld [smem:[#allocation17_spill]] }
 0xc96   : > { %5432 = vmatpush3.bf16.msra.mxu0 %v2449_v29 }
 0xc97   : > { %5443 = vmatprep.subr.bf16.mxu0 %v5903_v1 }
 0xc9a   : > { %s865_s7 = scalar_lea.vmem %s7028_s28, %s6081_s4 }
 0xc9b   : > { %v2417_v4 = vpop.f32.mrb[40].mxu0 }
 0xc9c   : > { %v2424_v5 = vmul.f32 0.25, %v2417_v4  ;;  %v5429_v6 = vpop.f32.mrb[41].mxu0 }
 0xc9d   : > { %v2420_v7 = vpop.f32.mrb[42].mxu0  ;;  %v5754_v6 = vld [vmem:[%s6968_s13 + $0x8] sm:$0xff]  }
 0xc9e   : > { %v2425_v8 = vmul.f32 0.25, %v2420_v7  ;;  %v5430_v9 = vpop.f32.mrb[43].mxu0  ;;  %v2426_v10 = vsel %vm1118_vm2, %v2424_v5, -inf  ;;  %v5755_v7 = vld [vmem:[%s6968_s13 + $0x10] sm:$0xff]  }
 0xc9f   : > { %2427 = vmax.xlane.f32.xlu0 %v2426_v10  ;;  %v5757_v9 = vld [vmem:[%s6968_s13 + $0x18] sm:$0xff]   ;;  %v5758_v10 = vld [vmem:[%s7023_s0 + $0x8] sm:$0xff]  }
 0xca0   : > { %v2429_v12 = vsel %vm1118_vm2, %v2425_v8, -inf }
 0xca1   : > { %2430 = vmax.xlane.f32.xlu1 %v2429_v12  ;;  %v867_v12 = vld [vmem:[%s855_s6] sm:$0xff] }
 0xd2c   : > { %v2428_v13 = vpop.xlane.xlu0 %2427 }
 0xd2d   : > { %v2432_v14 = vsub.f32 %v2424_v5, %v2428_v13  ;;  %v868_v13 = vld [vmem:[%s855_s6 + $0x8] sm:$0xff] }
 0xd2e   : > { %v2431_v15 = vpop.xlane.xlu1 %2430 }
 0xd2f   : > { %v2434_v16 = vmul.f32 1.442695, %v2432_v14  ;;  %v2433_v11 = vsub.f32 %v2425_v8, %v2431_v15  ;;  %v5756_v8 = vld [vmem:[%s7022_s8] sm:$0xff]   ;;  %v6488_v14 = vpack.c.bf16 %v868_v13, %v867_v12  ;;  %v5759_v15 = vld [vmem:[%s7023_s0 + $0x10] sm:$0xff]  }
 0xd31   : > { %5841 = vpow2.f32 %v2434_v16  ;;  %v2436_v17 = vmul.f32 1.442695, %v2433_v11  ;;  %v5760_v16 = vld [vmem:[%s7023_s0 + $0x18] sm:$0xff]  }
 0xd33   : > { %5843 = vpow2.f32 %v2436_v17 }
 0xd3b   : > { %v5842_v18 = vpop.eup %5841 }
 0xd3c   : > { %v2438_v19 = vsel %vm1118_vm2, %v5842_v18, 0.0 }
 0xd3d   : > { %v5844_v20 = vpop.eup %5843  ;;  %2439 = vadd.xlane.f32.xlu0 %v2438_v19 }
 0xd3e   : > { %v2441_v21 = vsel %vm1118_vm2, %v5844_v20, 0.0 }
 0xd3f   : > { %2442 = vadd.xlane.f32.xlu1 %v2441_v21 }
 0xdca   : > { %v2440_v31 = vpop.xlane.xlu0 %2439 }
 0xdcb   : > { %5845 = vrcp.f32 %v2440_v31 }
 0xdcc   : > { %v2443_v32 = vpop.xlane.xlu1 %2442 }
 0xdcd   : > { %5847 = vrcp.f32 %v2443_v32  ;;  %v5761_v32 = vld [vmem:[%s6969_s14] sm:$0xff]  }
 0xdd5   : > { %v5846_v33 = vpop.eup %5845 }
 0xdd6   : > { %v2446_v35 = vmul.f32 %v5846_v33, %v5842_v18 }
 0xdd7   : > { %v5848_v34 = vpop.eup %5847 }
 0xdd8   : > { %v2447_v36 = vmul.f32 %v5848_v34, %v5844_v20  ;;  %v5762_v34 = vld [vmem:[%s6969_s14 + $0x8] sm:$0xff]  }
 0xdda   : > { %v2448_v37 = vpack.c.bf16 %v2447_v36, %v2446_v35  ;;  %v5763_v35 = vld [vmem:[%s6969_s14 + $0x10] sm:$0xff]   ;;  %v5764_v36 = vld [vmem:[%s6969_s14 + $0x18] sm:$0xff]  }
 0xddc   : > { %5434 = vmatmul.mubr.msk.bf16.vlgmr.msra.gmra.mrb[44].mxu0 %vm1118_vm2, %v2448_v37  ;;  %v5765_v37 = vld [vmem:[%s7023_s0 + $0x20] sm:$0xff]  }
 0xddd   : > { %5451 = vmatprep.mubr.msk.bf16.mxu0 %vm5904_vm0, %v5903_v1  ;;  %5444 = vmatpush3.bf16.msra.mxu0 %v5756_v8 }
 0xdde   : > { %5445 = vmatprep.subr.bf16.mxu0 %v5903_v1 }
 0xde1   : > { %5446 = vmatpush3.bf16.msra.mxu0 %v5758_v10 }
 0xde2   : > { %5447 = vmatprep.subr.bf16.mxu0 %v5903_v1 }
 0xde5   : > { %5448 = vmatpush3.bf16.msra.mxu0 %v5759_v15 }
 0xde6   : > { %5449 = vmatprep.subr.bf16.mxu0 %v5903_v1 }
 0xde9   : > { %5450 = vmatpush3.bf16.msra.mxu0 %v5760_v16 }
 0xdea   : > { %5467 = vmatprep.subr.bf16.mxu0 %v5903_v1 }
 0xeaf   : > { %v2487_v39 = vpop.f32.mrb[44].mxu0 }
 0xeb0   : > { %v5435_v40 = vpop.f32.mrb[45].mxu0 }
 0xeb1   : > { %v2490_v42 = vpop.f32.mrb[46].mxu0  ;;  %v5767_v40 = vld [vmem:[%s7023_s0 + $0x30] sm:$0xff]  }
 0xeb2   : > { %v2497_v43 = vpack.c.bf16 %v2490_v42, %v2487_v39  ;;  %v5436_v44 = vpop.f32.mrb[47].mxu0  ;;  %v5766_v39 = vld [vmem:[%s7023_s0 + $0x28] sm:$0xff]   ;;  %v5768_v42 = vld [vmem:[%s7023_s0 + $0x38] sm:$0xff]  }
 0xeb4   : > { %5440 = vmatmul.mubr.msk.bf16.vlgmr.msra.gmra.mrb[44].mxu1 %vm1118_vm2, %v2497_v43  ;;  %v4851_v43 = vld [vmem:[%s6972_s17] ss:$0 sm:$0xff] }
 0xeb5   : > { %5463 = vmatprep.mubr.msk.bf16.mxu1 %vm5904_vm0, %v5903_v1 }
 0xf87   : > { %v2541_v45 = vpop.f32.mrb[44].mxu1 }
 0xf88   : > { %v2548_v47 = vadd.f32 %v2541_v45, %v6400_v51  ;;  %v5441_v48 = vpop.f32.mrb[45].mxu1  ;;  %v5753_v51 = vld [vmem:[%s6968_s13] sm:$0xff]  }
 0xf89   : > { %v2544_v49 = vpop.f32.mrb[46].mxu1  ;;  %5456 = vmatpush3.bf16.msra.mxu1 %v5753_v51  ;;  %v4857_v51 = vld [vmem:[%s6973_s18] ss:$0 sm:$0xff] }
 0xf8a   : > { %v2557_v50 = vadd.f32 %v4842_v46, %v2548_v47  ;;  %v2549_v52 = vadd.f32 %v2544_v49, %v6403_v54  ;;  %v5442_v53 = vpop.f32.mrb[47].mxu1  ;;  %5457 = vmatprep.subr.bf16.mxu1 %v5903_v1 }
 0xf8b   : > { %v4845_v53 = vld [vmem:[%s6971_s16] ss:$0 sm:$0xff] }
 0xf8c   : > { %v2558_v55 = vadd.f32 %v4842_v46, %v2549_v52  ;;  %v2559_v57 = vadd.f32 %v5893_v56, %v2557_v50 }
 0xf8d   : > { %5458 = vmatpush3.bf16.msra.mxu1 %v5754_v6 }
 0xf8e   : > { %v2561_v58 = vsel %vm911_vm1, %v2559_v57, 0.0  ;;  %v2560_v60 = vadd.f32 %v5894_v59, %v2558_v55  ;;  %5459 = vmatprep.subr.bf16.mxu1 %v5903_v1 }
 0xf8f   : > { %2562 = vadd.xlane.f32.xlu0 %v2561_v58 }
 0xf90   : > { %v2564_v61 = vsel %vm911_vm1, %v2560_v60, 0.0 }
 0xf91   : > { %2565 = vadd.xlane.f32.xlu1 %v2564_v61  ;;  %5460 = vmatpush3.bf16.msra.mxu1 %v5755_v7 }
 0xf92   : > { %5461 = vmatprep.subr.bf16.mxu1 %v5903_v1 }
 0xf95   : > { %5462 = vmatpush3.bf16.msra.mxu1 %v5757_v9 }
 0xf96   : > { %5479 = vmatprep.subr.bf16.mxu1 %v5903_v1 }
 0xf98   : > { %5464 = vmatmul.mubr.msk.bf16.vlgmr.msra.gmra.mrb[48].mxu1 %vm911_vm1, %v6488_v14 }
 0xf99   : > { %5481 = vmatprep.mubr.msk.bf16.mxu1 %vm5904_vm0, %v5903_v1 }
0x101c   : > { %v2563_v54 = vpop.xlane.xlu0 %2562 }
0x101d   : > { %v2568_v62 = vmul.f32 0.015625, %v2563_v54 }
0x101e   : > { %v2566_v63 = vpop.xlane.xlu1 %2565 }
0x101f   : > { %v2570_v38 = vsub.f32 %v2559_v57, %v2568_v62  ;;  %v2569_v41 = vmul.f32 0.015625, %v2566_v63 }
0x1021   : > { %v2571_v0 = vsub.f32 %v2560_v60, %v2569_v41  ;;  %v2572_v2 = vmul.f32 %v2570_v38, %v2570_v38 }
0x1023   : > { %v2574_v3 = vsel %vm911_vm1, %v2572_v2, 0.0  ;;  %v2573_v4 = vmul.f32 %v2571_v0, %v2571_v0 }
0x1024   : > { %2575 = vadd.xlane.f32.xlu0 %v2574_v3  ;;  %v4874_v3 = vld [vmem:[%s6971_s16 + $0x1] ss:$0 sm:$0xff] }
0x1025   : > { %v2577_v5 = vsel %vm911_vm1, %v2573_v4, 0.0 }
0x1026   : > { %2578 = vadd.xlane.f32.xlu1 %v2577_v5 }
0x106b   : > { %v2767_v44 = vpop.f32.mrb[48].mxu1 }
0x106c   : > { %v2768_v45 = vadd.f32 %v4851_v43, %v2767_v44  ;;  %v5465_v46 = vpop.f32.mrb[49].mxu1  ;;  %v5771_v44 = vld [vmem:[%s6968_s13 + $0x30] sm:$0xff]  }
0x106d   : > { %v2770_v47 = vpop.f32.mrb[50].mxu1 }
0x106e   : > { %v2771_v48 = vadd.f32 %v4851_v43, %v2770_v47  ;;  %v5466_v49 = vpop.f32.mrb[51].mxu1  ;;  %v5770_v43 = vld [vmem:[%s6968_s13 + $0x28] sm:$0xff]  }
0x1070   : > { %v2855_v50 = vpack.c.bf16 %v2771_v48, %v2768_v45  ;;  %v5772_v45 = vld [vmem:[%s6968_s13 + $0x38] sm:$0xff]  }
0x1072   : > { %v2860_v52 = vsel %vm1118_vm2, %v2855_v50, 0 }
0x1073   : > { %5480 = vmatpush3.bf16.xpose.msra.mxu1 %v2860_v52  ;;  %v4889_v52 = vld [vmem:[%s6972_s17 + $0x1] ss:$0 sm:$0xff] }
0x1074   : > { %5485 = vmatprep.subr.bf16.mxu1 %v5903_v1 }
0x10b1   : > { %v2576_v11 = vpop.xlane.xlu0 %2575 }
0x10b2   : > { %v2580_v17 = vmul.f32 0.015625, %v2576_v11 }
0x10b3   : > { %v2579_v18 = vpop.xlane.xlu1 %2578 }
0x10b4   : > { %v2582_v19 = vadd.f32 1e-05, %v2580_v17  ;;  %v2581_v20 = vmul.f32 0.015625, %v2579_v18 }
0x10b6   : > { %5849 = vrsqrt.f32 %v2582_v19  ;;  %v2583_v21 = vadd.f32 1e-05, %v2581_v20 }
0x10b8   : > { %5851 = vrsqrt.f32 %v2583_v21 }
0x10c0   : > { %v5850_v22 = vpop.eup %5849 }
0x10c1   : > { %v2586_v24 = vmul.f32 %v5850_v22, %v2570_v38 }
0x10c2   : > { %v5852_v25 = vpop.eup %5851 }
0x10c3   : > { %v2595_v26 = vmul.f32 %v4843_v23, %v2586_v24  ;;  %v2587_v27 = vmul.f32 %v5852_v25, %v2571_v0 }
0x10c5   : > { %v2596_v29 = vmul.f32 %v4843_v23, %v2587_v27  ;;  %v6510_v30 = vadd.f32 %v4844_v28, %v2595_v26 }
0x10c7   : > { %v6512_v31 = vadd.f32 %v4844_v28, %v2596_v29 }
0x10c9   : > { %v6519_v33 = vpack.c.bf16 %v6512_v31, %v6510_v30 }
0x10cb   : > { %5452 = vmatmul.mubr.msk.bf16.vlgmr.msra.gmra.mrb[48].mxu0 %vm911_vm1, %v6519_v33 }
0x10cc   : > { %5468 = vmatpush3.bf16.msra.mxu0 %v5761_v32  ;;  %5475 = vmatprep.mubr.msk.bf16.mxu0 %vm5904_vm0, %v5903_v1 }
0x10cd   : > { %5469 = vmatprep.subr.bf16.mxu0 %v5903_v1 }
0x10d0   : > { %5470 = vmatpush3.bf16.msra.mxu0 %v5762_v34 }
0x10d1   : > { %5471 = vmatprep.subr.bf16.mxu0 %v5903_v1 }
0x10d4   : > { %5472 = vmatpush3.bf16.msra.mxu0 %v5763_v35 }
0x10d5   : > { %5473 = vmatprep.subr.bf16.mxu0 %v5903_v1 }
0x10d8   : > { %5474 = vmatpush3.bf16.msra.mxu0 %v5764_v36 }
0x10d9   : > { %5491 = vmatprep.subr.bf16.mxu0 %v5903_v1 }
0x10db   : > { %5476 = vmatmul.mubr.msk.bf16.vlgmr.msra.gmra.mrb[52].mxu0 %vm911_vm1, %v6488_v14 }
0x10dc   : > { %5492 = vmatpush3.bf16.msra.mxu0 %v5765_v37  ;;  %5499 = vmatprep.mubr.msk.bf16.mxu0 %vm5904_vm0, %v5903_v1 }
0x10dd   : > { %5493 = vmatprep.subr.bf16.mxu0 %v5903_v1 }
0x10e0   : > { %5494 = vmatpush3.bf16.msra.mxu0 %v5766_v39 }
0x10e1   : > { %5495 = vmatprep.subr.bf16.mxu0 %v5903_v1 }
0x10e4   : > { %5496 = vmatpush3.bf16.msra.mxu0 %v5767_v40  ;;  %v5769_v40 = vld [vmem:[%s6968_s13 + $0x20] sm:$0xff]  }
0x10e5   : > { %5497 = vmatprep.subr.bf16.mxu0 %v5903_v1 }
0x10e8   : > { %5498 = vmatpush3.bf16.msra.mxu0 %v5768_v42 }
0x10e9   : > { %5515 = vmatprep.subr.bf16.mxu0 %v5903_v1 }
0x10eb   : > { %5500 = vmatmul.mubr.msk.bf16.vlgmr.msra.gmra.mrb[56].mxu0 %vm911_vm1, %v6519_v33 }
0x10ec   : > { %5523 = vmatprep.mubr.msk.bf16.mxu0 %vm5904_vm0, %v5903_v1 }
0x119e   : > { %v2684_v55 = vpop.f32.mrb[48].mxu0 }
0x119f   : > { %v5453_v56 = vpop.f32.mrb[49].mxu0  ;;  %v2685_v58 = vadd.f32 %v4845_v53, %v2684_v55 }
0x11a0   : > { %v2687_v57 = vpop.f32.mrb[50].mxu0 }
0x11a1   : > { %v2688_v59 = vadd.f32 %v4845_v53, %v2687_v57  ;;  %v5454_v60 = vpop.f32.mrb[51].mxu0 }
0x11a3   : > { %v2854_v61 = vpack.c.bf16 %v2688_v59, %v2685_v58 }
0x11a5   : > { %5482 = vmatmul.mubr.msk.bf16.vlgmr.msra.gmra.mrb[52].mxu1 %vm1118_vm2, %v2854_v61 }
0x11a6   : > { %5487 = vmatprep.mubr.msk.bf16.mxu1 %vm5904_vm0, %v5903_v1 }
0x11ae   : > { %v2847_v54 = vpop.f32.mrb[52].mxu0 }
0x11af   : > { %v2848_v62 = vadd.f32 %v4857_v51, %v2847_v54  ;;  %v5477_v63 = vpop.f32.mrb[53].mxu0  ;;  %v5774_v54 = vld [vmem:[%s6969_s14 + $0x28] sm:$0xff]  }
0x11b0   : > { %v2850_v38 = vpop.f32.mrb[54].mxu0  ;;  %v5776_v63 = vld [vmem:[%s6969_s14 + $0x38] sm:$0xff]  }
0x11b1   : > { %v2851_v41 = vadd.f32 %v4857_v51, %v2850_v38  ;;  %v5478_v0 = vpop.f32.mrb[55].mxu0  ;;  %v5773_v51 = vld [vmem:[%s6969_s14 + $0x20] sm:$0xff]  }
0x11b2   : > { %5516 = vmatpush3.bf16.msra.mxu0 %v5773_v51 }
0x11b3   : > { %v2928_v2 = vpack.c.bf16 %v2851_v41, %v2848_v62  ;;  %5517 = vmatprep.subr.bf16.mxu0 %v5903_v1  ;;  %v5775_v62 = vld [vmem:[%s6969_s14 + $0x30] sm:$0xff]  }
0x11b5   : > { %5486 = vmatpush3.bf16.msra.mxu1 %v2928_v2 }
0x11b6   : > { %5503 = vmatprep.subr.bf16.mxu1 %v5903_v1  ;;  %5518 = vmatpush3.bf16.msra.mxu0 %v5774_v54 }
0x11b7   : > { %5519 = vmatprep.subr.bf16.mxu0 %v5903_v1 }
0x11ba   : > { %5520 = vmatpush3.bf16.msra.mxu0 %v5775_v62 }
0x11bb   : > { %5521 = vmatprep.subr.bf16.mxu0 %v5903_v1 }
0x11be   : > { %v3051_v4 = vpop.f32.mrb[56].mxu0  ;;  %5522 = vmatpush3.bf16.msra.mxu0 %v5776_v63 }
0x11bf   : > { %v5501_v5 = vpop.f32.mrb[57].mxu0  ;;  %v6580_v7 = vadd.f32 %v4874_v3, %v3051_v4  ;;  %5539 = vmatprep.subr.bf16.mxu0 %v5903_v1 }
0x11c0   : > { %v3054_v6 = vpop.f32.mrb[58].mxu0 }
0x11c1   : > { %v6582_v8 = vadd.f32 %v4874_v3, %v3054_v6  ;;  %v5502_v9 = vpop.f32.mrb[59].mxu0  ;;  %5524 = vmatmul.mubr.msk.bf16.vlgmr.msra.gmra.mrb[60].mxu0 %vm911_vm1, %v6488_v14 }
0x11c2   : > { %5541 = vmatprep.mubr.msk.bf16.mxu0 %vm5904_vm0, %v5903_v1 }
0x11c3   : > { %v3222_v10 = vpack.c.bf16 %v6582_v8, %v6580_v7 }
0x1278   : > { %v2896_v12 = vpop.f32.mrb[52].mxu1 }
0x1279   : > { %v2903_v13 = vmul.f32 0.25, %v2896_v12  ;;  %v5483_v15 = vpop.f32.mrb[53].mxu1 }
0x127a   : > { %v2899_v16 = vpop.f32.mrb[54].mxu1 }
0x127b   : > { %v2904_v11 = vmul.f32 0.25, %v2899_v16  ;;  %v5484_v17 = vpop.f32.mrb[55].mxu1  ;;  %v2905_v18 = vsel %vm1118_vm2, %v2903_v13, -inf }
0x127c   : > { %2906 = vmax.xlane.f32.xlu0 %v2905_v18 }
0x127d   : > { %v2908_v19 = vsel %vm1118_vm2, %v2904_v11, -inf }
0x127e   : > { %2909 = vmax.xlane.f32.xlu1 %v2908_v19 }
0x1294   : > { %v3215_v18 = vpop.f32.mrb[60].mxu0 }
0x1295   : > { %v5525_v19 = vpop.f32.mrb[61].mxu0 }
0x1296   : > { %v5790_v19 = vld [vmem:[%s6969_s14 + $0x58] sm:$0xff]  }
0x1309   : > { %v2907_v20 = vpop.xlane.xlu0 %2906 }
0x130a   : > { %v2911_v21 = vsub.f32 %v2903_v13, %v2907_v20  ;;  %v3218_v20 = vpop.f32.mrb[62].mxu0 }
0x130b   : > { %v2910_v22 = vpop.xlane.xlu1 %2909 }
0x130c   : > { %v2913_v23 = vmul.f32 1.442695, %v2911_v21  ;;  %v2912_v24 = vsub.f32 %v2904_v11, %v2910_v22  ;;  %v4904_v21 = vld [vmem:[%s6973_s18 + $0x1] ss:$0 sm:$0xff]  ;;  %v5526_v22 = vpop.f32.mrb[63].mxu0 }
0x130e   : > { %5853 = vpow2.f32 %v2913_v23  ;;  %v2915_v25 = vmul.f32 1.442695, %v2912_v24  ;;  %v3216_v23 = vadd.f32 %v4904_v21, %v3215_v18  ;;  %v3219_v24 = vadd.f32 %v4904_v21, %v3218_v20  ;;  %v5789_v18 = vld [vmem:[%s6969_s14 + $0x50] sm:$0xff]  }
0x1310   : > { %5855 = vpow2.f32 %v2915_v25  ;;  %v3296_v25 = vpack.c.bf16 %v3219_v24, %v3216_v23 }
0x1318   : > { %v5854_v26 = vpop.eup %5853 }
0x1319   : > { %v2917_v27 = vsel %vm1118_vm2, %v5854_v26, 0.0 }
0x131a   : > { %v5856_v28 = vpop.eup %5855  ;;  %2918 = vadd.xlane.f32.xlu0 %v2917_v27 }
0x131b   : > { %v2920_v29 = vsel %vm1118_vm2, %v5856_v28, 0.0 }
0x131c   : > { %2921 = vadd.xlane.f32.xlu1 %v2920_v29 }
0x13a7   : > { %v2919_v32 = vpop.xlane.xlu0 %2918 }
0x13a8   : > { %5857 = vrcp.f32 %v2919_v32 }
0x13a9   : > { %v2922_v34 = vpop.xlane.xlu1 %2921 }
0x13aa   : > { %5859 = vrcp.f32 %v2922_v34 }
0x13b2   : > { %v5858_v35 = vpop.eup %5857 }
0x13b3   : > { %v2925_v37 = vmul.f32 %v5858_v35, %v5854_v26  ;;  %v5779_v26 = vld [vmem:[%s6970_s15 + $0x8] sm:$0xff]  }
0x13b4   : > { %v5860_v36 = vpop.eup %5859  ;;  %5540 = vmatpush3.bf16.msra.mxu0 %v5779_v26 }
0x13b5   : > { %v2926_v39 = vmul.f32 %v5860_v36, %v5856_v28  ;;  %5551 = vmatprep.subr.bf16.mxu0 %v5903_v1  ;;  %v5777_v36 = vld [vmem:[%s6970_s15] sm:$0xff]  }
0x13b7   : > { %v2927_v42 = vpack.c.bf16 %v2926_v39, %v2925_v37  ;;  %v5778_v39 = vld [vmem:[%s6968_s13 + $0x40] sm:$0xff]  }
0x13b9   : > { %5488 = vmatmul.mubr.msk.bf16.vlgmr.msra.gmra.mrb[56].mxu1 %vm1118_vm2, %v2927_v42  ;;  %v5781_v42 = vld [vmem:[%s6968_s13 + $0x50] sm:$0xff]  }
0x13ba   : > { %5504 = vmatpush3.bf16.msra.mxu1 %v5769_v40  ;;  %5511 = vmatprep.mubr.msk.bf16.mxu1 %vm5904_vm0, %v5903_v1  ;;  %v5780_v40 = vld [vmem:[%s6968_s13 + $0x48] sm:$0xff]  }
0x13bb   : > { %5505 = vmatprep.subr.bf16.mxu1 %v5903_v1 }
0x13be   : > { %5506 = vmatpush3.bf16.msra.mxu1 %v5770_v43  ;;  %v5783_v43 = vld [vmem:[%s6968_s13 + $0x58] sm:$0xff]  }
0x13bf   : > { %5507 = vmatprep.subr.bf16.mxu1 %v5903_v1 }
0x13c2   : > { %5508 = vmatpush3.bf16.msra.mxu1 %v5771_v44 }
0x13c3   : > { %5509 = vmatprep.subr.bf16.mxu1 %v5903_v1 }
0x13c6   : > { %5510 = vmatpush3.bf16.msra.mxu1 %v5772_v45 }
0x13c7   : > { %5527 = vmatprep.subr.bf16.mxu1 %v5903_v1 }
0x13c9   : > { %5512 = vmatmul.mubr.msk.bf16.vlgmr.msra.gmra.mrb[60].mxu1 %vm911_vm1, %v6488_v14 }
0x13ca   : > { %5529 = vmatprep.mubr.msk.bf16.mxu1 %vm5904_vm0, %v5903_v1 }
0x148c   : > { %v6613_v46 = vpop.f32.mrb[56].mxu1 }
0x148d   : > { %v5489_v47 = vpop.f32.mrb[57].mxu1 }
0x148e   : > { %v6615_v48 = vpop.f32.mrb[58].mxu1  ;;  %v5782_v47 = vld [vmem:[%s7023_s0 + $0x40] sm:$0xff]  }
0x148f   : > { %v2975_v49 = vpack.c.bf16 %v6615_v48, %v6613_v46  ;;  %v5490_v50 = vpop.f32.mrb[59].mxu1 }
0x1490   : > { %v5784_v50 = vld [vmem:[%s7023_s0 + $0x48] sm:$0xff]  }
0x149c   : > { %v3133_v53 = vpop.f32.mrb[60].mxu1 }
0x149d   : > { %v5513_v55 = vpop.f32.mrb[61].mxu1  ;;  %v3134_v57 = vadd.f32 %v4889_v52, %v3133_v53 }
0x149e   : > { %v3136_v56 = vpop.f32.mrb[62].mxu1 }
0x149f   : > { %v3137_v58 = vadd.f32 %v4889_v52, %v3136_v56  ;;  %v5514_v59 = vpop.f32.mrb[63].mxu1  ;;  %v5785_v56 = vld [vmem:[%s7023_s0 + $0x50] sm:$0xff]  }
0x14a0   : > { %v4942_v59 = vld [vmem:[%s6972_s17 + $0x2] ss:$0 sm:$0xff] }
0x14a1   : > { %v3223_v60 = vpack.c.bf16 %v3137_v58, %v3134_v57  ;;  %v5786_v58 = vld [vmem:[%s7023_s0 + $0x58] sm:$0xff]  }
0x14a3   : > { %v3228_v61 = vsel %vm1118_vm2, %v3223_v60, 0 }
0x14a4   : > { %5528 = vmatpush3.bf16.xpose.msra.mxu1 %v3228_v61 }
0x14a5   : > { %5533 = vmatprep.subr.bf16.mxu1 %v5903_v1 }
0x14ab   : > { %5530 = vmatmul.mubr.msk.bf16.vlgmr.msra.gmra.mrb[64].mxu1 %vm1118_vm2, %v3222_v10 }
0x14ac   : > { %5535 = vmatprep.mubr.msk.bf16.mxu1 %vm5904_vm0, %v5903_v1  ;;  %5534 = vmatpush3.bf16.msra.mxu1 %v3296_v25 }
0x14ad   : > { %5545 = vmatprep.subr.bf16.mxu1 %v5903_v1 }
0x157e   : > { %v3264_v38 = vpop.f32.mrb[64].mxu1 }
0x157f   : > { %v3271_v41 = vmul.f32 0.25, %v3264_v38  ;;  %v5531_v0 = vpop.f32.mrb[65].mxu1 }
0x1580   : > { %v3267_v2 = vpop.f32.mrb[66].mxu1 }
0x1581   : > { %v3272_v3 = vmul.f32 0.25, %v3267_v2  ;;  %v5532_v4 = vpop.f32.mrb[67].mxu1  ;;  %v3273_v5 = vsel %vm1118_vm2, %v3271_v41, -inf }
0x1582   : > { %3274 = vmax.xlane.f32.xlu0 %v3273_v5 }
0x1583   : > { %v3276_v6 = vsel %vm1118_vm2, %v3272_v3, -inf }
0x1584   : > { %3277 = vmax.xlane.f32.xlu1 %v3276_v6 }
0x160f   : > { %v3275_v7 = vpop.xlane.xlu0 %3274 }
0x1610   : > { %v3279_v8 = vsub.f32 %v3271_v41, %v3275_v7  ;;  %v4927_v7 = vld [vmem:[%s6971_s16 + $0x2] ss:$0 sm:$0xff] }
0x1611   : > { %v3278_v9 = vpop.xlane.xlu1 %3277 }
0x1612   : > { %v3281_v10 = vmul.f32 1.442695, %v3279_v8  ;;  %v3280_v12 = vsub.f32 %v3272_v3, %v3278_v9 }
0x1614   : > { %5861 = vpow2.f32 %v3281_v10  ;;  %v3283_v13 = vmul.f32 1.442695, %v3280_v12 }
0x1616   : > { %5863 = vpow2.f32 %v3283_v13 }
0x161e   : > { %v5862_v15 = vpop.eup %5861 }
0x161f   : > { %v3285_v16 = vsel %vm1118_vm2, %v5862_v15, 0.0 }
0x1620   : > { %v5864_v11 = vpop.eup %5863  ;;  %3286 = vadd.xlane.f32.xlu0 %v3285_v16 }
0x1621   : > { %v3288_v17 = vsel %vm1118_vm2, %v5864_v11, 0.0 }
0x1622   : > { %3289 = vadd.xlane.f32.xlu1 %v3288_v17  ;;  %v5788_v17 = vld [vmem:[%s6969_s14 + $0x48] sm:$0xff]  }
0x16ad   : > { %v3287_v27 = vpop.xlane.xlu0 %3286 }
0x16ae   : > { %5865 = vrcp.f32 %v3287_v27 }
0x16af   : > { %v3290_v28 = vpop.xlane.xlu1 %3289 }
0x16b0   : > { %5867 = vrcp.f32 %v3290_v28 }
0x16b8   : > { %v5866_v29 = vpop.eup %5865 }
0x16b9   : > { %v3293_v34 = vmul.f32 %v5866_v29, %v5862_v15 }
0x16ba   : > { %v5868_v32 = vpop.eup %5867 }
0x16bb   : > { %v3294_v35 = vmul.f32 %v5868_v32, %v5864_v11  ;;  %v5787_v11 = vld [vmem:[%s6969_s14 + $0x40] sm:$0xff]  }
0x16bd   : > { %v3295_v37 = vpack.c.bf16 %v3294_v35, %v3293_v34 }
0x16bf   : > { %5536 = vmatmul.mubr.msk.bf16.vlgmr.msra.gmra.mrb[68].mxu1 %vm1118_vm2, %v3295_v37 }
0x16c0   : > { %5546 = vmatpush3.bf16.msra.mxu1 %v5777_v36  ;;  %5547 = vmatprep.mubr.msk.bf16.mxu1 %vm5904_vm0, %v5903_v1 }
0x16c1   : > { %5563 = vmatprep.subr.bf16.mxu1 %v5903_v1 }
0x16c7   : > { %5548 = vmatmul.mubr.msk.bf16.vlgmr.msra.gmra.mrb[72].mxu1 %vm1118_vm2, %v2975_v49 }
0x16c8   : > { %5564 = vmatpush3.bf16.msra.mxu1 %v5778_v39  ;;  %5571 = vmatprep.mubr.msk.bf16.mxu1 %vm5904_vm0, %v5903_v1 }
0x16c9   : > { %5565 = vmatprep.subr.bf16.mxu1 %v5903_v1 }
0x16cc   : > { %5566 = vmatpush3.bf16.msra.mxu1 %v5780_v40 }
0x16cd   : > { %5567 = vmatprep.subr.bf16.mxu1 %v5903_v1 }
0x16d0   : > { %5568 = vmatpush3.bf16.msra.mxu1 %v5781_v42 }
0x16d1   : > { %5569 = vmatprep.subr.bf16.mxu1 %v5903_v1 }
0x16d4   : > { %5570 = vmatpush3.bf16.msra.mxu1 %v5783_v43 }
0x16d5   : > { %5587 = vmatprep.subr.bf16.mxu1 %v5903_v1 }
0x16d7   : > { %5572 = vmatmul.mubr.msk.bf16.vlgmr.msra.gmra.mrb[76].mxu1 %vm911_vm1, %v6488_v14 }
0x16d8   : > { %5589 = vmatprep.mubr.msk.bf16.mxu1 %vm5904_vm0, %v5903_v1 }
0x1792   : > { %v3334_v44 = vpop.f32.mrb[68].mxu1 }
0x1793   : > { %v5537_v45 = vpop.f32.mrb[69].mxu1 }
0x1794   : > { %v3337_v46 = vpop.f32.mrb[70].mxu1 }
0x1795   : > { %v3344_v48 = vpack.c.bf16 %v3337_v46, %v3334_v44  ;;  %v5538_v49 = vpop.f32.mrb[71].mxu1  ;;  %v4957_v46 = vld [vmem:[%s6973_s18 + $0x2] ss:$0 sm:$0xff] }
0x1797   : > { %5542 = vmatmul.mubr.msk.bf16.vlgmr.msra.gmra.mrb[64].mxu0 %vm1118_vm2, %v3344_v48 }
0x1798   : > { %5552 = vmatpush3.bf16.msra.mxu0 %v5782_v47  ;;  %5559 = vmatprep.mubr.msk.bf16.mxu0 %vm5904_vm0, %v5903_v1 }
0x1799   : > { %5553 = vmatprep.subr.bf16.mxu0 %v5903_v1 }
0x179a   : > { %v3438_v52 = vpop.f32.mrb[72].mxu1 }
0x179b   : > { %v5549_v53 = vpop.f32.mrb[73].mxu1 }
0x179c   : > { %5554 = vmatpush3.bf16.msra.mxu0 %v5784_v50  ;;  %v3441_v55 = vpop.f32.mrb[74].mxu1 }
0x179d   : > { %v5550_v57 = vpop.f32.mrb[75].mxu1  ;;  %5555 = vmatprep.subr.bf16.mxu0 %v5903_v1 }
0x17a0   : > { %5556 = vmatpush3.bf16.msra.mxu0 %v5785_v56 }
0x17a1   : > { %5557 = vmatprep.subr.bf16.mxu0 %v5903_v1 }
0x17a4   : > { %5558 = vmatpush3.bf16.msra.mxu0 %v5786_v58 }
0x17a5   : > { %5575 = vmatprep.subr.bf16.mxu0 %v5903_v1 }
0x17a7   : > { %5560 = vmatmul.mubr.msk.bf16.vlgmr.msra.gmra.mrb[68].mxu0 %vm911_vm1, %v6519_v33 }
0x17a8   : > { %5583 = vmatprep.mubr.msk.bf16.mxu0 %vm5904_vm0, %v5903_v1  ;;  %5576 = vmatpush3.bf16.msra.mxu0 %v5787_v11 }
0x17a9   : > { %5577 = vmatprep.subr.bf16.mxu0 %v5903_v1 }
0x17aa   : > { %v3602_v60 = vpop.f32.mrb[76].mxu1 }
0x17ab   : > { %v3603_v61 = vadd.f32 %v4942_v59, %v3602_v60  ;;  %v5573_v51 = vpop.f32.mrb[77].mxu1  ;;  %v5791_v60 = vld [vmem:[%s7023_s0 + $0x60] sm:$0xff]  }
0x17ac   : > { %v3605_v54 = vpop.f32.mrb[78].mxu1  ;;  %5578 = vmatpush3.bf16.msra.mxu0 %v5788_v17  ;;  %v5792_v51 = vld [vmem:[%s7023_s0 + $0x68] sm:$0xff]  }
0x17ad   : > { %v3606_v62 = vadd.f32 %v4942_v59, %v3605_v54  ;;  %v5574_v63 = vpop.f32.mrb[79].mxu1  ;;  %5579 = vmatprep.subr.bf16.mxu0 %v5903_v1  ;;  %v5793_v54 = vld [vmem:[%s7023_s0 + $0x70] sm:$0xff]  }
0x17af   : > { %v3692_v38 = vpack.c.bf16 %v3606_v62, %v3603_v61  ;;  %v5794_v62 = vld [vmem:[%s7023_s0 + $0x78] sm:$0xff]  }
0x17b0   : > { %5580 = vmatpush3.bf16.msra.mxu0 %v5789_v18 }
0x17b1   : > { %v3697_v41 = vsel %vm1118_vm2, %v3692_v38, 0  ;;  %5581 = vmatprep.subr.bf16.mxu0 %v5903_v1 }
0x17b2   : > { %5588 = vmatpush3.bf16.xpose.msra.mxu1 %v3697_v41 }
0x17b3   : > { %5593 = vmatprep.subr.bf16.mxu1 %v5903_v1 }
0x17b4   : > { %5582 = vmatpush3.bf16.msra.mxu0 %v5790_v19 }
0x17b5   : > { %5599 = vmatprep.subr.bf16.mxu0 %v5903_v1 }
0x17b7   : > { %5584 = vmatmul.mubr.msk.bf16.vlgmr.msra.gmra.mrb[72].mxu0 %vm911_vm1, %v6488_v14 }
0x17b8   : > { %5601 = vmatprep.mubr.msk.bf16.mxu0 %vm5904_vm0, %v5903_v1 }
0x186a   : > { %v3388_v0 = vpop.f32.mrb[64].mxu0 }
0x186b   : > { %v6723_v2 = vadd.f32 %v3438_v52, %v3388_v0  ;;  %v5543_v3 = vpop.f32.mrb[65].mxu0  ;;  %v5795_v52 = vld [vmem:[%s6970_s15 + $0x10] sm:$0xff]   ;;  %v5796_v0 = vld [vmem:[%s6968_s13 + $0x60] sm:$0xff]  }
0x186c   : > { %v3391_v4 = vpop.f32.mrb[66].mxu0  ;;  %5600 = vmatpush3.bf16.msra.mxu0 %v5795_v52 }
0x186d   : > { %v6725_v5 = vadd.f32 %v3441_v55, %v3391_v4  ;;  %v5544_v6 = vpop.f32.mrb[67].mxu0  ;;  %5617 = vmatprep.subr.bf16.mxu0 %v5903_v1 }
0x186e   : > { %v5797_v6 = vld [vmem:[%s6968_s13 + $0x68] sm:$0xff]  }
0x187a   : > { %v3520_v8 = vpop.f32.mrb[68].mxu0 }
0x187b   : > { %v5561_v9 = vpop.f32.mrb[69].mxu0  ;;  %v3521_v12 = vadd.f32 %v4927_v7, %v3520_v8  ;;  %v4978_v8 = vld [vmem:[%s6971_s16 + $0x3] ss:$0 sm:$0xff] }
0x187c   : > { %v3523_v10 = vpop.f32.mrb[70].mxu0 }
0x187d   : > { %v3524_v13 = vadd.f32 %v4927_v7, %v3523_v10  ;;  %v5562_v15 = vpop.f32.mrb[71].mxu0  ;;  %v5799_v7 = vld [vmem:[%s6968_s13 + $0x78] sm:$0xff]  }
0x187f   : > { %v3691_v16 = vpack.c.bf16 %v3524_v13, %v3521_v12 }
0x1881   : > { %5590 = vmatmul.mubr.msk.bf16.vlgmr.msra.gmra.mrb[80].mxu1 %vm1118_vm2, %v3691_v16 }
0x1882   : > { %5595 = vmatprep.mubr.msk.bf16.mxu1 %vm5904_vm0, %v5903_v1 }
0x188a   : > { %v3684_v43 = vpop.f32.mrb[72].mxu0 }
0x188b   : > { %v5585_v44 = vpop.f32.mrb[73].mxu0  ;;  %v3685_v48 = vadd.f32 %v4957_v46, %v3684_v43 }
0x188c   : > { %v3687_v45 = vpop.f32.mrb[74].mxu0 }
0x188d   : > { %v5586_v47 = vpop.f32.mrb[75].mxu0  ;;  %v3688_v49 = vadd.f32 %v4957_v46, %v3687_v45 }
0x188f   : > { %v3765_v50 = vpack.c.bf16 %v3688_v49, %v3685_v48 }
0x1891   : > { %5594 = vmatpush3.bf16.msra.mxu1 %v3765_v50 }
0x1892   : > { %5605 = vmatprep.subr.bf16.mxu1 %v5903_v1 }
0x1954   : > { %v3733_v20 = vpop.f32.mrb[80].mxu1 }
0x1955   : > { %v3740_v21 = vmul.f32 0.25, %v3733_v20  ;;  %v5591_v22 = vpop.f32.mrb[81].mxu1 }
0x1956   : > { %v3736_v23 = vpop.f32.mrb[82].mxu1 }
0x1957   : > { %v3741_v24 = vmul.f32 0.25, %v3736_v23  ;;  %v5592_v25 = vpop.f32.mrb[83].mxu1  ;;  %v3742_v26 = vsel %vm1118_vm2, %v3740_v21, -inf  ;;  %v4993_v23 = vld [vmem:[%s6972_s17 + $0x3] ss:$0 sm:$0xff] }
0x1958   : > { %3743 = vmax.xlane.f32.xlu0 %v3742_v26 }
0x1959   : > { %v3745_v27 = vsel %vm1118_vm2, %v3741_v24, -inf }
0x195a   : > { %3746 = vmax.xlane.f32.xlu1 %v3745_v27 }
0x19e5   : > { %v3744_v28 = vpop.xlane.xlu0 %3743 }
0x19e6   : > { %v3748_v29 = vsub.f32 %v3740_v21, %v3744_v28 }
0x19e7   : > { %v3747_v32 = vpop.xlane.xlu1 %3746 }
0x19e8   : > { %v3750_v34 = vmul.f32 1.442695, %v3748_v29  ;;  %v3749_v35 = vsub.f32 %v3741_v24, %v3747_v32 }
0x19ea   : > { %5869 = vpow2.f32 %v3750_v34  ;;  %v3752_v36 = vmul.f32 1.442695, %v3749_v35  ;;  %v5801_v34 = vld [vmem:[%s6969_s14 + $0x68] sm:$0xff]   ;;  %v5802_v35 = vld [vmem:[%s6969_s14 + $0x70] sm:$0xff]  }
0x19ec   : > { %5871 = vpow2.f32 %v3752_v36  ;;  %v5803_v36 = vld [vmem:[%s6969_s14 + $0x78] sm:$0xff]  }
0x19f4   : > { %v5870_v37 = vpop.eup %5869 }
0x19f5   : > { %v3754_v39 = vsel %vm1118_vm2, %v5870_v37, 0.0 }
0x19f6   : > { %v5872_v40 = vpop.eup %5871  ;;  %3755 = vadd.xlane.f32.xlu0 %v3754_v39 }
0x19f7   : > { %v3757_v42 = vsel %vm1118_vm2, %v5872_v40, 0.0 }
0x19f8   : > { %3758 = vadd.xlane.f32.xlu1 %v3757_v42 }
0x1a83   : > { %v3756_v53 = vpop.xlane.xlu0 %3755 }
0x1a84   : > { %5873 = vrcp.f32 %v3756_v53 }
0x1a85   : > { %v3759_v55 = vpop.xlane.xlu1 %3758 }
0x1a86   : > { %5875 = vrcp.f32 %v3759_v55 }
0x1a8e   : > { %v5874_v56 = vpop.eup %5873 }
0x1a8f   : > { %v3762_v58 = vmul.f32 %v5874_v56, %v5870_v37 }
0x1a90   : > { %v5876_v57 = vpop.eup %5875 }
0x1a91   : > { %v3763_v59 = vmul.f32 %v5876_v57, %v5872_v40 }
0x1a93   : > { %v3764_v61 = vpack.c.bf16 %v3763_v59, %v3762_v58 }
0x1a95   : > { %5596 = vmatmul.mubr.msk.bf16.vlgmr.msra.gmra.mrb[84].mxu1 %vm1118_vm2, %v3764_v61  ;;  %v5008_v61 = vld [vmem:[%s6973_s18 + $0x3] ss:$0 sm:$0xff] }
0x1a96   : > { %5606 = vmatpush3.bf16.msra.mxu1 %v5791_v60  ;;  %5613 = vmatprep.mubr.msk.bf16.mxu1 %vm5904_vm0, %v5903_v1 }
0x1a97   : > { %5607 = vmatprep.subr.bf16.mxu1 %v5903_v1 }
0x1a9a   : > { %5608 = vmatpush3.bf16.msra.mxu1 %v5792_v51 }
0x1a9b   : > { %5609 = vmatprep.subr.bf16.mxu1 %v5903_v1 }
0x1a9e   : > { %5610 = vmatpush3.bf16.msra.mxu1 %v5793_v54 }
0x1a9f   : > { %5611 = vmatprep.subr.bf16.mxu1 %v5903_v1 }
0x1aa2   : > { %5612 = vmatpush3.bf16.msra.mxu1 %v5794_v62 }
0x1aa3   : > { %5629 = vmatprep.subr.bf16.mxu1 %v5903_v1 }
0x1aa5   : > { %5614 = vmatmul.mubr.msk.bf16.vlgmr.msra.gmra.mrb[88].mxu1 %vm911_vm1, %v6519_v33  ;;  %v5798_v33 = vld [vmem:[%s6968_s13 + $0x70] sm:$0xff]  }
0x1aa6   : > { %5637 = vmatprep.mubr.msk.bf16.mxu1 %vm5904_vm0, %v5903_v1 }
0x1b68   : > { %v3803_v63 = vpop.f32.mrb[84].mxu1 }
0x1b69   : > { %v5597_v38 = vpop.f32.mrb[85].mxu1 }
0x1b6a   : > { %v3806_v41 = vpop.f32.mrb[86].mxu1  ;;  %v5804_v38 = vld [vmem:[%s6970_s15 + $0x18] sm:$0xff]  }
0x1b6b   : > { %v3813_v3 = vpack.c.bf16 %v3806_v41, %v3803_v63  ;;  %v5598_v4 = vpop.f32.mrb[87].mxu1 }
0x1b6d   : > { %5602 = vmatmul.mubr.msk.bf16.vlgmr.msra.gmra.mrb[76].mxu0 %vm1118_vm2, %v3813_v3 }
0x1b6e   : > { %5618 = vmatpush3.bf16.msra.mxu0 %v5796_v0  ;;  %5625 = vmatprep.mubr.msk.bf16.mxu0 %vm5904_vm0, %v5903_v1 }
0x1b6f   : > { %5619 = vmatprep.subr.bf16.mxu0 %v5903_v1 }
0x1b72   : > { %5620 = vmatpush3.bf16.msra.mxu0 %v5797_v6 }
0x1b73   : > { %5621 = vmatprep.subr.bf16.mxu0 %v5903_v1 }
0x1b76   : > { %5622 = vmatpush3.bf16.msra.mxu0 %v5798_v33 }
0x1b77   : > { %5623 = vmatprep.subr.bf16.mxu0 %v5903_v1 }
0x1b78   : > { %v3941_v9 = vpop.f32.mrb[88].mxu1 }
0x1b79   : > { %v5615_v10 = vpop.f32.mrb[89].mxu1  ;;  %v3942_v13 = vadd.f32 %v4978_v8, %v3941_v9 }
0x1b7a   : > { %v3944_v12 = vpop.f32.mrb[90].mxu1  ;;  %5624 = vmatpush3.bf16.msra.mxu0 %v5799_v7 }
0x1b7b   : > { %v3945_v15 = vadd.f32 %v4978_v8, %v3944_v12  ;;  %v5616_v16 = vpop.f32.mrb[91].mxu1  ;;  %5641 = vmatprep.subr.bf16.mxu0 %v5903_v1 }
0x1b7c   : > { %v5020_v16 = vld [vmem:[%s6974_s19] ss:$0 sm:$0xff] }
0x1b7d   : > { %v4112_v11 = vpack.c.bf16 %v3945_v15, %v3942_v13  ;;  %5626 = vmatmul.mubr.msk.bf16.vlgmr.msra.gmra.mrb[80].mxu0 %vm911_vm1, %v6488_v14 }
0x1b7e   : > { %5643 = vmatprep.mubr.msk.bf16.mxu0 %vm5904_vm0, %v5903_v1 }
0x1c40   : > { %v3857_v17 = vpop.f32.mrb[76].mxu0 }
0x1c41   : > { %v6815_v18 = vadd.f32 %v3857_v17, %v6723_v2  ;;  %v5603_v19 = vpop.f32.mrb[77].mxu0 }
0x1c42   : > { %v3860_v20 = vpop.f32.mrb[78].mxu0 }
0x1c43   : > { %v6818_v21 = vadd.f32 %v3860_v20, %v6725_v5  ;;  %v5604_v22 = vpop.f32.mrb[79].mxu0  ;;  %v5800_v5 = vld [vmem:[%s6969_s14 + $0x60] sm:$0xff]  }
0x1c44   : > { %5630 = vmatpush3.bf16.msra.mxu1 %v5800_v5 }
0x1c45   : > { %5631 = vmatprep.subr.bf16.mxu1 %v5903_v1 }
0x1c48   : > { %5632 = vmatpush3.bf16.msra.mxu1 %v5801_v34 }
0x1c49   : > { %5633 = vmatprep.subr.bf16.mxu1 %v5903_v1 }
0x1c4c   : > { %5634 = vmatpush3.bf16.msra.mxu1 %v5802_v35 }
0x1c4d   : > { %5635 = vmatprep.subr.bf16.mxu1 %v5903_v1 }
0x1c50   : > { %v4023_v24 = vpop.f32.mrb[80].mxu0  ;;  %5636 = vmatpush3.bf16.msra.mxu1 %v5803_v36 }
0x1c51   : > { %v5627_v25 = vpop.f32.mrb[81].mxu0  ;;  %v4024_v27 = vadd.f32 %v4993_v23, %v4023_v24  ;;  %5653 = vmatprep.subr.bf16.mxu1 %v5903_v1 }
0x1c52   : > { %v4026_v26 = vpop.f32.mrb[82].mxu0 }
0x1c53   : > { %v4027_v28 = vadd.f32 %v4993_v23, %v4026_v26  ;;  %v5628_v29 = vpop.f32.mrb[83].mxu0  ;;  %5638 = vmatmul.mubr.msk.bf16.vlgmr.msra.gmra.mrb[92].mxu1 %vm911_vm1, %v6488_v14 }
0x1c54   : > { %5655 = vmatprep.mubr.msk.bf16.mxu1 %vm5904_vm0, %v5903_v1  ;;  %5654 = vmatpush3.bf16.msra.mxu1 %v5804_v38  ;;  %v5815_v38 = vld [vmem:[%s6979_s24 + $0x30] sm:$0xff]  }
0x1c55   : > { %v4113_v32 = vpack.c.bf16 %v4027_v28, %v4024_v27  ;;  %5671 = vmatprep.subr.bf16.mxu1 %v5903_v1 }
0x1c57   : > { %v4118_v2 = vsel %vm1118_vm2, %v4113_v32, 0 }
0x1c58   : > { %5642 = vmatpush3.bf16.xpose.msra.mxu0 %v4118_v2 }
0x1c59   : > { %5647 = vmatprep.subr.bf16.mxu0 %v5903_v1 }
0x1c5f   : > { %5644 = vmatmul.mubr.msk.bf16.vlgmr.msra.gmra.mrb[84].mxu0 %vm1118_vm2, %v4112_v11 }
0x1c60   : > { %5649 = vmatprep.mubr.msk.bf16.mxu0 %vm5904_vm0, %v5903_v1 }
0x1d26   : > { %v4105_v58 = vpop.f32.mrb[92].mxu1 }
0x1d27   : > { %v5639_v59 = vpop.f32.mrb[93].mxu1  ;;  %v4106_v54 = vadd.f32 %v5008_v61, %v4105_v58 }
0x1d28   : > { %v4108_v60 = vpop.f32.mrb[94].mxu1 }
0x1d29   : > { %v5640_v51 = vpop.f32.mrb[95].mxu1  ;;  %v4109_v62 = vadd.f32 %v5008_v61, %v4108_v60  ;;  %v5022_v61 = vld [vmem:[%s6976_s21] ss:$0 sm:$0xff] }
0x1d2b   : > { %v4186_v63 = vpack.c.bf16 %v4109_v62, %v4106_v54 }
0x1d2d   : > { %5648 = vmatpush3.bf16.msra.mxu0 %v4186_v63 }
0x1d2e   : > { %5659 = vmatprep.subr.bf16.mxu0 %v5903_v1 }
0x1d32   : > { %v4154_v37 = vpop.f32.mrb[84].mxu0 }
0x1d33   : > { %v4161_v39 = vmul.f32 0.25, %v4154_v37  ;;  %v5645_v40 = vpop.f32.mrb[85].mxu0  ;;  %v5806_v37 = vld [vmem:[%s6977_s22 + $0x8] sm:$0xff]  }
0x1d34   : > { %v4157_v42 = vpop.f32.mrb[86].mxu0  ;;  %v5808_v40 = vld [vmem:[%s6977_s22 + $0x18] sm:$0xff]  }
0x1d35   : > { %v4162_v43 = vmul.f32 0.25, %v4157_v42  ;;  %v5646_v44 = vpop.f32.mrb[87].mxu0  ;;  %v4163_v45 = vsel %vm1118_vm2, %v4161_v39, -inf  ;;  %v5809_v42 = vld [vmem:[%s6979_s24] sm:$0xff]  }
0x1d36   : > { %4164 = vmax.xlane.f32.xlu0 %v4163_v45  ;;  %v5811_v44 = vld [vmem:[%s6979_s24 + $0x10] sm:$0xff]   ;;  %v5812_v45 = vld [vmem:[%s6979_s24 + $0x18] sm:$0xff]  }
0x1d37   : > { %v4166_v46 = vsel %vm1118_vm2, %v4162_v43, -inf }
0x1d38   : > { %4167 = vmax.xlane.f32.xlu1 %v4166_v46  ;;  %v5813_v46 = vld [vmem:[%s6979_s24 + $0x20] sm:$0xff]  }
0x1dc3   : > { %v4165_v47 = vpop.xlane.xlu0 %4164 }
0x1dc4   : > { %v4169_v48 = vsub.f32 %v4161_v39, %v4165_v47  ;;  %v5807_v39 = vld [vmem:[%s6977_s22 + $0x10] sm:$0xff]   ;;  %v5814_v47 = vld [vmem:[%s6979_s24 + $0x28] sm:$0xff]  }
0x1dc5   : > { %v4168_v49 = vpop.xlane.xlu1 %4167 }
0x1dc6   : > { %v4171_v50 = vmul.f32 1.442695, %v4169_v48  ;;  %v4170_v14 = vsub.f32 %v4162_v43, %v4168_v49  ;;  %v5810_v43 = vld [vmem:[%s6979_s24 + $0x8] sm:$0xff]  }
0x1dc8   : > { %5877 = vpow2.f32 %v4171_v50  ;;  %v4173_v52 = vmul.f32 1.442695, %v4170_v14 }
0x1dca   : > { %5879 = vpow2.f32 %v4173_v52 }
0x1dd2   : > { %v5878_v53 = vpop.eup %5877 }
0x1dd3   : > { %v4175_v55 = vsel %vm1118_vm2, %v5878_v53, 0.0 }
0x1dd4   : > { %v5880_v56 = vpop.eup %5879  ;;  %4176 = vadd.xlane.f32.xlu0 %v4175_v55 }
0x1dd5   : > { %v4178_v57 = vsel %vm1118_vm2, %v5880_v56, 0.0 }
0x1dd6   : > { %4179 = vadd.xlane.f32.xlu1 %v4178_v57 }
0x1e61   : > { %v4177_v41 = vpop.xlane.xlu0 %4176 }
0x1e62   : > { %5881 = vrcp.f32 %v4177_v41  ;;  %v5816_v41 = vld [vmem:[%s6979_s24 + $0x38] sm:$0xff]  }
0x1e63   : > { %v4180_v0 = vpop.xlane.xlu1 %4179 }
0x1e64   : > { %5883 = vrcp.f32 %v4180_v0  ;;  %v5023_v0 = vld [vmem:[%s6978_s23] ss:$0 sm:$0xff] }
0x1e6c   : > { %v5882_v3 = vpop.eup %5881 }
0x1e6d   : > { %v4183_v6 = vmul.f32 %v5882_v3, %v5878_v53 }
0x1e6e   : > { %v5884_v4 = vpop.eup %5883 }
0x1e6f   : > { %v4184_v33 = vmul.f32 %v5884_v4, %v5880_v56  ;;  %v5021_v56 = vld [vmem:[%s6975_s20] ss:$0 sm:$0xff] }
0x1e71   : > { %v4185_v7 = vpack.c.bf16 %v4184_v33, %v4183_v6 }
0x1e73   : > { %5650 = vmatmul.mubr.msk.bf16.vlgmr.msra.gmra.mrb[88].mxu0 %vm1118_vm2, %v4185_v7 }
0x1e74   : > { %5667 = vmatprep.mubr.msk.bf16.mxu0 %vm5904_vm0, %v5903_v1 }
0x1f46   : > { %v4224_v8 = vpop.f32.mrb[88].mxu0 }
0x1f47   : > { %v5651_v9 = vpop.f32.mrb[89].mxu0 }
0x1f48   : > { %v4227_v10 = vpop.f32.mrb[90].mxu0 }
0x1f49   : > { %v4234_v12 = vpack.c.bf16 %v4227_v10, %v4224_v8  ;;  %v5652_v13 = vpop.f32.mrb[91].mxu0 }
0x1f4b   : > { %5656 = vmatmul.mubr.msk.bf16.vlgmr.msra.gmra.mrb[96].mxu1 %vm1118_vm2, %v4234_v12 }
0x1f4c   : > { %5687 = vmatprep.mubr.msk.bf16.mxu1 %vm5904_vm0, %v5903_v1  ;;  %5672 = vmatpush3.bf16.msra.mxu1 %v5809_v42 }
0x1f4d   : > { %5673 = vmatprep.subr.bf16.mxu1 %v5903_v1 }
0x1f50   : > { %5674 = vmatpush3.bf16.msra.mxu1 %v5810_v43 }
0x1f51   : > { %5675 = vmatprep.subr.bf16.mxu1 %v5903_v1 }
0x1f54   : > { %5676 = vmatpush3.bf16.msra.mxu1 %v5811_v44  ;;  %v5039_v44 = vld [vmem:[%s7027_s27] ss:$0 sm:$0xff] }
0x1f55   : > { %5677 = vmatprep.subr.bf16.mxu1 %v5903_v1 }
0x1f58   : > { %5678 = vmatpush3.bf16.msra.mxu1 %v5812_v45 }
0x1f59   : > { %5679 = vmatprep.subr.bf16.mxu1 %v5903_v1 }
0x1f5c   : > { %5680 = vmatpush3.bf16.msra.mxu1 %v5813_v46 }
0x1f5d   : > { %5681 = vmatprep.subr.bf16.mxu1 %v5903_v1 }
0x1f60   : > { %5682 = vmatpush3.bf16.msra.mxu1 %v5814_v47 }
0x1f61   : > { %5683 = vmatprep.subr.bf16.mxu1 %v5903_v1 }
0x1f64   : > { %5684 = vmatpush3.bf16.msra.mxu1 %v5815_v38 }
0x1f65   : > { %5685 = vmatprep.subr.bf16.mxu1 %v5903_v1 }
0x1f68   : > { %5686 = vmatpush3.bf16.msra.mxu1 %v5816_v41 }
0x201e   : > { %v4278_v15 = vpop.f32.mrb[96].mxu1 }
0x201f   : > { %v4285_v11 = vadd.f32 %v4278_v15, %v6815_v18  ;;  %v5657_v17 = vpop.f32.mrb[97].mxu1 }
0x2020   : > { %v4281_v19 = vpop.f32.mrb[98].mxu1 }
0x2021   : > { %v4294_v20 = vadd.f32 %v5020_v16, %v4285_v11  ;;  %v4286_v22 = vadd.f32 %v4281_v19, %v6818_v21  ;;  %v5658_v23 = vpop.f32.mrb[99].mxu1 }
0x2023   : > { %v4295_v24 = vadd.f32 %v5020_v16, %v4286_v22  ;;  %v4296_v25 = vadd.f32 %v4294_v20, %v6510_v30 }
0x2025   : > { %v4298_v26 = vsel %vm911_vm1, %v4296_v25, 0.0  ;;  %v4297_v27 = vadd.f32 %v4295_v24, %v6512_v31  ;;  %v5805_v31 = vld [vmem:[%s6977_s22] sm:$0xff]  }
0x2026   : > { %4299 = vadd.xlane.f32.xlu0 %v4298_v26  ;;  %5660 = vmatpush3.bf16.msra.mxu0 %v5805_v31 }
0x2027   : > { %v4301_v28 = vsel %vm911_vm1, %v4297_v27, 0.0  ;;  %5661 = vmatprep.subr.bf16.mxu0 %v5903_v1 }
0x2028   : > { %4302 = vadd.xlane.f32.xlu1 %v4301_v28 }
0x202a   : > { %5662 = vmatpush3.bf16.msra.mxu0 %v5806_v37 }
0x202b   : > { %5663 = vmatprep.subr.bf16.mxu0 %v5903_v1 }
0x202e   : > { %5664 = vmatpush3.bf16.msra.mxu0 %v5807_v39 }
0x202f   : > { %5665 = vmatprep.subr.bf16.mxu0 %v5903_v1  ;;  %v5029_v1 = vld [vmem:[%s6980_s25] ss:$0 sm:$0xff] }
0x2032   : > { %5666 = vmatpush3.bf16.msra.mxu0 %v5808_v40  ;;  %v5038_v40 = vld [vmem:[%s6981_s26] ss:$0 sm:$0xff] }
0x20b3   : > { %v4300_v29 = vpop.xlane.xlu0 %4299 }
0x20b4   : > { %v4304_v32 = vmul.f32 0.015625, %v4300_v29 }
0x20b5   : > { %v4303_v18 = vpop.xlane.xlu1 %4302 }
0x20b6   : > { %v4306_v2 = vsub.f32 %v4296_v25, %v4304_v32  ;;  %v4305_v5 = vmul.f32 0.015625, %v4303_v18 }
0x20b8   : > { %v4307_v34 = vsub.f32 %v4297_v27, %v4305_v5  ;;  %v4308_v35 = vmul.f32 %v4306_v2, %v4306_v2 }
0x20ba   : > { %v4310_v21 = vsel %vm911_vm1, %v4308_v35, 0.0  ;;  %v4309_v36 = vmul.f32 %v4307_v34, %v4307_v34 }
0x20bb   : > { %4311 = vadd.xlane.f32.xlu0 %v4310_v21 }
0x20bc   : > { %v4313_v30 = vsel %vm911_vm1, %v4309_v36, 0.0 }
0x20bd   : > { %4314 = vadd.xlane.f32.xlu1 %v4313_v30 }
0x2148   : > { %v4312_v48 = vpop.xlane.xlu0 %4311 }
0x2149   : > { %v4316_v49 = vmul.f32 0.015625, %v4312_v48 }
0x214a   : > { %v4315_v50 = vpop.xlane.xlu1 %4314 }
0x214b   : > { %v4318_v14 = vadd.f32 1e-05, %v4316_v49  ;;  %v4317_v52 = vmul.f32 0.015625, %v4315_v50 }
0x214d   : > { %5885 = vrsqrt.f32 %v4318_v14  ;;  %v4319_v53 = vadd.f32 1e-05, %v4317_v52 }
0x214f   : > { %5887 = vrsqrt.f32 %v4319_v53 }
0x2157   : > { %v5886_v55 = vpop.eup %5885 }
0x2158   : > { %v4322_v57 = vmul.f32 %v5886_v55, %v4306_v2 }
0x2159   : > { %v5888_v58 = vpop.eup %5887 }
0x215a   : > { %v4331_v59 = vmul.f32 %v5021_v56, %v4322_v57  ;;  %v4323_v60 = vmul.f32 %v5888_v58, %v4307_v34 }
0x215c   : > { %v4332_v51 = vmul.f32 %v5021_v56, %v4323_v60  ;;  %v4340_v54 = vadd.f32 %v5022_v61, %v4331_v59 }
0x215e   : > { %v4341_v62 = vadd.f32 %v5022_v61, %v4332_v51 }
0x2160   : > { %v4350_v63 = vpack.c.bf16 %v4341_v62, %v4340_v54 }
0x2162   : > { %5668 = vmatmul.mubr.msk.bf16.vlgmr.msra.gmra.mrb[92].mxu0 %vm911_vm1, %v4350_v63 }
0x2235   : > { %v4419_v3 = vpop.f32.mrb[92].mxu0 }
0x2236   : > { %v4420_v4 = vadd.f32 %v5023_v0, %v4419_v3  ;;  %v5669_v6 = vpop.f32.mrb[93].mxu0 }
0x2237   : > { %v4422_v33 = vpop.f32.mrb[94].mxu0 }
0x2238   : > { %v4423_v7 = vadd.f32 %v5023_v0, %v4422_v33  ;;  %v5670_v8 = vpop.f32.mrb[95].mxu0  ;;  %v4426_v9 = vmax.f32 %v4420_v4, 0.0 }
0x223a   : > { %v4427_v10 = vmax.f32 %v4423_v7, 0.0 }
0x223c   : > { %v4444_v12 = vpack.c.bf16 %v4427_v10, %v4426_v9 }
0x223e   : > { %5688 = vmatmul.mubr.bf16.vlgmr.msra.gmra.mrb[100].mxu1 %v4444_v12 }
0x2311   : > { %v4534_v13 = vpop.f32.mrb[100].mxu1 }
0x2312   : > { %v4535_v15 = vadd.f32 %v5029_v1, %v4534_v13  ;;  %v5689_v16 = vpop.f32.mrb[101].mxu1 }
0x2313   : > { %v4537_v11 = vpop.f32.mrb[102].mxu1 }
0x2314   : > { %v4538_v17 = vadd.f32 %v5029_v1, %v4537_v11  ;;  %v5690_v19 = vpop.f32.mrb[103].mxu1  ;;  %v4541_v20 = vadd.f32 %v4535_v15, %v4340_v54 }
0x2316   : > { %v4543_v22 = vsel %vm911_vm1, %v4541_v20, 0.0  ;;  %v4542_v23 = vadd.f32 %v4538_v17, %v4341_v62 }
0x2317   : > { %4544 = vadd.xlane.f32.xlu0 %v4543_v22 }
0x2318   : > { %v4546_v24 = vsel %vm911_vm1, %v4542_v23, 0.0 }
0x2319   : > { %4547 = vadd.xlane.f32.xlu1 %v4546_v24 }
0x23a4   : > { %v4545_v25 = vpop.xlane.xlu0 %4544 }
0x23a5   : > { %v4549_v26 = vmul.f32 0.015625, %v4545_v25 }
0x23a6   : > { %v4548_v27 = vpop.xlane.xlu1 %4547 }
0x23a7   : > { %v4551_v28 = vsub.f32 %v4541_v20, %v4549_v26  ;;  %v4550_v29 = vmul.f32 0.015625, %v4548_v27 }
0x23a9   : > { %v4552_v32 = vsub.f32 %v4542_v23, %v4550_v29  ;;  %v4553_v18 = vmul.f32 %v4551_v28, %v4551_v28 }
0x23ab   : > { %v4555_v2 = vsel %vm911_vm1, %v4553_v18, 0.0  ;;  %v4554_v5 = vmul.f32 %v4552_v32, %v4552_v32 }
0x23ac   : > { %4556 = vadd.xlane.f32.xlu0 %v4555_v2 }
0x23ad   : > { %v4558_v34 = vsel %vm911_vm1, %v4554_v5, 0.0 }
0x23ae   : > { %4559 = vadd.xlane.f32.xlu1 %v4558_v34 }
0x2439   : > { %v4557_v35 = vpop.xlane.xlu0 %4556 }
0x243a   : > { %v4561_v21 = vmul.f32 0.015625, %v4557_v35 }
0x243b   : > { %v4560_v36 = vpop.xlane.xlu1 %4559 }
0x243c   : > { %v4563_v30 = vadd.f32 1e-05, %v4561_v21  ;;  %v4562_v31 = vmul.f32 0.015625, %v4560_v36 }
0x243e   : > { %5889 = vrsqrt.f32 %v4563_v30  ;;  %v4564_v37 = vadd.f32 1e-05, %v4562_v31 }
0x2440   : > { %5891 = vrsqrt.f32 %v4564_v37 }
0x2448   : > { %v5890_v39 = vpop.eup %5889 }
0x2449   : > { %v4567_v42 = vmul.f32 %v5890_v39, %v4551_v28 }
0x244a   : > { %v5892_v43 = vpop.eup %5891 }
0x244b   : > { %v4576_v45 = vmul.f32 %v5038_v40, %v4567_v42  ;;  %v4568_v46 = vmul.f32 %v5892_v43, %v4552_v32 }
0x244d   : > { %v4585_v47 = vadd.f32 %v5039_v44, %v4576_v45  ;;  %v4577_v48 = vmul.f32 %v5038_v40, %v4568_v46 }
0x244f   : > { %4587 = vst.msk [vmem:[%s865_s7] sm:$0xff] %vm911_vm1, %v4585_v47  ;;  %v4586_v49 = vadd.f32 %v5039_v44, %v4577_v48 }
0x2451   : > { %4588 = vst.msk [vmem:[%s865_s7 + $0x8] sm:$0xff] %vm911_vm1, %v4586_v49 }
0x2452 PF: > { %s7029_s3 = sld [smem:[#allocation2_spill]] }
0x2458   : > { %s38_s8 = sadd.s32 1, %s7029_s3  }
0x2459   : > { %p35_p4 = scmp.ge.s32.totalorder %s38_s8, 4  }
0x245b   :  { %37 = sbr.rel (!%p35_p4) target bundleno = 16 (0x10), region = 207 }

</bundles_post_ra>
